<compile_context>
chip_gen: v7x
topology: tpu7x:2x2x1
jax: 0.10.0
libtpu: 0.0.40
codegen_flags: <defaults>
</compile_context>

<pallas_src>
import jax
import jax.numpy as jnp
import numpy as np
from jax.experimental import pallas as pl
from jax.experimental.pallas import tpu as pltpu


# --------------------------- fused GRU + Linear kernel ---------------------------

def _build_kernel(num_layers, T, Bp, H):
    """Ref order: x2d, then per layer (wih_r, wih_z, wih_n, whh_r, whh_z, whh_n,
    b_r, b_z, bi_n, bh_n), then wout, bout, o_ref."""
    NPL = 10  # refs per layer

    def kernel(*refs):
        x_ref = refs[0]
        layer_refs = [refs[1 + NPL * l: 1 + NPL * (l + 1)] for l in range(num_layers)]
        wout_ref, bout_ref, o_ref = refs[1 + NPL * num_layers: 4 + NPL * num_layers]

        def sig(v):                                   # sigmoid as ONE EUP tanh push
            return 0.5 * jnp.tanh(0.5 * v) + 0.5

        # Load all layer params once; hoist (1,H)->(Bp,H) bias broadcasts out of the
        # unrolled loops (JAX does not CSE broadcast_in_dim).
        L = []
        for l in range(num_layers):
            (wih_r, wih_z, wih_n, whh_r, whh_z, whh_n,
             b_r, b_z, bi_n, bh_n) = (ref[...] for ref in layer_refs[l])
            L.append(dict(
                wih_r=wih_r, wih_z=wih_z, wih_n=wih_n,
                whh_r=whh_r, whh_z=whh_z, whh_n=whh_n,
                b_r=jnp.broadcast_to(b_r, (Bp, H)),
                b_z=jnp.broadcast_to(b_z, (Bp, H)),
                bi_n=jnp.broadcast_to(bi_n, (Bp, H)),
                bh_n=jnp.broadcast_to(bh_n, (Bp, H)),
            ))

        def cell(h, gi_r, gi_z, gi_n, w):
            # Recurrent path: 3 independent tiny MXU matmuls + 3 EUP pushes, all
            # lane-aligned at [0,H) (no intra-vreg gate slicing).
            gh_r = jnp.dot(h, w["whh_r"], preferred_element_type=jnp.float32)
            gh_z = jnp.dot(h, w["whh_z"], preferred_element_type=jnp.float32)
            gh_n = jnp.dot(h, w["whh_n"], preferred_element_type=jnp.float32) + w["bh_n"]
            r = sig(gi_r + gh_r)
            z = sig(gi_z + gh_z)
            n = jnp.tanh(gi_n + r * gh_n)
            return (1.0 - z) * n + z * h

        # Layer 0: input projection hoisted over ALL timesteps (off the recurrent
        # critical path). b_hh for r/z is already folded into b_r/b_z at init.
        x = x_ref[...].astype(jnp.float32)                        # (T*Bp, D)
        w0 = L[0]
        gi_r0 = jnp.dot(x, w0["wih_r"], preferred_element_type=jnp.float32) + layer_refs[0][6][...]
        gi_z0 = jnp.dot(x, w0["wih_z"], preferred_element_type=jnp.float32) + layer_refs[0][7][...]
        gi_n0 = jnp.dot(x, w0["wih_n"], preferred_element_type=jnp.float32) + layer_refs[0][8][...]

        # Time-major wavefront: per-timestep handoff between layers stays in vregs,
        # so layer l step t and layer l-1 step t+1 overlap (no VMEM round trip).
        h = [jnp.zeros((Bp, H), jnp.float32) for _ in range(num_layers)]
        for t in range(T):
            lo, hi = t * Bp, (t + 1) * Bp                          # 8-sublane aligned
            h[0] = cell(h[0], gi_r0[lo:hi, :], gi_z0[lo:hi, :], gi_n0[lo:hi, :], w0)
            for l in range(1, num_layers):
                w = L[l]
                x_t = h[l - 1]
                gi_r = jnp.dot(x_t, w["wih_r"], preferred_element_type=jnp.float32) + w["b_r"]
                gi_z = jnp.dot(x_t, w["wih_z"], preferred_element_type=jnp.float32) + w["b_z"]
                gi_n = jnp.dot(x_t, w["wih_n"], preferred_element_type=jnp.float32) + w["bi_n"]
                h[l] = cell(h[l], gi_r, gi_z, gi_n, w)

        # Fused Linear on the last layer's last hidden state. Output is zero-padded
        # to 128 lanes -> single unmasked lane-dense store.
        out = (jnp.dot(h[-1], wout_ref[...], preferred_element_type=jnp.float32)
               + bout_ref[...])
        o_ref[...] = out.astype(o_ref.dtype)

    return kernel


def model_forward(params, input_seq):
    """input_seq: (B, T, input_size), batch_first — same as the PyTorch module."""
    B, T, D = input_seq.shape
    gl = params["gru"]
    num_layers = len(gl)
    H = gl[0]["whh_r"].shape[0]
    O = params["out"]["w"].shape[1]

    B_pad = max(8, ((B + 7) // 8) * 8)        # sublane granularity
    O_pad = max(128, ((O + 127) // 128) * 128)  # lane-dense output store

    # Time-major, batch padded to B_pad with zeros: row index = t*B_pad + b.
    x = jnp.transpose(input_seq, (1, 0, 2)).astype(jnp.float32)      # (T, B, D)
    x = jnp.pad(x, ((0, 0), (0, B_pad - B), (0, 0)))
    x2d = x.reshape(T * B_pad, D)

    w_out = jnp.pad(params["out"]["w"].astype(jnp.float32), ((0, 0), (0, O_pad - O)))
    b_out = jnp.pad(params["out"]["b"].astype(jnp.float32), ((0, 0), (0, O_pad - O)))

    flat = [x2d]
    for lp in gl:
        flat += [lp["wih_r"], lp["wih_z"], lp["wih_n"],
                 lp["whh_r"], lp["whh_z"], lp["whh_n"],
                 lp["b_r"], lp["b_z"], lp["bi_n"], lp["bh_n"]]
    flat += [w_out, b_out]

    kernel = _build_kernel(num_layers, T, B_pad, H)
    vmem = pl.BlockSpec(memory_space=pltpu.MemorySpace.VMEM)

    out_pad = pl.pallas_call(
        kernel,
        out_shape=jax.ShapeDtypeStruct((B_pad, O_pad), jnp.float32),
        in_specs=[vmem] * len(flat),
        out_specs=vmem,
    )(*flat)
    return out_pad[:B, :O].astype(input_seq.dtype)


# ------------------------------ parameters ----------------------------------

def init_params(key, input_size, hidden_size, output_size, num_layers):
    """PyTorch-style init (gate order [r, z, n]), but stored pre-transposed and
    pre-split per gate, with b_hh folded into the r/z biases (done ONCE here)."""
    H = hidden_size
    params = {"gru": [], "out": {}}
    k = 1.0 / np.sqrt(H)
    for layer in range(num_layers):
        d_in = input_size if layer == 0 else H
        key, k1, k2, k3, k4 = jax.random.split(key, 5)
        w_ih = jax.random.uniform(k1, (3 * H, d_in), jnp.float32, -k, k)
        w_hh = jax.random.uniform(k2, (3 * H, H), jnp.float32, -k, k)
        b_ih = jax.random.uniform(k3, (3 * H,), jnp.float32, -k, k)
        b_hh = jax.random.uniform(k4, (3 * H,), jnp.float32, -k, k)
        wih_t = jnp.transpose(w_ih)        # (d_in, 3H), columns [r|z|n]
        whh_t = jnp.transpose(w_hh)        # (H, 3H)
        params["gru"].append(dict(
            wih_r=wih_t[:, 0:H], wih_z=wih_t[:, H:2 * H], wih_n=wih_t[:, 2 * H:3 * H],
            whh_r=whh_t[:, 0:H], whh_z=whh_t[:, H:2 * H], whh_n=whh_t[:, 2 * H:3 * H],
            b_r=(b_ih[0:H] + b_hh[0:H]).reshape(1, H),
            b_z=(b_ih[H:2 * H] + b_hh[H:2 * H]).reshape(1, H),
            bi_n=b_ih[2 * H:3 * H].reshape(1, H),
            bh_n=b_hh[2 * H:3 * H].reshape(1, H),
        ))
    key, k1, k2 = jax.random.split(key, 3)
    w = jax.random.uniform(k1, (output_size, H), jnp.float32, -k, k)
    b = jax.random.uniform(k2, (output_size,), jnp.float32, -k, k)
    params["out"] = dict(w=jnp.transpose(w),          # (H, O)
                         b=b.reshape(1, output_size))
    return params


# -------------------------- pure-JAX reference check -------------------------

def model_forward_ref(params, input_seq):
    x = jnp.transpose(input_seq, (1, 0, 2)).astype(jnp.float32)  # (T, B, D)
    T, B, _ = x.shape
    for lp in params["gru"]:
        H = lp["whh_r"].shape[0]
        h = jnp.zeros((B, H), jnp.float32)
        ys = []
        for t in range(T):
            x_t = x[t]
            r = jax.nn.sigmoid(x_t @ lp["wih_r"] + h @ lp["whh_r"] + lp["b_r"])
            z = jax.nn.sigmoid(x_t @ lp["wih_z"] + h @ lp["whh_z"] + lp["b_z"])
            n = jnp.tanh(x_t @ lp["wih_n"] + lp["bi_n"] + r * (h @ lp["whh_n"] + lp["bh_n"]))
            h = (1.0 - z) * n + z * h
            ys.append(h)
        x = jnp.stack(ys, axis=0)
    return x[-1] @ params["out"]["w"] + params["out"]["b"]


# ---------------------------------- main -------------------------------------

if __name__ == "__main__":
    batch, seq_len = 2, 8
    input_size, hidden_size, output_size, num_layers = 16, 32, 4, 2

    key = jax.random.PRNGKey(0)
    key, pkey, xkey = jax.random.split(key, 3)
    params = init_params(pkey, input_size, hidden_size, output_size, num_layers)
    x = jax.random.normal(xkey, (batch, seq_len, input_size), jnp.float32)

    out = jax.block_until_ready(model_forward(params, x))
    ref = jax.block_until_ready(model_forward_ref(params, x))

    assert out.shape == (batch, output_size)
    np.testing.assert_allclose(np.asarray(out), np.asarray(ref), rtol=1e-4, atol=1e-4)

    print("KERNEL_OK")
</pallas_src>

<mosaic_0001>
module attributes {stable_mosaic.version = 11 : i64} {
  func.func @kernel(%arg0: memref<64x16xf32, #tpu.memory_space<vmem>>, %arg1: memref<16x32xf32, #tpu.memory_space<vmem>>, %arg2: memref<16x32xf32, #tpu.memory_space<vmem>>, %arg3: memref<16x32xf32, #tpu.memory_space<vmem>>, %arg4: memref<32x32xf32, #tpu.memory_space<vmem>>, %arg5: memref<32x32xf32, #tpu.memory_space<vmem>>, %arg6: memref<32x32xf32, #tpu.memory_space<vmem>>, %arg7: memref<1x32xf32, #tpu.memory_space<vmem>>, %arg8: memref<1x32xf32, #tpu.memory_space<vmem>>, %arg9: memref<1x32xf32, #tpu.memory_space<vmem>>, %arg10: memref<1x32xf32, #tpu.memory_space<vmem>>, %arg11: memref<32x32xf32, #tpu.memory_space<vmem>>, %arg12: memref<32x32xf32, #tpu.memory_space<vmem>>, %arg13: memref<32x32xf32, #tpu.memory_space<vmem>>, %arg14: memref<32x32xf32, #tpu.memory_space<vmem>>, %arg15: memref<32x32xf32, #tpu.memory_space<vmem>>, %arg16: memref<32x32xf32, #tpu.memory_space<vmem>>, %arg17: memref<1x32xf32, #tpu.memory_space<vmem>>, %arg18: memref<1x32xf32, #tpu.memory_space<vmem>>, %arg19: memref<1x32xf32, #tpu.memory_space<vmem>>, %arg20: memref<1x32xf32, #tpu.memory_space<vmem>>, %arg21: memref<32x128xf32, #tpu.memory_space<vmem>>, %arg22: memref<1x128xf32, #tpu.memory_space<vmem>>, %arg23: memref<8x128xf32, #tpu.memory_space<vmem>>) attributes {dimension_semantics = [], scalar_prefetch = 0 : i64, scratch_operands = 0 : i64, tpu.core_type = #tpu.core_type<tc>} {
    %c0 = arith.constant 0 : index
    %c0_0 = arith.constant 0 : index
    %0 = vector.load %arg1[%c0, %c0_0] : memref<16x32xf32, #tpu.memory_space<vmem>>, vector<16x32xf32>
    %c0_1 = arith.constant 0 : index
    %c0_2 = arith.constant 0 : index
    %1 = vector.load %arg2[%c0_1, %c0_2] : memref<16x32xf32, #tpu.memory_space<vmem>>, vector<16x32xf32>
    %c0_3 = arith.constant 0 : index
    %c0_4 = arith.constant 0 : index
    %2 = vector.load %arg3[%c0_3, %c0_4] : memref<16x32xf32, #tpu.memory_space<vmem>>, vector<16x32xf32>
    %c0_5 = arith.constant 0 : index
    %c0_6 = arith.constant 0 : index
    %3 = vector.load %arg4[%c0_5, %c0_6] : memref<32x32xf32, #tpu.memory_space<vmem>>, vector<32x32xf32>
    %c0_7 = arith.constant 0 : index
    %c0_8 = arith.constant 0 : index
    %4 = vector.load %arg5[%c0_7, %c0_8] : memref<32x32xf32, #tpu.memory_space<vmem>>, vector<32x32xf32>
    %c0_9 = arith.constant 0 : index
    %c0_10 = arith.constant 0 : index
    %5 = vector.load %arg6[%c0_9, %c0_10] : memref<32x32xf32, #tpu.memory_space<vmem>>, vector<32x32xf32>
    %c0_11 = arith.constant 0 : index
    %c0_12 = arith.constant 0 : index
    %6 = vector.load %arg10[%c0_11, %c0_12] : memref<1x32xf32, #tpu.memory_space<vmem>>, vector<1x32xf32>
    %7 = vector.shape_cast %6 : vector<1x32xf32> to vector<1x32xf32>
    %8 = vector.broadcast %7 : vector<1x32xf32> to vector<8x32xf32>
    %c0_13 = arith.constant 0 : index
    %c0_14 = arith.constant 0 : index
    %9 = vector.load %arg11[%c0_13, %c0_14] : memref<32x32xf32, #tpu.memory_space<vmem>>, vector<32x32xf32>
    %c0_15 = arith.constant 0 : index
    %c0_16 = arith.constant 0 : index
    %10 = vector.load %arg12[%c0_15, %c0_16] : memref<32x32xf32, #tpu.memory_space<vmem>>, vector<32x32xf32>
    %c0_17 = arith.constant 0 : index
    %c0_18 = arith.constant 0 : index
    %11 = vector.load %arg13[%c0_17, %c0_18] : memref<32x32xf32, #tpu.memory_space<vmem>>, vector<32x32xf32>
    %c0_19 = arith.constant 0 : index
    %c0_20 = arith.constant 0 : index
    %12 = vector.load %arg14[%c0_19, %c0_20] : memref<32x32xf32, #tpu.memory_space<vmem>>, vector<32x32xf32>
    %c0_21 = arith.constant 0 : index
    %c0_22 = arith.constant 0 : index
    %13 = vector.load %arg15[%c0_21, %c0_22] : memref<32x32xf32, #tpu.memory_space<vmem>>, vector<32x32xf32>
    %c0_23 = arith.constant 0 : index
    %c0_24 = arith.constant 0 : index
    %14 = vector.load %arg16[%c0_23, %c0_24] : memref<32x32xf32, #tpu.memory_space<vmem>>, vector<32x32xf32>
    %c0_25 = arith.constant 0 : index
    %c0_26 = arith.constant 0 : index
    %15 = vector.load %arg17[%c0_25, %c0_26] : memref<1x32xf32, #tpu.memory_space<vmem>>, vector<1x32xf32>
    %c0_27 = arith.constant 0 : index
    %c0_28 = arith.constant 0 : index
    %16 = vector.load %arg18[%c0_27, %c0_28] : memref<1x32xf32, #tpu.memory_space<vmem>>, vector<1x32xf32>
    %c0_29 = arith.constant 0 : index
    %c0_30 = arith.constant 0 : index
    %17 = vector.load %arg19[%c0_29, %c0_30] : memref<1x32xf32, #tpu.memory_space<vmem>>, vector<1x32xf32>
    %c0_31 = arith.constant 0 : index
    %c0_32 = arith.constant 0 : index
    %18 = vector.load %arg20[%c0_31, %c0_32] : memref<1x32xf32, #tpu.memory_space<vmem>>, vector<1x32xf32>
    %19 = vector.shape_cast %15 : vector<1x32xf32> to vector<1x32xf32>
    %20 = vector.broadcast %19 : vector<1x32xf32> to vector<8x32xf32>
    %21 = vector.shape_cast %16 : vector<1x32xf32> to vector<1x32xf32>
    %22 = vector.broadcast %21 : vector<1x32xf32> to vector<8x32xf32>
    %23 = vector.shape_cast %17 : vector<1x32xf32> to vector<1x32xf32>
    %24 = vector.broadcast %23 : vector<1x32xf32> to vector<8x32xf32>
    %25 = vector.shape_cast %18 : vector<1x32xf32> to vector<1x32xf32>
    %26 = vector.broadcast %25 : vector<1x32xf32> to vector<8x32xf32>
    %c0_33 = arith.constant 0 : index
    %c0_34 = arith.constant 0 : index
    %27 = vector.load %arg0[%c0_33, %c0_34] : memref<64x16xf32, #tpu.memory_space<vmem>>, vector<64x16xf32>
    %cst = arith.constant dense<0.000000e+00> : vector<64x32xf32>
    %28 = tpu.matmul %27, %0, %cst {dimension_numbers = #tpu.dot_dimension_numbers<[1], [0], [0], [1], [0, 0, 1, 1], [], []>} : vector<64x16xf32>, vector<16x32xf32>, vector<64x32xf32> -> vector<64x32xf32>
    %c0_35 = arith.constant 0 : index
    %c0_36 = arith.constant 0 : index
    %29 = vector.load %arg7[%c0_35, %c0_36] : memref<1x32xf32, #tpu.memory_space<vmem>>, vector<1x32xf32>
    %30 = vector.broadcast %29 : vector<1x32xf32> to vector<64x32xf32>
    %31 = arith.addf %28, %30 : vector<64x32xf32>
    %cst_37 = arith.constant dense<0.000000e+00> : vector<64x32xf32>
    %32 = tpu.matmul %27, %1, %cst_37 {dimension_numbers = #tpu.dot_dimension_numbers<[1], [0], [0], [1], [0, 0, 1, 1], [], []>} : vector<64x16xf32>, vector<16x32xf32>, vector<64x32xf32> -> vector<64x32xf32>
    %c0_38 = arith.constant 0 : index
    %c0_39 = arith.constant 0 : index
    %33 = vector.load %arg8[%c0_38, %c0_39] : memref<1x32xf32, #tpu.memory_space<vmem>>, vector<1x32xf32>
    %34 = vector.broadcast %33 : vector<1x32xf32> to vector<64x32xf32>
    %35 = arith.addf %32, %34 : vector<64x32xf32>
    %cst_40 = arith.constant dense<0.000000e+00> : vector<64x32xf32>
    %36 = tpu.matmul %27, %2, %cst_40 {dimension_numbers = #tpu.dot_dimension_numbers<[1], [0], [0], [1], [0, 0, 1, 1], [], []>} : vector<64x16xf32>, vector<16x32xf32>, vector<64x32xf32> -> vector<64x32xf32>
    %c0_41 = arith.constant 0 : index
    %c0_42 = arith.constant 0 : index
    %37 = vector.load %arg9[%c0_41, %c0_42] : memref<1x32xf32, #tpu.memory_space<vmem>>, vector<1x32xf32>
    %38 = vector.broadcast %37 : vector<1x32xf32> to vector<64x32xf32>
    %39 = arith.addf %36, %38 : vector<64x32xf32>
    %cst_43 = arith.constant 0.000000e+00 : f32
    %40 = vector.broadcast %cst_43 : f32 to vector<8x32xf32>
    %cst_44 = arith.constant 0.000000e+00 : f32
    %41 = vector.broadcast %cst_44 : f32 to vector<8x32xf32>
    %42 = vector.extract_strided_slice %31 {offsets = [0, 0], sizes = [8, 32], strides = [1, 1]} : vector<64x32xf32> to vector<8x32xf32>
    %43 = vector.extract_strided_slice %35 {offsets = [0, 0], sizes = [8, 32], strides = [1, 1]} : vector<64x32xf32> to vector<8x32xf32>
    %44 = vector.extract_strided_slice %39 {offsets = [0, 0], sizes = [8, 32], strides = [1, 1]} : vector<64x32xf32> to vector<8x32xf32>
    %cst_45 = arith.constant dense<0.000000e+00> : vector<8x32xf32>
    %45 = tpu.matmul %40, %3, %cst_45 {dimension_numbers = #tpu.dot_dimension_numbers<[1], [0], [0], [1], [0, 0, 1, 1], [], []>} : vector<8x32xf32>, vector<32x32xf32>, vector<8x32xf32> -> vector<8x32xf32>
    %cst_46 = arith.constant dense<0.000000e+00> : vector<8x32xf32>
    %46 = tpu.matmul %40, %4, %cst_46 {dimension_numbers = #tpu.dot_dimension_numbers<[1], [0], [0], [1], [0, 0, 1, 1], [], []>} : vector<8x32xf32>, vector<32x32xf32>, vector<8x32xf32> -> vector<8x32xf32>
    %cst_47 = arith.constant dense<0.000000e+00> : vector<8x32xf32>
    %47 = tpu.matmul %40, %5, %cst_47 {dimension_numbers = #tpu.dot_dimension_numbers<[1], [0], [0], [1], [0, 0, 1, 1], [], []>} : vector<8x32xf32>, vector<32x32xf32>, vector<8x32xf32> -> vector<8x32xf32>
    %48 = arith.addf %47, %8 : vector<8x32xf32>
    %49 = arith.addf %42, %45 : vector<8x32xf32>
    %cst_48 = arith.constant 5.000000e-01 : f32
    %50 = vector.broadcast %cst_48 : f32 to vector<8x32xf32>
    %51 = arith.mulf %50, %49 : vector<8x32xf32>
    %52 = math.tanh %51 : vector<8x32xf32>
    %cst_49 = arith.constant 5.000000e-01 : f32
    %53 = vector.broadcast %cst_49 : f32 to vector<8x32xf32>
    %54 = arith.mulf %53, %52 : vector<8x32xf32>
    %cst_50 = arith.constant 5.000000e-01 : f32
    %55 = vector.broadcast %cst_50 : f32 to vector<8x32xf32>
    %56 = arith.addf %54, %55 : vector<8x32xf32>
    %57 = arith.addf %43, %46 : vector<8x32xf32>
    %cst_51 = arith.constant 5.000000e-01 : f32
    %58 = vector.broadcast %cst_51 : f32 to vector<8x32xf32>
    %59 = arith.mulf %58, %57 : vector<8x32xf32>
    %60 = math.tanh %59 : vector<8x32xf32>
    %cst_52 = arith.constant 5.000000e-01 : f32
    %61 = vector.broadcast %cst_52 : f32 to vector<8x32xf32>
    %62 = arith.mulf %61, %60 : vector<8x32xf32>
    %cst_53 = arith.constant 5.000000e-01 : f32
    %63 = vector.broadcast %cst_53 : f32 to vector<8x32xf32>
    %64 = arith.addf %62, %63 : vector<8x32xf32>
    %65 = arith.mulf %56, %48 : vector<8x32xf32>
    %66 = arith.addf %44, %65 : vector<8x32xf32>
    %67 = math.tanh %66 : vector<8x32xf32>
    %cst_54 = arith.constant 1.000000e+00 : f32
    %68 = vector.broadcast %cst_54 : f32 to vector<8x32xf32>
    %69 = arith.subf %68, %64 : vector<8x32xf32>
    %70 = arith.mulf %69, %67 : vector<8x32xf32>
    %71 = arith.mulf %64, %40 : vector<8x32xf32>
    %72 = arith.addf %70, %71 : vector<8x32xf32>
    %cst_55 = arith.constant dense<0.000000e+00> : vector<8x32xf32>
    %73 = tpu.matmul %72, %9, %cst_55 {dimension_numbers = #tpu.dot_dimension_numbers<[1], [0], [0], [1], [0, 0, 1, 1], [], []>} : vector<8x32xf32>, vector<32x32xf32>, vector<8x32xf32> -> vector<8x32xf32>
    %74 = arith.addf %73, %20 : vector<8x32xf32>
    %cst_56 = arith.constant dense<0.000000e+00> : vector<8x32xf32>
    %75 = tpu.matmul %72, %10, %cst_56 {dimension_numbers = #tpu.dot_dimension_numbers<[1], [0], [0], [1], [0, 0, 1, 1], [], []>} : vector<8x32xf32>, vector<32x32xf32>, vector<8x32xf32> -> vector<8x32xf32>
    %76 = arith.addf %75, %22 : vector<8x32xf32>
    %cst_57 = arith.constant dense<0.000000e+00> : vector<8x32xf32>
    %77 = tpu.matmul %72, %11, %cst_57 {dimension_numbers = #tpu.dot_dimension_numbers<[1], [0], [0], [1], [0, 0, 1, 1], [], []>} : vector<8x32xf32>, vector<32x32xf32>, vector<8x32xf32> -> vector<8x32xf32>
    %78 = arith.addf %77, %24 : vector<8x32xf32>
    %cst_58 = arith.constant dense<0.000000e+00> : vector<8x32xf32>
    %79 = tpu.matmul %41, %12, %cst_58 {dimension_numbers = #tpu.dot_dimension_numbers<[1], [0], [0], [1], [0, 0, 1, 1], [], []>} : vector<8x32xf32>, vector<32x32xf32>, vector<8x32xf32> -> vector<8x32xf32>
    %cst_59 = arith.constant dense<0.000000e+00> : vector<8x32xf32>
    %80 = tpu.matmul %41, %13, %cst_59 {dimension_numbers = #tpu.dot_dimension_numbers<[1], [0], [0], [1], [0, 0, 1, 1], [], []>} : vector<8x32xf32>, vector<32x32xf32>, vector<8x32xf32> -> vector<8x32xf32>
    %cst_60 = arith.constant dense<0.000000e+00> : vector<8x32xf32>
    %81 = tpu.matmul %41, %14, %cst_60 {dimension_numbers = #tpu.dot_dimension_numbers<[1], [0], [0], [1], [0, 0, 1, 1], [], []>} : vector<8x32xf32>, vector<32x32xf32>, vector<8x32xf32> -> vector<8x32xf32>
    %82 = arith.addf %81, %26 : vector<8x32xf32>
    %83 = arith.addf %74, %79 : vector<8x32xf32>
    %cst_61 = arith.constant 5.000000e-01 : f32
    %84 = vector.broadcast %cst_61 : f32 to vector<8x32xf32>
    %85 = arith.mulf %84, %83 : vector<8x32xf32>
    %86 = math.tanh %85 : vector<8x32xf32>
    %cst_62 = arith.constant 5.000000e-01 : f32
    %87 = vector.broadcast %cst_62 : f32 to vector<8x32xf32>
    %88 = arith.mulf %87, %86 : vector<8x32xf32>
    %cst_63 = arith.constant 5.000000e-01 : f32
    %89 = vector.broadcast %cst_63 : f32 to vector<8x32xf32>
    %90 = arith.addf %88, %89 : vector<8x32xf32>
    %91 = arith.addf %76, %80 : vector<8x32xf32>
    %cst_64 = arith.constant 5.000000e-01 : f32
    %92 = vector.broadcast %cst_64 : f32 to vector<8x32xf32>
    %93 = arith.mulf %92, %91 : vector<8x32xf32>
    %94 = math.tanh %93 : vector<8x32xf32>
    %cst_65 = arith.constant 5.000000e-01 : f32
    %95 = vector.broadcast %cst_65 : f32 to vector<8x32xf32>
    %96 = arith.mulf %95, %94 : vector<8x32xf32>
    %cst_66 = arith.constant 5.000000e-01 : f32
    %97 = vector.broadcast %cst_66 : f32 to vector<8x32xf32>
    %98 = arith.addf %96, %97 : vector<8x32xf32>
    %99 = arith.mulf %90, %82 : vector<8x32xf32>
    %100 = arith.addf %78, %99 : vector<8x32xf32>
    %101 = math.tanh %100 : vector<8x32xf32>
    %cst_67 = arith.constant 1.000000e+00 : f32
    %102 = vector.broadcast %cst_67 : f32 to vector<8x32xf32>
    %103 = arith.subf %102, %98 : vector<8x32xf32>
    %104 = arith.mulf %103, %101 : vector<8x32xf32>
    %105 = arith.mulf %98, %41 : vector<8x32xf32>
    %106 = arith.addf %104, %105 : vector<8x32xf32>
    %107 = vector.extract_strided_slice %31 {offsets = [8, 0], sizes = [8, 32], strides = [1, 1]} : vector<64x32xf32> to vector<8x32xf32>
    %108 = vector.extract_strided_slice %35 {offsets = [8, 0], sizes = [8, 32], strides = [1, 1]} : vector<64x32xf32> to vector<8x32xf32>
    %109 = vector.extract_strided_slice %39 {offsets = [8, 0], sizes = [8, 32], strides = [1, 1]} : vector<64x32xf32> to vector<8x32xf32>
    %cst_68 = arith.constant dense<0.000000e+00> : vector<8x32xf32>
    %110 = tpu.matmul %72, %3, %cst_68 {dimension_numbers = #tpu.dot_dimension_numbers<[1], [0], [0], [1], [0, 0, 1, 1], [], []>} : vector<8x32xf32>, vector<32x32xf32>, vector<8x32xf32> -> vector<8x32xf32>
    %cst_69 = arith.constant dense<0.000000e+00> : vector<8x32xf32>
    %111 = tpu.matmul %72, %4, %cst_69 {dimension_numbers = #tpu.dot_dimension_numbers<[1], [0], [0], [1], [0, 0, 1, 1], [], []>} : vector<8x32xf32>, vector<32x32xf32>, vector<8x32xf32> -> vector<8x32xf32>
    %cst_70 = arith.constant dense<0.000000e+00> : vector<8x32xf32>
    %112 = tpu.matmul %72, %5, %cst_70 {dimension_numbers = #tpu.dot_dimension_numbers<[1], [0], [0], [1], [0, 0, 1, 1], [], []>} : vector<8x32xf32>, vector<32x32xf32>, vector<8x32xf32> -> vector<8x32xf32>
    %113 = arith.addf %112, %8 : vector<8x32xf32>
    %114 = arith.addf %107, %110 : vector<8x32xf32>
    %cst_71 = arith.constant 5.000000e-01 : f32
    %115 = vector.broadcast %cst_71 : f32 to vector<8x32xf32>
    %116 = arith.mulf %115, %114 : vector<8x32xf32>
    %117 = math.tanh %116 : vector<8x32xf32>
    %cst_72 = arith.constant 5.000000e-01 : f32
    %118 = vector.broadcast %cst_72 : f32 to vector<8x32xf32>
    %119 = arith.mulf %118, %117 : vector<8x32xf32>
    %cst_73 = arith.constant 5.000000e-01 : f32
    %120 = vector.broadcast %cst_73 : f32 to vector<8x32xf32>
    %121 = arith.addf %119, %120 : vector<8x32xf32>
    %122 = arith.addf %108, %111 : vector<8x32xf32>
    %cst_74 = arith.constant 5.000000e-01 : f32
    %123 = vector.broadcast %cst_74 : f32 to vector<8x32xf32>
    %124 = arith.mulf %123, %122 : vector<8x32xf32>
    %125 = math.tanh %124 : vector<8x32xf32>
    %cst_75 = arith.constant 5.000000e-01 : f32
    %126 = vector.broadcast %cst_75 : f32 to vector<8x32xf32>
    %127 = arith.mulf %126, %125 : vector<8x32xf32>
    %cst_76 = arith.constant 5.000000e-01 : f32
    %128 = vector.broadcast %cst_76 : f32 to vector<8x32xf32>
    %129 = arith.addf %127, %128 : vector<8x32xf32>
    %130 = arith.mulf %121, %113 : vector<8x32xf32>
    %131 = arith.addf %109, %130 : vector<8x32xf32>
    %132 = math.tanh %131 : vector<8x32xf32>
    %cst_77 = arith.constant 1.000000e+00 : f32
    %133 = vector.broadcast %cst_77 : f32 to vector<8x32xf32>
    %134 = arith.subf %133, %129 : vector<8x32xf32>
    %135 = arith.mulf %134, %132 : vector<8x32xf32>
    %136 = arith.mulf %129, %72 : vector<8x32xf32>
    %137 = arith.addf %135, %136 : vector<8x32xf32>
    %cst_78 = arith.constant dense<0.000000e+00> : vector<8x32xf32>
    %138 = tpu.matmul %137, %9, %cst_78 {dimension_numbers = #tpu.dot_dimension_numbers<[1], [0], [0], [1], [0, 0, 1, 1], [], []>} : vector<8x32xf32>, vector<32x32xf32>, vector<8x32xf32> -> vector<8x32xf32>
    %139 = arith.addf %138, %20 : vector<8x32xf32>
    %cst_79 = arith.constant dense<0.000000e+00> : vector<8x32xf32>
    %140 = tpu.matmul %137, %10, %cst_79 {dimension_numbers = #tpu.dot_dimension_numbers<[1], [0], [0], [1], [0, 0, 1, 1], [], []>} : vector<8x32xf32>, vector<32x32xf32>, vector<8x32xf32> -> vector<8x32xf32>
    %141 = arith.addf %140, %22 : vector<8x32xf32>
    %cst_80 = arith.constant dense<0.000000e+00> : vector<8x32xf32>
    %142 = tpu.matmul %137, %11, %cst_80 {dimension_numbers = #tpu.dot_dimension_numbers<[1], [0], [0], [1], [0, 0, 1, 1], [], []>} : vector<8x32xf32>, vector<32x32xf32>, vector<8x32xf32> -> vector<8x32xf32>
    %143 = arith.addf %142, %24 : vector<8x32xf32>
    %cst_81 = arith.constant dense<0.000000e+00> : vector<8x32xf32>
    %144 = tpu.matmul %106, %12, %cst_81 {dimension_numbers = #tpu.dot_dimension_numbers<[1], [0], [0], [1], [0, 0, 1, 1], [], []>} : vector<8x32xf32>, vector<32x32xf32>, vector<8x32xf32> -> vector<8x32xf32>
    %cst_82 = arith.constant dense<0.000000e+00> : vector<8x32xf32>
    %145 = tpu.matmul %106, %13, %cst_82 {dimension_numbers = #tpu.dot_dimension_numbers<[1], [0], [0], [1], [0, 0, 1, 1], [], []>} : vector<8x32xf32>, vector<32x32xf32>, vector<8x32xf32> -> vector<8x32xf32>
    %cst_83 = arith.constant dense<0.000000e+00> : vector<8x32xf32>
    %146 = tpu.matmul %106, %14, %cst_83 {dimension_numbers = #tpu.dot_dimension_numbers<[1], [0], [0], [1], [0, 0, 1, 1], [], []>} : vector<8x32xf32>, vector<32x32xf32>, vector<8x32xf32> -> vector<8x32xf32>
    %147 = arith.addf %146, %26 : vector<8x32xf32>
    %148 = arith.addf %139, %144 : vector<8x32xf32>
    %cst_84 = arith.constant 5.000000e-01 : f32
    %149 = vector.broadcast %cst_84 : f32 to vector<8x32xf32>
    %150 = arith.mulf %149, %148 : vector<8x32xf32>
    %151 = math.tanh %150 : vector<8x32xf32>
    %cst_85 = arith.constant 5.000000e-01 : f32
    %152 = vector.broadcast %cst_85 : f32 to vector<8x32xf32>
    %153 = arith.mulf %152, %151 : vector<8x32xf32>
    %cst_86 = arith.constant 5.000000e-01 : f32
    %154 = vector.broadcast %cst_86 : f32 to vector<8x32xf32>
    %155 = arith.addf %153, %154 : vector<8x32xf32>
    %156 = arith.addf %141, %145 : vector<8x32xf32>
    %cst_87 = arith.constant 5.000000e-01 : f32
    %157 = vector.broadcast %cst_87 : f32 to vector<8x32xf32>
    %158 = arith.mulf %157, %156 : vector<8x32xf32>
    %159 = math.tanh %158 : vector<8x32xf32>
    %cst_88 = arith.constant 5.000000e-01 : f32
    %160 = vector.broadcast %cst_88 : f32 to vector<8x32xf32>
    %161 = arith.mulf %160, %159 : vector<8x32xf32>
    %cst_89 = arith.constant 5.000000e-01 : f32
    %162 = vector.broadcast %cst_89 : f32 to vector<8x32xf32>
    %163 = arith.addf %161, %162 : vector<8x32xf32>
    %164 = arith.mulf %155, %147 : vector<8x32xf32>
    %165 = arith.addf %143, %164 : vector<8x32xf32>
    %166 = math.tanh %165 : vector<8x32xf32>
    %cst_90 = arith.constant 1.000000e+00 : f32
    %167 = vector.broadcast %cst_90 : f32 to vector<8x32xf32>
    %168 = arith.subf %167, %163 : vector<8x32xf32>
    %169 = arith.mulf %168, %166 : vector<8x32xf32>
    %170 = arith.mulf %163, %106 : vector<8x32xf32>
    %171 = arith.addf %169, %170 : vector<8x32xf32>
    %172 = vector.extract_strided_slice %31 {offsets = [16, 0], sizes = [8, 32], strides = [1, 1]} : vector<64x32xf32> to vector<8x32xf32>
    %173 = vector.extract_strided_slice %35 {offsets = [16, 0], sizes = [8, 32], strides = [1, 1]} : vector<64x32xf32> to vector<8x32xf32>
    %174 = vector.extract_strided_slice %39 {offsets = [16, 0], sizes = [8, 32], strides = [1, 1]} : vector<64x32xf32> to vector<8x32xf32>
    %cst_91 = arith.constant dense<0.000000e+00> : vector<8x32xf32>
    %175 = tpu.matmul %137, %3, %cst_91 {dimension_numbers = #tpu.dot_dimension_numbers<[1], [0], [0], [1], [0, 0, 1, 1], [], []>} : vector<8x32xf32>, vector<32x32xf32>, vector<8x32xf32> -> vector<8x32xf32>
    %cst_92 = arith.constant dense<0.000000e+00> : vector<8x32xf32>
    %176 = tpu.matmul %137, %4, %cst_92 {dimension_numbers = #tpu.dot_dimension_numbers<[1], [0], [0], [1], [0, 0, 1, 1], [], []>} : vector<8x32xf32>, vector<32x32xf32>, vector<8x32xf32> -> vector<8x32xf32>
    %cst_93 = arith.constant dense<0.000000e+00> : vector<8x32xf32>
    %177 = tpu.matmul %137, %5, %cst_93 {dimension_numbers = #tpu.dot_dimension_numbers<[1], [0], [0], [1], [0, 0, 1, 1], [], []>} : vector<8x32xf32>, vector<32x32xf32>, vector<8x32xf32> -> vector<8x32xf32>
    %178 = arith.addf %177, %8 : vector<8x32xf32>
    %179 = arith.addf %172, %175 : vector<8x32xf32>
    %cst_94 = arith.constant 5.000000e-01 : f32
    %180 = vector.broadcast %cst_94 : f32 to vector<8x32xf32>
    %181 = arith.mulf %180, %179 : vector<8x32xf32>
    %182 = math.tanh %181 : vector<8x32xf32>
    %cst_95 = arith.constant 5.000000e-01 : f32
    %183 = vector.broadcast %cst_95 : f32 to vector<8x32xf32>
    %184 = arith.mulf %183, %182 : vector<8x32xf32>
    %cst_96 = arith.constant 5.000000e-01 : f32
    %185 = vector.broadcast %cst_96 : f32 to vector<8x32xf32>
    %186 = arith.addf %184, %185 : vector<8x32xf32>
    %187 = arith.addf %173, %176 : vector<8x32xf32>
    %cst_97 = arith.constant 5.000000e-01 : f32
    %188 = vector.broadcast %cst_97 : f32 to vector<8x32xf32>
    %189 = arith.mulf %188, %187 : vector<8x32xf32>
    %190 = math.tanh %189 : vector<8x32xf32>
    %cst_98 = arith.constant 5.000000e-01 : f32
    %191 = vector.broadcast %cst_98 : f32 to vector<8x32xf32>
    %192 = arith.mulf %191, %190 : vector<8x32xf32>
    %cst_99 = arith.constant 5.000000e-01 : f32
    %193 = vector.broadcast %cst_99 : f32 to vector<8x32xf32>
    %194 = arith.addf %192, %193 : vector<8x32xf32>
    %195 = arith.mulf %186, %178 : vector<8x32xf32>
    %196 = arith.addf %174, %195 : vector<8x32xf32>
    %197 = math.tanh %196 : vector<8x32xf32>
    %cst_100 = arith.constant 1.000000e+00 : f32
    %198 = vector.broadcast %cst_100 : f32 to vector<8x32xf32>
    %199 = arith.subf %198, %194 : vector<8x32xf32>
    %200 = arith.mulf %199, %197 : vector<8x32xf32>
    %201 = arith.mulf %194, %137 : vector<8x32xf32>
    %202 = arith.addf %200, %201 : vector<8x32xf32>
    %cst_101 = arith.constant dense<0.000000e+00> : vector<8x32xf32>
    %203 = tpu.matmul %202, %9, %cst_101 {dimension_numbers = #tpu.dot_dimension_numbers<[1], [0], [0], [1], [0, 0, 1, 1], [], []>} : vector<8x32xf32>, vector<32x32xf32>, vector<8x32xf32> -> vector<8x32xf32>
    %204 = arith.addf %203, %20 : vector<8x32xf32>
    %cst_102 = arith.constant dense<0.000000e+00> : vector<8x32xf32>
    %205 = tpu.matmul %202, %10, %cst_102 {dimension_numbers = #tpu.dot_dimension_numbers<[1], [0], [0], [1], [0, 0, 1, 1], [], []>} : vector<8x32xf32>, vector<32x32xf32>, vector<8x32xf32> -> vector<8x32xf32>
    %206 = arith.addf %205, %22 : vector<8x32xf32>
    %cst_103 = arith.constant dense<0.000000e+00> : vector<8x32xf32>
    %207 = tpu.matmul %202, %11, %cst_103 {dimension_numbers = #tpu.dot_dimension_numbers<[1], [0], [0], [1], [0, 0, 1, 1], [], []>} : vector<8x32xf32>, vector<32x32xf32>, vector<8x32xf32> -> vector<8x32xf32>
    %208 = arith.addf %207, %24 : vector<8x32xf32>
    %cst_104 = arith.constant dense<0.000000e+00> : vector<8x32xf32>
    %209 = tpu.matmul %171, %12, %cst_104 {dimension_numbers = #tpu.dot_dimension_numbers<[1], [0], [0], [1], [0, 0, 1, 1], [], []>} : vector<8x32xf32>, vector<32x32xf32>, vector<8x32xf32> -> vector<8x32xf32>
    %cst_105 = arith.constant dense<0.000000e+00> : vector<8x32xf32>
    %210 = tpu.matmul %171, %13, %cst_105 {dimension_numbers = #tpu.dot_dimension_numbers<[1], [0], [0], [1], [0, 0, 1, 1], [], []>} : vector<8x32xf32>, vector<32x32xf32>, vector<8x32xf32> -> vector<8x32xf32>
    %cst_106 = arith.constant dense<0.000000e+00> : vector<8x32xf32>
    %211 = tpu.matmul %171, %14, %cst_106 {dimension_numbers = #tpu.dot_dimension_numbers<[1], [0], [0], [1], [0, 0, 1, 1], [], []>} : vector<8x32xf32>, vector<32x32xf32>, vector<8x32xf32> -> vector<8x32xf32>
    %212 = arith.addf %211, %26 : vector<8x32xf32>
    %213 = arith.addf %204, %209 : vector<8x32xf32>
    %cst_107 = arith.constant 5.000000e-01 : f32
    %214 = vector.broadcast %cst_107 : f32 to vector<8x32xf32>
    %215 = arith.mulf %214, %213 : vector<8x32xf32>
    %216 = math.tanh %215 : vector<8x32xf32>
    %cst_108 = arith.constant 5.000000e-01 : f32
    %217 = vector.broadcast %cst_108 : f32 to vector<8x32xf32>
    %218 = arith.mulf %217, %216 : vector<8x32xf32>
    %cst_109 = arith.constant 5.000000e-01 : f32
    %219 = vector.broadcast %cst_109 : f32 to vector<8x32xf32>
    %220 = arith.addf %218, %219 : vector<8x32xf32>
    %221 = arith.addf %206, %210 : vector<8x32xf32>
    %cst_110 = arith.constant 5.000000e-01 : f32
    %222 = vector.broadcast %cst_110 : f32 to vector<8x32xf32>
    %223 = arith.mulf %222, %221 : vector<8x32xf32>
    %224 = math.tanh %223 : vector<8x32xf32>
    %cst_111 = arith.constant 5.000000e-01 : f32
    %225 = vector.broadcast %cst_111 : f32 to vector<8x32xf32>
    %226 = arith.mulf %225, %224 : vector<8x32xf32>
    %cst_112 = arith.constant 5.000000e-01 : f32
    %227 = vector.broadcast %cst_112 : f32 to vector<8x32xf32>
    %228 = arith.addf %226, %227 : vector<8x32xf32>
    %229 = arith.mulf %220, %212 : vector<8x32xf32>
    %230 = arith.addf %208, %229 : vector<8x32xf32>
    %231 = math.tanh %230 : vector<8x32xf32>
    %cst_113 = arith.constant 1.000000e+00 : f32
    %232 = vector.broadcast %cst_113 : f32 to vector<8x32xf32>
    %233 = arith.subf %232, %228 : vector<8x32xf32>
    %234 = arith.mulf %233, %231 : vector<8x32xf32>
    %235 = arith.mulf %228, %171 : vector<8x32xf32>
    %236 = arith.addf %234, %235 : vector<8x32xf32>
    %237 = vector.extract_strided_slice %31 {offsets = [24, 0], sizes = [8, 32], strides = [1, 1]} : vector<64x32xf32> to vector<8x32xf32>
    %238 = vector.extract_strided_slice %35 {offsets = [24, 0], sizes = [8, 32], strides = [1, 1]} : vector<64x32xf32> to vector<8x32xf32>
    %239 = vector.extract_strided_slice %39 {offsets = [24, 0], sizes = [8, 32], strides = [1, 1]} : vector<64x32xf32> to vector<8x32xf32>
    %cst_114 = arith.constant dense<0.000000e+00> : vector<8x32xf32>
    %240 = tpu.matmul %202, %3, %cst_114 {dimension_numbers = #tpu.dot_dimension_numbers<[1], [0], [0], [1], [0, 0, 1, 1], [], []>} : vector<8x32xf32>, vector<32x32xf32>, vector<8x32xf32> -> vector<8x32xf32>
    %cst_115 = arith.constant dense<0.000000e+00> : vector<8x32xf32>
    %241 = tpu.matmul %202, %4, %cst_115 {dimension_numbers = #tpu.dot_dimension_numbers<[1], [0], [0], [1], [0, 0, 1, 1], [], []>} : vector<8x32xf32>, vector<32x32xf32>, vector<8x32xf32> -> vector<8x32xf32>
    %cst_116 = arith.constant dense<0.000000e+00> : vector<8x32xf32>
    %242 = tpu.matmul %202, %5, %cst_116 {dimension_numbers = #tpu.dot_dimension_numbers<[1], [0], [0], [1], [0, 0, 1, 1], [], []>} : vector<8x32xf32>, vector<32x32xf32>, vector<8x32xf32> -> vector<8x32xf32>
    %243 = arith.addf %242, %8 : vector<8x32xf32>
    %244 = arith.addf %237, %240 : vector<8x32xf32>
    %cst_117 = arith.constant 5.000000e-01 : f32
    %245 = vector.broadcast %cst_117 : f32 to vector<8x32xf32>
    %246 = arith.mulf %245, %244 : vector<8x32xf32>
    %247 = math.tanh %246 : vector<8x32xf32>
    %cst_118 = arith.constant 5.000000e-01 : f32
    %248 = vector.broadcast %cst_118 : f32 to vector<8x32xf32>
    %249 = arith.mulf %248, %247 : vector<8x32xf32>
    %cst_119 = arith.constant 5.000000e-01 : f32
    %250 = vector.broadcast %cst_119 : f32 to vector<8x32xf32>
    %251 = arith.addf %249, %250 : vector<8x32xf32>
    %252 = arith.addf %238, %241 : vector<8x32xf32>
    %cst_120 = arith.constant 5.000000e-01 : f32
    %253 = vector.broadcast %cst_120 : f32 to vector<8x32xf32>
    %254 = arith.mulf %253, %252 : vector<8x32xf32>
    %255 = math.tanh %254 : vector<8x32xf32>
    %cst_121 = arith.constant 5.000000e-01 : f32
    %256 = vector.broadcast %cst_121 : f32 to vector<8x32xf32>
    %257 = arith.mulf %256, %255 : vector<8x32xf32>
    %cst_122 = arith.constant 5.000000e-01 : f32
    %258 = vector.broadcast %cst_122 : f32 to vector<8x32xf32>
    %259 = arith.addf %257, %258 : vector<8x32xf32>
    %260 = arith.mulf %251, %243 : vector<8x32xf32>
    %261 = arith.addf %239, %260 : vector<8x32xf32>
    %262 = math.tanh %261 : vector<8x32xf32>
    %cst_123 = arith.constant 1.000000e+00 : f32
    %263 = vector.broadcast %cst_123 : f32 to vector<8x32xf32>
    %264 = arith.subf %263, %259 : vector<8x32xf32>
    %265 = arith.mulf %264, %262 : vector<8x32xf32>
    %266 = arith.mulf %259, %202 : vector<8x32xf32>
    %267 = arith.addf %265, %266 : vector<8x32xf32>
    %cst_124 = arith.constant dense<0.000000e+00> : vector<8x32xf32>
    %268 = tpu.matmul %267, %9, %cst_124 {dimension_numbers = #tpu.dot_dimension_numbers<[1], [0], [0], [1], [0, 0, 1, 1], [], []>} : vector<8x32xf32>, vector<32x32xf32>, vector<8x32xf32> -> vector<8x32xf32>
    %269 = arith.addf %268, %20 : vector<8x32xf32>
    %cst_125 = arith.constant dense<0.000000e+00> : vector<8x32xf32>
    %270 = tpu.matmul %267, %10, %cst_125 {dimension_numbers = #tpu.dot_dimension_numbers<[1], [0], [0], [1], [0, 0, 1, 1], [], []>} : vector<8x32xf32>, vector<32x32xf32>, vector<8x32xf32> -> vector<8x32xf32>
    %271 = arith.addf %270, %22 : vector<8x32xf32>
    %cst_126 = arith.constant dense<0.000000e+00> : vector<8x32xf32>
    %272 = tpu.matmul %267, %11, %cst_126 {dimension_numbers = #tpu.dot_dimension_numbers<[1], [0], [0], [1], [0, 0, 1, 1], [], []>} : vector<8x32xf32>, vector<32x32xf32>, vector<8x32xf32> -> vector<8x32xf32>
    %273 = arith.addf %272, %24 : vector<8x32xf32>
    %cst_127 = arith.constant dense<0.000000e+00> : vector<8x32xf32>
    %274 = tpu.matmul %236, %12, %cst_127 {dimension_numbers = #tpu.dot_dimension_numbers<[1], [0], [0], [1], [0, 0, 1, 1], [], []>} : vector<8x32xf32>, vector<32x32xf32>, vector<8x32xf32> -> vector<8x32xf32>
    %cst_128 = arith.constant dense<0.000000e+00> : vector<8x32xf32>
    %275 = tpu.matmul %236, %13, %cst_128 {dimension_numbers = #tpu.dot_dimension_numbers<[1], [0], [0], [1], [0, 0, 1, 1], [], []>} : vector<8x32xf32>, vector<32x32xf32>, vector<8x32xf32> -> vector<8x32xf32>
    %cst_129 = arith.constant dense<0.000000e+00> : vector<8x32xf32>
    %276 = tpu.matmul %236, %14, %cst_129 {dimension_numbers = #tpu.dot_dimension_numbers<[1], [0], [0], [1], [0, 0, 1, 1], [], []>} : vector<8x32xf32>, vector<32x32xf32>, vector<8x32xf32> -> vector<8x32xf32>
    %277 = arith.addf %276, %26 : vector<8x32xf32>
    %278 = arith.addf %269, %274 : vector<8x32xf32>
    %cst_130 = arith.constant 5.000000e-01 : f32
    %279 = vector.broadcast %cst_130 : f32 to vector<8x32xf32>
    %280 = arith.mulf %279, %278 : vector<8x32xf32>
    %281 = math.tanh %280 : vector<8x32xf32>
    %cst_131 = arith.constant 5.000000e-01 : f32
    %282 = vector.broadcast %cst_131 : f32 to vector<8x32xf32>
    %283 = arith.mulf %282, %281 : vector<8x32xf32>
    %cst_132 = arith.constant 5.000000e-01 : f32
    %284 = vector.broadcast %cst_132 : f32 to vector<8x32xf32>
    %285 = arith.addf %283, %284 : vector<8x32xf32>
    %286 = arith.addf %271, %275 : vector<8x32xf32>
    %cst_133 = arith.constant 5.000000e-01 : f32
    %287 = vector.broadcast %cst_133 : f32 to vector<8x32xf32>
    %288 = arith.mulf %287, %286 : vector<8x32xf32>
    %289 = math.tanh %288 : vector<8x32xf32>
    %cst_134 = arith.constant 5.000000e-01 : f32
    %290 = vector.broadcast %cst_134 : f32 to vector<8x32xf32>
    %291 = arith.mulf %290, %289 : vector<8x32xf32>
    %cst_135 = arith.constant 5.000000e-01 : f32
    %292 = vector.broadcast %cst_135 : f32 to vector<8x32xf32>
    %293 = arith.addf %291, %292 : vector<8x32xf32>
    %294 = arith.mulf %285, %277 : vector<8x32xf32>
    %295 = arith.addf %273, %294 : vector<8x32xf32>
    %296 = math.tanh %295 : vector<8x32xf32>
    %cst_136 = arith.constant 1.000000e+00 : f32
    %297 = vector.broadcast %cst_136 : f32 to vector<8x32xf32>
    %298 = arith.subf %297, %293 : vector<8x32xf32>
    %299 = arith.mulf %298, %296 : vector<8x32xf32>
    %300 = arith.mulf %293, %236 : vector<8x32xf32>
    %301 = arith.addf %299, %300 : vector<8x32xf32>
    %302 = vector.extract_strided_slice %31 {offsets = [32, 0], sizes = [8, 32], strides = [1, 1]} : vector<64x32xf32> to vector<8x32xf32>
    %303 = vector.extract_strided_slice %35 {offsets = [32, 0], sizes = [8, 32], strides = [1, 1]} : vector<64x32xf32> to vector<8x32xf32>
    %304 = vector.extract_strided_slice %39 {offsets = [32, 0], sizes = [8, 32], strides = [1, 1]} : vector<64x32xf32> to vector<8x32xf32>
    %cst_137 = arith.constant dense<0.000000e+00> : vector<8x32xf32>
    %305 = tpu.matmul %267, %3, %cst_137 {dimension_numbers = #tpu.dot_dimension_numbers<[1], [0], [0], [1], [0, 0, 1, 1], [], []>} : vector<8x32xf32>, vector<32x32xf32>, vector<8x32xf32> -> vector<8x32xf32>
    %cst_138 = arith.constant dense<0.000000e+00> : vector<8x32xf32>
    %306 = tpu.matmul %267, %4, %cst_138 {dimension_numbers = #tpu.dot_dimension_numbers<[1], [0], [0], [1], [0, 0, 1, 1], [], []>} : vector<8x32xf32>, vector<32x32xf32>, vector<8x32xf32> -> vector<8x32xf32>
    %cst_139 = arith.constant dense<0.000000e+00> : vector<8x32xf32>
    %307 = tpu.matmul %267, %5, %cst_139 {dimension_numbers = #tpu.dot_dimension_numbers<[1], [0], [0], [1], [0, 0, 1, 1], [], []>} : vector<8x32xf32>, vector<32x32xf32>, vector<8x32xf32> -> vector<8x32xf32>
    %308 = arith.addf %307, %8 : vector<8x32xf32>
    %309 = arith.addf %302, %305 : vector<8x32xf32>
    %cst_140 = arith.constant 5.000000e-01 : f32
    %310 = vector.broadcast %cst_140 : f32 to vector<8x32xf32>
    %311 = arith.mulf %310, %309 : vector<8x32xf32>
    %312 = math.tanh %311 : vector<8x32xf32>
    %cst_141 = arith.constant 5.000000e-01 : f32
    %313 = vector.broadcast %cst_141 : f32 to vector<8x32xf32>
    %314 = arith.mulf %313, %312 : vector<8x32xf32>
    %cst_142 = arith.constant 5.000000e-01 : f32
    %315 = vector.broadcast %cst_142 : f32 to vector<8x32xf32>
    %316 = arith.addf %314, %315 : vector<8x32xf32>
    %317 = arith.addf %303, %306 : vector<8x32xf32>
    %cst_143 = arith.constant 5.000000e-01 : f32
    %318 = vector.broadcast %cst_143 : f32 to vector<8x32xf32>
    %319 = arith.mulf %318, %317 : vector<8x32xf32>
    %320 = math.tanh %319 : vector<8x32xf32>
    %cst_144 = arith.constant 5.000000e-01 : f32
    %321 = vector.broadcast %cst_144 : f32 to vector<8x32xf32>
    %322 = arith.mulf %321, %320 : vector<8x32xf32>
    %cst_145 = arith.constant 5.000000e-01 : f32
    %323 = vector.broadcast %cst_145 : f32 to vector<8x32xf32>
    %324 = arith.addf %322, %323 : vector<8x32xf32>
    %325 = arith.mulf %316, %308 : vector<8x32xf32>
    %326 = arith.addf %304, %325 : vector<8x32xf32>
    %327 = math.tanh %326 : vector<8x32xf32>
    %cst_146 = arith.constant 1.000000e+00 : f32
    %328 = vector.broadcast %cst_146 : f32 to vector<8x32xf32>
    %329 = arith.subf %328, %324 : vector<8x32xf32>
    %330 = arith.mulf %329, %327 : vector<8x32xf32>
    %331 = arith.mulf %324, %267 : vector<8x32xf32>
    %332 = arith.addf %330, %331 : vector<8x32xf32>
    %cst_147 = arith.constant dense<0.000000e+00> : vector<8x32xf32>
    %333 = tpu.matmul %332, %9, %cst_147 {dimension_numbers = #tpu.dot_dimension_numbers<[1], [0], [0], [1], [0, 0, 1, 1], [], []>} : vector<8x32xf32>, vector<32x32xf32>, vector<8x32xf32> -> vector<8x32xf32>
    %334 = arith.addf %333, %20 : vector<8x32xf32>
    %cst_148 = arith.constant dense<0.000000e+00> : vector<8x32xf32>
    %335 = tpu.matmul %332, %10, %cst_148 {dimension_numbers = #tpu.dot_dimension_numbers<[1], [0], [0], [1], [0, 0, 1, 1], [], []>} : vector<8x32xf32>, vector<32x32xf32>, vector<8x32xf32> -> vector<8x32xf32>
    %336 = arith.addf %335, %22 : vector<8x32xf32>
    %cst_149 = arith.constant dense<0.000000e+00> : vector<8x32xf32>
    %337 = tpu.matmul %332, %11, %cst_149 {dimension_numbers = #tpu.dot_dimension_numbers<[1], [0], [0], [1], [0, 0, 1, 1], [], []>} : vector<8x32xf32>, vector<32x32xf32>, vector<8x32xf32> -> vector<8x32xf32>
    %338 = arith.addf %337, %24 : vector<8x32xf32>
    %cst_150 = arith.constant dense<0.000000e+00> : vector<8x32xf32>
    %339 = tpu.matmul %301, %12, %cst_150 {dimension_numbers = #tpu.dot_dimension_numbers<[1], [0], [0], [1], [0, 0, 1, 1], [], []>} : vector<8x32xf32>, vector<32x32xf32>, vector<8x32xf32> -> vector<8x32xf32>
    %cst_151 = arith.constant dense<0.000000e+00> : vector<8x32xf32>
    %340 = tpu.matmul %301, %13, %cst_151 {dimension_numbers = #tpu.dot_dimension_numbers<[1], [0], [0], [1], [0, 0, 1, 1], [], []>} : vector<8x32xf32>, vector<32x32xf32>, vector<8x32xf32> -> vector<8x32xf32>
    %cst_152 = arith.constant dense<0.000000e+00> : vector<8x32xf32>
    %341 = tpu.matmul %301, %14, %cst_152 {dimension_numbers = #tpu.dot_dimension_numbers<[1], [0], [0], [1], [0, 0, 1, 1], [], []>} : vector<8x32xf32>, vector<32x32xf32>, vector<8x32xf32> -> vector<8x32xf32>
    %342 = arith.addf %341, %26 : vector<8x32xf32>
    %343 = arith.addf %334, %339 : vector<8x32xf32>
    %cst_153 = arith.constant 5.000000e-01 : f32
    %344 = vector.broadcast %cst_153 : f32 to vector<8x32xf32>
    %345 = arith.mulf %344, %343 : vector<8x32xf32>
    %346 = math.tanh %345 : vector<8x32xf32>
    %cst_154 = arith.constant 5.000000e-01 : f32
    %347 = vector.broadcast %cst_154 : f32 to vector<8x32xf32>
    %348 = arith.mulf %347, %346 : vector<8x32xf32>
    %cst_155 = arith.constant 5.000000e-01 : f32
    %349 = vector.broadcast %cst_155 : f32 to vector<8x32xf32>
    %350 = arith.addf %348, %349 : vector<8x32xf32>
    %351 = arith.addf %336, %340 : vector<8x32xf32>
    %cst_156 = arith.constant 5.000000e-01 : f32
    %352 = vector.broadcast %cst_156 : f32 to vector<8x32xf32>
    %353 = arith.mulf %352, %351 : vector<8x32xf32>
    %354 = math.tanh %353 : vector<8x32xf32>
    %cst_157 = arith.constant 5.000000e-01 : f32
    %355 = vector.broadcast %cst_157 : f32 to vector<8x32xf32>
    %356 = arith.mulf %355, %354 : vector<8x32xf32>
    %cst_158 = arith.constant 5.000000e-01 : f32
    %357 = vector.broadcast %cst_158 : f32 to vector<8x32xf32>
    %358 = arith.addf %356, %357 : vector<8x32xf32>
    %359 = arith.mulf %350, %342 : vector<8x32xf32>
    %360 = arith.addf %338, %359 : vector<8x32xf32>
    %361 = math.tanh %360 : vector<8x32xf32>
    %cst_159 = arith.constant 1.000000e+00 : f32
    %362 = vector.broadcast %cst_159 : f32 to vector<8x32xf32>
    %363 = arith.subf %362, %358 : vector<8x32xf32>
    %364 = arith.mulf %363, %361 : vector<8x32xf32>
    %365 = arith.mulf %358, %301 : vector<8x32xf32>
    %366 = arith.addf %364, %365 : vector<8x32xf32>
    %367 = vector.extract_strided_slice %31 {offsets = [40, 0], sizes = [8, 32], strides = [1, 1]} : vector<64x32xf32> to vector<8x32xf32>
    %368 = vector.extract_strided_slice %35 {offsets = [40, 0], sizes = [8, 32], strides = [1, 1]} : vector<64x32xf32> to vector<8x32xf32>
    %369 = vector.extract_strided_slice %39 {offsets = [40, 0], sizes = [8, 32], strides = [1, 1]} : vector<64x32xf32> to vector<8x32xf32>
    %cst_160 = arith.constant dense<0.000000e+00> : vector<8x32xf32>
    %370 = tpu.matmul %332, %3, %cst_160 {dimension_numbers = #tpu.dot_dimension_numbers<[1], [0], [0], [1], [0, 0, 1, 1], [], []>} : vector<8x32xf32>, vector<32x32xf32>, vector<8x32xf32> -> vector<8x32xf32>
    %cst_161 = arith.constant dense<0.000000e+00> : vector<8x32xf32>
    %371 = tpu.matmul %332, %4, %cst_161 {dimension_numbers = #tpu.dot_dimension_numbers<[1], [0], [0], [1], [0, 0, 1, 1], [], []>} : vector<8x32xf32>, vector<32x32xf32>, vector<8x32xf32> -> vector<8x32xf32>
    %cst_162 = arith.constant dense<0.000000e+00> : vector<8x32xf32>
    %372 = tpu.matmul %332, %5, %cst_162 {dimension_numbers = #tpu.dot_dimension_numbers<[1], [0], [0], [1], [0, 0, 1, 1], [], []>} : vector<8x32xf32>, vector<32x32xf32>, vector<8x32xf32> -> vector<8x32xf32>
    %373 = arith.addf %372, %8 : vector<8x32xf32>
    %374 = arith.addf %367, %370 : vector<8x32xf32>
    %cst_163 = arith.constant 5.000000e-01 : f32
    %375 = vector.broadcast %cst_163 : f32 to vector<8x32xf32>
    %376 = arith.mulf %375, %374 : vector<8x32xf32>
    %377 = math.tanh %376 : vector<8x32xf32>
    %cst_164 = arith.constant 5.000000e-01 : f32
    %378 = vector.broadcast %cst_164 : f32 to vector<8x32xf32>
    %379 = arith.mulf %378, %377 : vector<8x32xf32>
    %cst_165 = arith.constant 5.000000e-01 : f32
    %380 = vector.broadcast %cst_165 : f32 to vector<8x32xf32>
    %381 = arith.addf %379, %380 : vector<8x32xf32>
    %382 = arith.addf %368, %371 : vector<8x32xf32>
    %cst_166 = arith.constant 5.000000e-01 : f32
    %383 = vector.broadcast %cst_166 : f32 to vector<8x32xf32>
    %384 = arith.mulf %383, %382 : vector<8x32xf32>
    %385 = math.tanh %384 : vector<8x32xf32>
    %cst_167 = arith.constant 5.000000e-01 : f32
    %386 = vector.broadcast %cst_167 : f32 to vector<8x32xf32>
    %387 = arith.mulf %386, %385 : vector<8x32xf32>
    %cst_168 = arith.constant 5.000000e-01 : f32
    %388 = vector.broadcast %cst_168 : f32 to vector<8x32xf32>
    %389 = arith.addf %387, %388 : vector<8x32xf32>
    %390 = arith.mulf %381, %373 : vector<8x32xf32>
    %391 = arith.addf %369, %390 : vector<8x32xf32>
    %392 = math.tanh %391 : vector<8x32xf32>
    %cst_169 = arith.constant 1.000000e+00 : f32
    %393 = vector.broadcast %cst_169 : f32 to vector<8x32xf32>
    %394 = arith.subf %393, %389 : vector<8x32xf32>
    %395 = arith.mulf %394, %392 : vector<8x32xf32>
    %396 = arith.mulf %389, %332 : vector<8x32xf32>
    %397 = arith.addf %395, %396 : vector<8x32xf32>
    %cst_170 = arith.constant dense<0.000000e+00> : vector<8x32xf32>
    %398 = tpu.matmul %397, %9, %cst_170 {dimension_numbers = #tpu.dot_dimension_numbers<[1], [0], [0], [1], [0, 0, 1, 1], [], []>} : vector<8x32xf32>, vector<32x32xf32>, vector<8x32xf32> -> vector<8x32xf32>
    %399 = arith.addf %398, %20 : vector<8x32xf32>
    %cst_171 = arith.constant dense<0.000000e+00> : vector<8x32xf32>
    %400 = tpu.matmul %397, %10, %cst_171 {dimension_numbers = #tpu.dot_dimension_numbers<[1], [0], [0], [1], [0, 0, 1, 1], [], []>} : vector<8x32xf32>, vector<32x32xf32>, vector<8x32xf32> -> vector<8x32xf32>
    %401 = arith.addf %400, %22 : vector<8x32xf32>
    %cst_172 = arith.constant dense<0.000000e+00> : vector<8x32xf32>
    %402 = tpu.matmul %397, %11, %cst_172 {dimension_numbers = #tpu.dot_dimension_numbers<[1], [0], [0], [1], [0, 0, 1, 1], [], []>} : vector<8x32xf32>, vector<32x32xf32>, vector<8x32xf32> -> vector<8x32xf32>
    %403 = arith.addf %402, %24 : vector<8x32xf32>
    %cst_173 = arith.constant dense<0.000000e+00> : vector<8x32xf32>
    %404 = tpu.matmul %366, %12, %cst_173 {dimension_numbers = #tpu.dot_dimension_numbers<[1], [0], [0], [1], [0, 0, 1, 1], [], []>} : vector<8x32xf32>, vector<32x32xf32>, vector<8x32xf32> -> vector<8x32xf32>
    %cst_174 = arith.constant dense<0.000000e+00> : vector<8x32xf32>
    %405 = tpu.matmul %366, %13, %cst_174 {dimension_numbers = #tpu.dot_dimension_numbers<[1], [0], [0], [1], [0, 0, 1, 1], [], []>} : vector<8x32xf32>, vector<32x32xf32>, vector<8x32xf32> -> vector<8x32xf32>
    %cst_175 = arith.constant dense<0.000000e+00> : vector<8x32xf32>
    %406 = tpu.matmul %366, %14, %cst_175 {dimension_numbers = #tpu.dot_dimension_numbers<[1], [0], [0], [1], [0, 0, 1, 1], [], []>} : vector<8x32xf32>, vector<32x32xf32>, vector<8x32xf32> -> vector<8x32xf32>
    %407 = arith.addf %406, %26 : vector<8x32xf32>
    %408 = arith.addf %399, %404 : vector<8x32xf32>
    %cst_176 = arith.constant 5.000000e-01 : f32
    %409 = vector.broadcast %cst_176 : f32 to vector<8x32xf32>
    %410 = arith.mulf %409, %408 : vector<8x32xf32>
    %411 = math.tanh %410 : vector<8x32xf32>
    %cst_177 = arith.constant 5.000000e-01 : f32
    %412 = vector.broadcast %cst_177 : f32 to vector<8x32xf32>
    %413 = arith.mulf %412, %411 : vector<8x32xf32>
    %cst_178 = arith.constant 5.000000e-01 : f32
    %414 = vector.broadcast %cst_178 : f32 to vector<8x32xf32>
    %415 = arith.addf %413, %414 : vector<8x32xf32>
    %416 = arith.addf %401, %405 : vector<8x32xf32>
    %cst_179 = arith.constant 5.000000e-01 : f32
    %417 = vector.broadcast %cst_179 : f32 to vector<8x32xf32>
    %418 = arith.mulf %417, %416 : vector<8x32xf32>
    %419 = math.tanh %418 : vector<8x32xf32>
    %cst_180 = arith.constant 5.000000e-01 : f32
    %420 = vector.broadcast %cst_180 : f32 to vector<8x32xf32>
    %421 = arith.mulf %420, %419 : vector<8x32xf32>
    %cst_181 = arith.constant 5.000000e-01 : f32
    %422 = vector.broadcast %cst_181 : f32 to vector<8x32xf32>
    %423 = arith.addf %421, %422 : vector<8x32xf32>
    %424 = arith.mulf %415, %407 : vector<8x32xf32>
    %425 = arith.addf %403, %424 : vector<8x32xf32>
    %426 = math.tanh %425 : vector<8x32xf32>
    %cst_182 = arith.constant 1.000000e+00 : f32
    %427 = vector.broadcast %cst_182 : f32 to vector<8x32xf32>
    %428 = arith.subf %427, %423 : vector<8x32xf32>
    %429 = arith.mulf %428, %426 : vector<8x32xf32>
    %430 = arith.mulf %423, %366 : vector<8x32xf32>
    %431 = arith.addf %429, %430 : vector<8x32xf32>
    %432 = vector.extract_strided_slice %31 {offsets = [48, 0], sizes = [8, 32], strides = [1, 1]} : vector<64x32xf32> to vector<8x32xf32>
    %433 = vector.extract_strided_slice %35 {offsets = [48, 0], sizes = [8, 32], strides = [1, 1]} : vector<64x32xf32> to vector<8x32xf32>
    %434 = vector.extract_strided_slice %39 {offsets = [48, 0], sizes = [8, 32], strides = [1, 1]} : vector<64x32xf32> to vector<8x32xf32>
    %cst_183 = arith.constant dense<0.000000e+00> : vector<8x32xf32>
    %435 = tpu.matmul %397, %3, %cst_183 {dimension_numbers = #tpu.dot_dimension_numbers<[1], [0], [0], [1], [0, 0, 1, 1], [], []>} : vector<8x32xf32>, vector<32x32xf32>, vector<8x32xf32> -> vector<8x32xf32>
    %cst_184 = arith.constant dense<0.000000e+00> : vector<8x32xf32>
    %436 = tpu.matmul %397, %4, %cst_184 {dimension_numbers = #tpu.dot_dimension_numbers<[1], [0], [0], [1], [0, 0, 1, 1], [], []>} : vector<8x32xf32>, vector<32x32xf32>, vector<8x32xf32> -> vector<8x32xf32>
    %cst_185 = arith.constant dense<0.000000e+00> : vector<8x32xf32>
    %437 = tpu.matmul %397, %5, %cst_185 {dimension_numbers = #tpu.dot_dimension_numbers<[1], [0], [0], [1], [0, 0, 1, 1], [], []>} : vector<8x32xf32>, vector<32x32xf32>, vector<8x32xf32> -> vector<8x32xf32>
    %438 = arith.addf %437, %8 : vector<8x32xf32>
    %439 = arith.addf %432, %435 : vector<8x32xf32>
    %cst_186 = arith.constant 5.000000e-01 : f32
    %440 = vector.broadcast %cst_186 : f32 to vector<8x32xf32>
    %441 = arith.mulf %440, %439 : vector<8x32xf32>
    %442 = math.tanh %441 : vector<8x32xf32>
    %cst_187 = arith.constant 5.000000e-01 : f32
    %443 = vector.broadcast %cst_187 : f32 to vector<8x32xf32>
    %444 = arith.mulf %443, %442 : vector<8x32xf32>
    %cst_188 = arith.constant 5.000000e-01 : f32
    %445 = vector.broadcast %cst_188 : f32 to vector<8x32xf32>
    %446 = arith.addf %444, %445 : vector<8x32xf32>
    %447 = arith.addf %433, %436 : vector<8x32xf32>
    %cst_189 = arith.constant 5.000000e-01 : f32
    %448 = vector.broadcast %cst_189 : f32 to vector<8x32xf32>
    %449 = arith.mulf %448, %447 : vector<8x32xf32>
    %450 = math.tanh %449 : vector<8x32xf32>
    %cst_190 = arith.constant 5.000000e-01 : f32
    %451 = vector.broadcast %cst_190 : f32 to vector<8x32xf32>
    %452 = arith.mulf %451, %450 : vector<8x32xf32>
    %cst_191 = arith.constant 5.000000e-01 : f32
    %453 = vector.broadcast %cst_191 : f32 to vector<8x32xf32>
    %454 = arith.addf %452, %453 : vector<8x32xf32>
    %455 = arith.mulf %446, %438 : vector<8x32xf32>
    %456 = arith.addf %434, %455 : vector<8x32xf32>
    %457 = math.tanh %456 : vector<8x32xf32>
    %cst_192 = arith.constant 1.000000e+00 : f32
    %458 = vector.broadcast %cst_192 : f32 to vector<8x32xf32>
    %459 = arith.subf %458, %454 : vector<8x32xf32>
    %460 = arith.mulf %459, %457 : vector<8x32xf32>
    %461 = arith.mulf %454, %397 : vector<8x32xf32>
    %462 = arith.addf %460, %461 : vector<8x32xf32>
    %cst_193 = arith.constant dense<0.000000e+00> : vector<8x32xf32>
    %463 = tpu.matmul %462, %9, %cst_193 {dimension_numbers = #tpu.dot_dimension_numbers<[1], [0], [0], [1], [0, 0, 1, 1], [], []>} : vector<8x32xf32>, vector<32x32xf32>, vector<8x32xf32> -> vector<8x32xf32>
    %464 = arith.addf %463, %20 : vector<8x32xf32>
    %cst_194 = arith.constant dense<0.000000e+00> : vector<8x32xf32>
    %465 = tpu.matmul %462, %10, %cst_194 {dimension_numbers = #tpu.dot_dimension_numbers<[1], [0], [0], [1], [0, 0, 1, 1], [], []>} : vector<8x32xf32>, vector<32x32xf32>, vector<8x32xf32> -> vector<8x32xf32>
    %466 = arith.addf %465, %22 : vector<8x32xf32>
    %cst_195 = arith.constant dense<0.000000e+00> : vector<8x32xf32>
    %467 = tpu.matmul %462, %11, %cst_195 {dimension_numbers = #tpu.dot_dimension_numbers<[1], [0], [0], [1], [0, 0, 1, 1], [], []>} : vector<8x32xf32>, vector<32x32xf32>, vector<8x32xf32> -> vector<8x32xf32>
    %468 = arith.addf %467, %24 : vector<8x32xf32>
    %cst_196 = arith.constant dense<0.000000e+00> : vector<8x32xf32>
    %469 = tpu.matmul %431, %12, %cst_196 {dimension_numbers = #tpu.dot_dimension_numbers<[1], [0], [0], [1], [0, 0, 1, 1], [], []>} : vector<8x32xf32>, vector<32x32xf32>, vector<8x32xf32> -> vector<8x32xf32>
    %cst_197 = arith.constant dense<0.000000e+00> : vector<8x32xf32>
    %470 = tpu.matmul %431, %13, %cst_197 {dimension_numbers = #tpu.dot_dimension_numbers<[1], [0], [0], [1], [0, 0, 1, 1], [], []>} : vector<8x32xf32>, vector<32x32xf32>, vector<8x32xf32> -> vector<8x32xf32>
    %cst_198 = arith.constant dense<0.000000e+00> : vector<8x32xf32>
    %471 = tpu.matmul %431, %14, %cst_198 {dimension_numbers = #tpu.dot_dimension_numbers<[1], [0], [0], [1], [0, 0, 1, 1], [], []>} : vector<8x32xf32>, vector<32x32xf32>, vector<8x32xf32> -> vector<8x32xf32>
    %472 = arith.addf %471, %26 : vector<8x32xf32>
    %473 = arith.addf %464, %469 : vector<8x32xf32>
    %cst_199 = arith.constant 5.000000e-01 : f32
    %474 = vector.broadcast %cst_199 : f32 to vector<8x32xf32>
    %475 = arith.mulf %474, %473 : vector<8x32xf32>
    %476 = math.tanh %475 : vector<8x32xf32>
    %cst_200 = arith.constant 5.000000e-01 : f32
    %477 = vector.broadcast %cst_200 : f32 to vector<8x32xf32>
    %478 = arith.mulf %477, %476 : vector<8x32xf32>
    %cst_201 = arith.constant 5.000000e-01 : f32
    %479 = vector.broadcast %cst_201 : f32 to vector<8x32xf32>
    %480 = arith.addf %478, %479 : vector<8x32xf32>
    %481 = arith.addf %466, %470 : vector<8x32xf32>
    %cst_202 = arith.constant 5.000000e-01 : f32
    %482 = vector.broadcast %cst_202 : f32 to vector<8x32xf32>
    %483 = arith.mulf %482, %481 : vector<8x32xf32>
    %484 = math.tanh %483 : vector<8x32xf32>
    %cst_203 = arith.constant 5.000000e-01 : f32
    %485 = vector.broadcast %cst_203 : f32 to vector<8x32xf32>
    %486 = arith.mulf %485, %484 : vector<8x32xf32>
    %cst_204 = arith.constant 5.000000e-01 : f32
    %487 = vector.broadcast %cst_204 : f32 to vector<8x32xf32>
    %488 = arith.addf %486, %487 : vector<8x32xf32>
    %489 = arith.mulf %480, %472 : vector<8x32xf32>
    %490 = arith.addf %468, %489 : vector<8x32xf32>
    %491 = math.tanh %490 : vector<8x32xf32>
    %cst_205 = arith.constant 1.000000e+00 : f32
    %492 = vector.broadcast %cst_205 : f32 to vector<8x32xf32>
    %493 = arith.subf %492, %488 : vector<8x32xf32>
    %494 = arith.mulf %493, %491 : vector<8x32xf32>
    %495 = arith.mulf %488, %431 : vector<8x32xf32>
    %496 = arith.addf %494, %495 : vector<8x32xf32>
    %497 = vector.extract_strided_slice %31 {offsets = [56, 0], sizes = [8, 32], strides = [1, 1]} : vector<64x32xf32> to vector<8x32xf32>
    %498 = vector.extract_strided_slice %35 {offsets = [56, 0], sizes = [8, 32], strides = [1, 1]} : vector<64x32xf32> to vector<8x32xf32>
    %499 = vector.extract_strided_slice %39 {offsets = [56, 0], sizes = [8, 32], strides = [1, 1]} : vector<64x32xf32> to vector<8x32xf32>
    %cst_206 = arith.constant dense<0.000000e+00> : vector<8x32xf32>
    %500 = tpu.matmul %462, %3, %cst_206 {dimension_numbers = #tpu.dot_dimension_numbers<[1], [0], [0], [1], [0, 0, 1, 1], [], []>} : vector<8x32xf32>, vector<32x32xf32>, vector<8x32xf32> -> vector<8x32xf32>
    %cst_207 = arith.constant dense<0.000000e+00> : vector<8x32xf32>
    %501 = tpu.matmul %462, %4, %cst_207 {dimension_numbers = #tpu.dot_dimension_numbers<[1], [0], [0], [1], [0, 0, 1, 1], [], []>} : vector<8x32xf32>, vector<32x32xf32>, vector<8x32xf32> -> vector<8x32xf32>
    %cst_208 = arith.constant dense<0.000000e+00> : vector<8x32xf32>
    %502 = tpu.matmul %462, %5, %cst_208 {dimension_numbers = #tpu.dot_dimension_numbers<[1], [0], [0], [1], [0, 0, 1, 1], [], []>} : vector<8x32xf32>, vector<32x32xf32>, vector<8x32xf32> -> vector<8x32xf32>
    %503 = arith.addf %502, %8 : vector<8x32xf32>
    %504 = arith.addf %497, %500 : vector<8x32xf32>
    %cst_209 = arith.constant 5.000000e-01 : f32
    %505 = vector.broadcast %cst_209 : f32 to vector<8x32xf32>
    %506 = arith.mulf %505, %504 : vector<8x32xf32>
    %507 = math.tanh %506 : vector<8x32xf32>
    %cst_210 = arith.constant 5.000000e-01 : f32
    %508 = vector.broadcast %cst_210 : f32 to vector<8x32xf32>
    %509 = arith.mulf %508, %507 : vector<8x32xf32>
    %cst_211 = arith.constant 5.000000e-01 : f32
    %510 = vector.broadcast %cst_211 : f32 to vector<8x32xf32>
    %511 = arith.addf %509, %510 : vector<8x32xf32>
    %512 = arith.addf %498, %501 : vector<8x32xf32>
    %cst_212 = arith.constant 5.000000e-01 : f32
    %513 = vector.broadcast %cst_212 : f32 to vector<8x32xf32>
    %514 = arith.mulf %513, %512 : vector<8x32xf32>
    %515 = math.tanh %514 : vector<8x32xf32>
    %cst_213 = arith.constant 5.000000e-01 : f32
    %516 = vector.broadcast %cst_213 : f32 to vector<8x32xf32>
    %517 = arith.mulf %516, %515 : vector<8x32xf32>
    %cst_214 = arith.constant 5.000000e-01 : f32
    %518 = vector.broadcast %cst_214 : f32 to vector<8x32xf32>
    %519 = arith.addf %517, %518 : vector<8x32xf32>
    %520 = arith.mulf %511, %503 : vector<8x32xf32>
    %521 = arith.addf %499, %520 : vector<8x32xf32>
    %522 = math.tanh %521 : vector<8x32xf32>
    %cst_215 = arith.constant 1.000000e+00 : f32
    %523 = vector.broadcast %cst_215 : f32 to vector<8x32xf32>
    %524 = arith.subf %523, %519 : vector<8x32xf32>
    %525 = arith.mulf %524, %522 : vector<8x32xf32>
    %526 = arith.mulf %519, %462 : vector<8x32xf32>
    %527 = arith.addf %525, %526 : vector<8x32xf32>
    %cst_216 = arith.constant dense<0.000000e+00> : vector<8x32xf32>
    %528 = tpu.matmul %527, %9, %cst_216 {dimension_numbers = #tpu.dot_dimension_numbers<[1], [0], [0], [1], [0, 0, 1, 1], [], []>} : vector<8x32xf32>, vector<32x32xf32>, vector<8x32xf32> -> vector<8x32xf32>
    %529 = arith.addf %528, %20 : vector<8x32xf32>
    %cst_217 = arith.constant dense<0.000000e+00> : vector<8x32xf32>
    %530 = tpu.matmul %527, %10, %cst_217 {dimension_numbers = #tpu.dot_dimension_numbers<[1], [0], [0], [1], [0, 0, 1, 1], [], []>} : vector<8x32xf32>, vector<32x32xf32>, vector<8x32xf32> -> vector<8x32xf32>
    %531 = arith.addf %530, %22 : vector<8x32xf32>
    %cst_218 = arith.constant dense<0.000000e+00> : vector<8x32xf32>
    %532 = tpu.matmul %527, %11, %cst_218 {dimension_numbers = #tpu.dot_dimension_numbers<[1], [0], [0], [1], [0, 0, 1, 1], [], []>} : vector<8x32xf32>, vector<32x32xf32>, vector<8x32xf32> -> vector<8x32xf32>
    %533 = arith.addf %532, %24 : vector<8x32xf32>
    %cst_219 = arith.constant dense<0.000000e+00> : vector<8x32xf32>
    %534 = tpu.matmul %496, %12, %cst_219 {dimension_numbers = #tpu.dot_dimension_numbers<[1], [0], [0], [1], [0, 0, 1, 1], [], []>} : vector<8x32xf32>, vector<32x32xf32>, vector<8x32xf32> -> vector<8x32xf32>
    %cst_220 = arith.constant dense<0.000000e+00> : vector<8x32xf32>
    %535 = tpu.matmul %496, %13, %cst_220 {dimension_numbers = #tpu.dot_dimension_numbers<[1], [0], [0], [1], [0, 0, 1, 1], [], []>} : vector<8x32xf32>, vector<32x32xf32>, vector<8x32xf32> -> vector<8x32xf32>
    %cst_221 = arith.constant dense<0.000000e+00> : vector<8x32xf32>
    %536 = tpu.matmul %496, %14, %cst_221 {dimension_numbers = #tpu.dot_dimension_numbers<[1], [0], [0], [1], [0, 0, 1, 1], [], []>} : vector<8x32xf32>, vector<32x32xf32>, vector<8x32xf32> -> vector<8x32xf32>
    %537 = arith.addf %536, %26 : vector<8x32xf32>
    %538 = arith.addf %529, %534 : vector<8x32xf32>
    %cst_222 = arith.constant 5.000000e-01 : f32
    %539 = vector.broadcast %cst_222 : f32 to vector<8x32xf32>
    %540 = arith.mulf %539, %538 : vector<8x32xf32>
    %541 = math.tanh %540 : vector<8x32xf32>
    %cst_223 = arith.constant 5.000000e-01 : f32
    %542 = vector.broadcast %cst_223 : f32 to vector<8x32xf32>
    %543 = arith.mulf %542, %541 : vector<8x32xf32>
    %cst_224 = arith.constant 5.000000e-01 : f32
    %544 = vector.broadcast %cst_224 : f32 to vector<8x32xf32>
    %545 = arith.addf %543, %544 : vector<8x32xf32>
    %546 = arith.addf %531, %535 : vector<8x32xf32>
    %cst_225 = arith.constant 5.000000e-01 : f32
    %547 = vector.broadcast %cst_225 : f32 to vector<8x32xf32>
    %548 = arith.mulf %547, %546 : vector<8x32xf32>
    %549 = math.tanh %548 : vector<8x32xf32>
    %cst_226 = arith.constant 5.000000e-01 : f32
    %550 = vector.broadcast %cst_226 : f32 to vector<8x32xf32>
    %551 = arith.mulf %550, %549 : vector<8x32xf32>
    %cst_227 = arith.constant 5.000000e-01 : f32
    %552 = vector.broadcast %cst_227 : f32 to vector<8x32xf32>
    %553 = arith.addf %551, %552 : vector<8x32xf32>
    %554 = arith.mulf %545, %537 : vector<8x32xf32>
    %555 = arith.addf %533, %554 : vector<8x32xf32>
    %556 = math.tanh %555 : vector<8x32xf32>
    %cst_228 = arith.constant 1.000000e+00 : f32
    %557 = vector.broadcast %cst_228 : f32 to vector<8x32xf32>
    %558 = arith.subf %557, %553 : vector<8x32xf32>
    %559 = arith.mulf %558, %556 : vector<8x32xf32>
    %560 = arith.mulf %553, %496 : vector<8x32xf32>
    %561 = arith.addf %559, %560 : vector<8x32xf32>
    %c0_229 = arith.constant 0 : index
    %c0_230 = arith.constant 0 : index
    %562 = vector.load %arg21[%c0_229, %c0_230] : memref<32x128xf32, #tpu.memory_space<vmem>>, vector<32x128xf32>
    %cst_231 = arith.constant dense<0.000000e+00> : vector<8x128xf32>
    %563 = tpu.matmul %561, %562, %cst_231 {dimension_numbers = #tpu.dot_dimension_numbers<[1], [0], [0], [1], [0, 0, 1, 1], [], []>} : vector<8x32xf32>, vector<32x128xf32>, vector<8x128xf32> -> vector<8x128xf32>
    %c0_232 = arith.constant 0 : index
    %c0_233 = arith.constant 0 : index
    %564 = vector.load %arg22[%c0_232, %c0_233] : memref<1x128xf32, #tpu.memory_space<vmem>>, vector<1x128xf32>
    %565 = vector.broadcast %564 : vector<1x128xf32> to vector<8x128xf32>
    %566 = arith.addf %563, %565 : vector<8x128xf32>
    %c0_234 = arith.constant 0 : index
    %c0_235 = arith.constant 0 : index
    %567 = vector.load %arg23[%c0_234, %c0_235] : memref<8x128xf32, #tpu.memory_space<vmem>>, vector<8x128xf32>
    tpu.vector_store %arg23[%c0_234, %c0_235], %566 {strides = array<i32>} : memref<8x128xf32, #tpu.memory_space<vmem>>, vector<8x128xf32>,
    return
  }
}

</mosaic_0001>

<bundles_post_ra>
// kernel: tpu_custom_call.1
= control target key start
LH: loop header
LB: loop body
LE: loop exit
PB: predicated region body
PF: predicated region fallthrough
CT: control target
= control target key end

     0   :  { %s9678_s0 = inlined_call_operand.vmem [shape: f32[64,16], index: 0, kind: input, shape index: {}]   ;;  %s9679_s1 = inlined_call_operand.hbm [shape: f32[16,32], index: 1, kind: input, shape index: {}]   ;;  %s9680_s2 = inlined_call_operand.hbm [shape: f32[16,32], index: 2, kind: input, shape index: {}]   ;;  %s9681_s3 = inlined_call_operand.hbm [shape: f32[16,32], index: 3, kind: input, shape index: {}]   ;;  %s9682_s4 = inlined_call_operand.vmem [shape: f32[32,32], index: 4, kind: input, shape index: {}]   ;;  %s9683_s5 = inlined_call_operand.vmem [shape: f32[32,32], index: 5, kind: input, shape index: {}]   ;;  %s9684_s6 = inlined_call_operand.vmem [shape: f32[32,32], index: 6, kind: input, shape index: {}]   ;;  %s9685_s7 = inlined_call_operand.vmem [shape: f32[1,32], index: 7, kind: input, shape index: {}]   ;;  %s9686_s8 = inlined_call_operand.hbm [shape: f32[1,32], index: 8, kind: input, shape index: {}]   ;;  %s9687_s9 = inlined_call_operand.hbm [shape: f32[1,32], index: 9, kind: input, shape index: {}]   ;;  %s9688_s10 = inlined_call_operand.hbm [shape: f32[1,32], index: 10, kind: input, shape index: {}]   ;;  %s9689_s11 = inlined_call_operand.hbm [shape: f32[32,32], index: 11, kind: input, shape index: {}]   ;;  %s9690_s12 = inlined_call_operand.hbm [shape: f32[32,32], index: 12, kind: input, shape index: {}]   ;;  %s9691_s13 = inlined_call_operand.vmem [shape: f32[32,32], index: 13, kind: input, shape index: {}]   ;;  %s9692_s14 = inlined_call_operand.hbm [shape: f32[32,32], index: 14, kind: input, shape index: {}]   ;;  %s9693_s15 = inlined_call_operand.hbm [shape: f32[32,32], index: 15, kind: input, shape index: {}]   ;;  %s9694_s16 = inlined_call_operand.hbm [shape: f32[32,32], index: 16, kind: input, shape index: {}]   ;;  %s9695_s17 = inlined_call_operand.vmem [shape: f32[1,32], index: 17, kind: input, shape index: {}]   ;;  %s9696_s18 = inlined_call_operand.vmem [shape: f32[1,32], index: 18, kind: input, shape index: {}]   ;;  %s9697_s19 = inlined_call_operand.vmem [shape: f32[1,32], index: 19, kind: input, shape index: {}]   ;;  %s9698_s20 = inlined_call_operand.vmem [shape: f32[1,32], index: 20, kind: input, shape index: {}]   ;;  %s9699_s21 = inlined_call_operand.hbm [shape: f32[32,128], index: 21, kind: input, shape index: {}]   ;;  %s9700_s22 = inlined_call_operand.vmem [shape: f32[1,128], index: 22, kind: input, shape index: {}]   ;;  %s9701_s23 = inlined_call_operand.hbm [shape: f32[8,128], index: 23, kind: output, shape index: {}]  }
   0x1   :  { %9713 = sst [smem:[#allocation31_spill]] %s9678_s0 }
   0x2   :  { %9714 = sst [smem:[#allocation32_spill]] %s9679_s1 }
   0x3   :  { %9715 = sst [smem:[#allocation33_spill]] %s9680_s2 }
   0x4   :  { %9716 = sst [smem:[#allocation34_spill]] %s9681_s3 }
   0x5   :  { %9717 = sst [smem:[#allocation35_spill]] %s9682_s4 }
   0x6   :  { %9718 = sst [smem:[#allocation36_spill]] %s9683_s5 }
   0x7   :  { %9719 = sst [smem:[#allocation37_spill]] %s9684_s6 }
   0x8   :  { %9720 = sst [smem:[#allocation38_spill]] %s9685_s7 }
   0x9   :  { %28 = vsyncpa [#allocation3], 0 }
   0xa   :  { %29 = vsyncpa [#allocation6], 0 }
   0xb   :  { %30 = vsyncpa [#allocation9], 0 }
   0xc   :  { %31 = vsyncpa [#allocation12], 0 }
   0xd   :  { %32 = vsyncpa [#allocation15], 0 }
   0xe   :  { %33 = vsyncpa [#allocation18], 0 }
   0xf   :  { %34 = vsyncpa [#allocation21], 0 }
  0x10   :  { %35 = vsyncpa [#allocation4], 0  ;;  %s8412_s4 = smov [#allocation5]   ;;  %s8413_s24 = smov [#allocation8]  }
  0x11   :  { %s55_s30 = sshll.u32 %s8412_s4, 4  ;;  %s88_s25 = sshll.u32 %s8413_s24, 4  ;;  %s56_s30 = int_to_ptr.vmem [resolvable:$true] %s55_s30  ;;  %s8550_s25 = int_to_ptr.vmem [resolvable:$true] %s88_s25 }
  0x12   :  { %s9721_s26 = sld [smem:[#allocation33_spill]] }
  0x18   :  { %s8110_s2 = scalar_lea.hbm %s9721_s26, 256 }
  0x19   :  { %p8111_p0 = scmp.ne.s32.totalorder %s9721_s26, %s8110_s2  ;;  %p8114_p1 = scmp.lt.u32.totalorder %s8110_s2, %s9721_s26 }
  0x1b   :  { %p8116_p2 = pnand %p8114_p1, %p8111_p0 }
  0x1d   :  { %8119 = shalt.err (!%p8116_p2)
}
  0x1e   :  { %s8120_s29 = scalar_lea.vmem %s56_s30, 256  ;;  %p8125_p4 = scmp.lt.s32.totalorder %s56_s30, %s56_s30 }
  0x1f   :  { %p8121_p3 = scmp.ne.s32.totalorder %s56_s30, %s8120_s29  ;;  %p8126_p5 = scmp.lt.s32.totalorder %s8120_s29, %s8120_s29 }
  0x21   :  { %p8127_p6 = por %p8126_p5, %p8125_p4 }
  0x23   :  { %p8128_p7 = pnand %p8127_p6, %p8121_p3 }
  0x25   :  { %8131 = shalt.err (!%p8128_p7)
}
  0x26   :  { %s9709_s3 = smov 128   ;;  %s8415_s0 = smov 8  }
  0x27   :  { %61 = dma.hbm_to_vmem [thread:$0]  %s9721_s26, 256, %s56_s30, [#allocation6], %s9709_s3, %s9709_s3, %s8415_s0  }
  0x28   :  { %s8132_s2 = scalar_lea.hbm %s9686_s8, 16 }
  0x29   :  { %p8133_p8 = scmp.ne.s32.totalorder %s9686_s8, %s8132_s2  ;;  %p8136_p9 = scmp.lt.u32.totalorder %s8132_s2, %s9686_s8 }
  0x2b   :  { %p8138_p10 = pnand %p8136_p9, %p8133_p8 }
  0x2d   :  { %8141 = shalt.err (!%p8138_p10)
}
  0x2e   :  { %s8142_s29 = scalar_lea.vmem %s8550_s25, 16  ;;  %s8146_s30 = scalar_lea.vmem %s8550_s25, 32 }
  0x2f   :  { %p8143_p11 = scmp.ne.s32.totalorder %s8550_s25, %s8142_s29  ;;  %p8147_p12 = scmp.lt.s32.totalorder %s8550_s25, %s8550_s25 }
  0x30   :  { %p8148_p13 = scmp.lt.s32.totalorder %s8146_s30, %s8142_s29 }
  0x32   :  { %p8149_p0 = por %p8148_p13, %p8147_p12 }
  0x34   :  { %p8150_p1 = pnand %p8149_p0, %p8143_p11 }
  0x36   :  { %8153 = shalt.err (!%p8150_p1)
}
  0x37   :  { %91 = dma.hbm_to_vmem [thread:$0]  %s9686_s8, 16, %s8550_s25, [#allocation9]  }
  0x38   :  { %s8416_s24 = smov [#allocation11]   ;;  %s8417_s1 = smov [#allocation14]  }
  0x39   :  { %s108_s5 = sshll.u32 %s8416_s24, 4  ;;  %s129_s2 = sshll.u32 %s8417_s1, 4  ;;  %s109_s5 = int_to_ptr.vmem [resolvable:$true] %s108_s5  ;;  %s8585_s2 = int_to_ptr.vmem [resolvable:$true] %s129_s2 }
  0x3a   :  { %s8154_s7 = scalar_lea.hbm %s9688_s10, 16 }
  0x3b   :  { %p8155_p2 = scmp.ne.s32.totalorder %s9688_s10, %s8154_s7  ;;  %p8158_p3 = scmp.lt.u32.totalorder %s8154_s7, %s9688_s10 }
  0x3d   :  { %p8160_p4 = pnand %p8158_p3, %p8155_p2 }
  0x3f   :  { %8163 = shalt.err (!%p8160_p4)
}
  0x40   :  { %s8164_s8 = scalar_lea.vmem %s109_s5, 16  ;;  %s8168_s25 = scalar_lea.vmem %s109_s5, 32 }
  0x41   :  { %p8165_p5 = scmp.ne.s32.totalorder %s109_s5, %s8164_s8  ;;  %p8169_p6 = scmp.lt.s32.totalorder %s109_s5, %s109_s5 }
  0x42   :  { %p8170_p7 = scmp.lt.s32.totalorder %s8168_s25, %s8164_s8 }
  0x44   :  { %p8171_p8 = por %p8170_p7, %p8169_p6 }
  0x46   :  { %p8172_p9 = pnand %p8171_p8, %p8165_p5 }
  0x48   :  { %8175 = shalt.err (!%p8172_p9)
}
  0x49   :  { %111 = dma.hbm_to_vmem [thread:$0]  %s9688_s10, 16, %s109_s5, [#allocation12]  }
  0x4a   :  { %s8176_s6 = scalar_lea.hbm %s9690_s12, 512 }
  0x4b   :  { %p8177_p10 = scmp.ne.s32.totalorder %s9690_s12, %s8176_s6  ;;  %p8180_p11 = scmp.lt.u32.totalorder %s8176_s6, %s9690_s12 }
  0x4d   :  { %p8182_p12 = pnand %p8180_p11, %p8177_p10 }
  0x4f   :  { %8185 = shalt.err (!%p8182_p12)
}
  0x50   :  { %s8186_s29 = scalar_lea.vmem %s8585_s2, 512  ;;  %p8191_p0 = scmp.lt.s32.totalorder %s8585_s2, %s8585_s2 }
  0x51   :  { %p8187_p13 = scmp.ne.s32.totalorder %s8585_s2, %s8186_s29  ;;  %p8192_p1 = scmp.lt.s32.totalorder %s8186_s29, %s8186_s29 }
  0x53   :  { %p8193_p2 = por %p8192_p1, %p8191_p0 }
  0x55   :  { %p8194_p3 = pnand %p8193_p2, %p8187_p13 }
  0x57   :  { %8197 = shalt.err (!%p8194_p3)
}
  0x58   :  { %s9722_s10 = smov 128   ;;  %s8418_s8 = smov [#allocation17]  }
  0x59   :  { %135 = dma.hbm_to_vmem [thread:$0]  %s9690_s12, 512, %s8585_s2, [#allocation15], %s9722_s10, %s9722_s10, %s8415_s0  }
  0x5a   :  { %s155_s25 = sshll.u32 %s8418_s8, 4  ;;  %s8419_s26 = smov [#allocation2]   ;;  %s156_s25 = int_to_ptr.vmem [resolvable:$true] %s155_s25 }
  0x5b   :  { %s43_s4 = sshll.u32 %s8419_s26, 4  ;;  %s8198_s6 = scalar_lea.hbm %s9693_s15, 512  ;;  %s8619_s4 = int_to_ptr.vmem [resolvable:$true] %s43_s4 }
  0x5c   :  { %p8199_p4 = scmp.ne.s32.totalorder %s9693_s15, %s8198_s6  ;;  %p8202_p5 = scmp.lt.u32.totalorder %s8198_s6, %s9693_s15 }
  0x5e   :  { %p8204_p6 = pnand %p8202_p5, %p8199_p4 }
  0x60   :  { %8207 = shalt.err (!%p8204_p6)
}
  0x61   :  { %s8208_s12 = scalar_lea.vmem %s156_s25, 512  ;;  %p8213_p8 = scmp.lt.s32.totalorder %s156_s25, %s156_s25 }
  0x62   :  { %p8209_p7 = scmp.ne.s32.totalorder %s156_s25, %s8208_s12  ;;  %p8214_p9 = scmp.lt.s32.totalorder %s8208_s12, %s8208_s12 }
  0x64   :  { %p8215_p10 = por %p8214_p9, %p8213_p8 }
  0x66   :  { %p8216_p11 = pnand %p8215_p10, %p8209_p7 }
  0x68   :  { %8219 = shalt.err (!%p8216_p11)
}
  0x69   :  { %161 = dma.hbm_to_vmem [thread:$0]  %s9693_s15, 512, %s156_s25, [#allocation18], %s9722_s10, %s9722_s10, %s8415_s0  }
  0x6a   :  { %s9723_s8 = sld [smem:[#allocation32_spill]] }
  0x70   :  { %s8220_s26 = scalar_lea.hbm %s9723_s8, 256 }
  0x71   :  { %p8221_p12 = scmp.ne.s32.totalorder %s9723_s8, %s8220_s26  ;;  %p8224_p13 = scmp.lt.u32.totalorder %s8220_s26, %s9723_s8 }
  0x73   :  { %p8226_p0 = pnand %p8224_p13, %p8221_p12 }
  0x75   :  { %8229 = shalt.err (!%p8226_p0)
}
  0x76   :  { %s8230_s27 = scalar_lea.vmem %s8619_s4, 256  ;;  %p8235_p2 = scmp.lt.s32.totalorder %s8619_s4, %s8619_s4 }
  0x77   :  { %p8231_p1 = scmp.ne.s32.totalorder %s8619_s4, %s8230_s27  ;;  %p8236_p3 = scmp.lt.s32.totalorder %s8230_s27, %s8230_s27 }
  0x79   :  { %p8237_p4 = por %p8236_p3, %p8235_p2 }
  0x7b   :  { %p8238_p5 = pnand %p8237_p4, %p8231_p1 }
  0x7d   :  { %8241 = shalt.err (!%p8238_p5)
}
  0x7e   :  { %49 = dma.hbm_to_vmem [thread:$0]  %s9723_s8, 256, %s8619_s4, [#allocation3], %s9722_s10, %s9722_s10, %s8415_s0  }
  0x7f   :  { %s8420_s7 = smov [#allocation7]   ;;  %s8421_s12 = smov [#allocation10]  }
  0x80   :  { %s67_s28 = sshll.u32 %s8420_s7, 4  ;;  %s98_s2 = sshll.u32 %s8421_s12, 4  ;;  %s68_s28 = int_to_ptr.vmem [resolvable:$true] %s67_s28  ;;  %s99_s2 = int_to_ptr.vmem [resolvable:$true] %s98_s2 }
  0x81   :  { %s9724_s30 = sld [smem:[#allocation34_spill]] }
  0x87   :  { %s8242_s26 = scalar_lea.hbm %s9724_s30, 256 }
  0x88   :  { %p8243_p6 = scmp.ne.s32.totalorder %s9724_s30, %s8242_s26  ;;  %p8246_p7 = scmp.lt.u32.totalorder %s8242_s26, %s9724_s30 }
  0x8a   :  { %p8248_p8 = pnand %p8246_p7, %p8243_p6 }
  0x8c   :  { %8251 = shalt.err (!%p8248_p8)
}
  0x8d   :  { %s8252_s4 = scalar_lea.vmem %s68_s28, 256  ;;  %p8257_p10 = scmp.lt.s32.totalorder %s68_s28, %s68_s28 }
  0x8e   :  { %p8253_p9 = scmp.ne.s32.totalorder %s68_s28, %s8252_s4  ;;  %p8258_p11 = scmp.lt.s32.totalorder %s8252_s4, %s8252_s4 }
  0x90   :  { %p8259_p12 = por %p8258_p11, %p8257_p10 }
  0x92   :  { %p8260_p13 = pnand %p8259_p12, %p8253_p9 }
  0x94   :  { %8263 = shalt.err (!%p8260_p13)
}
  0x95   :  { %73 = dma.hbm_to_vmem [thread:$0]  %s9724_s30, 256, %s68_s28, [#allocation6], %s9722_s10, %s9722_s10, %s8415_s0  }
  0x96   :  { %s8264_s7 = scalar_lea.hbm %s9687_s9, 16 }
  0x97   :  { %p8265_p0 = scmp.ne.s32.totalorder %s9687_s9, %s8264_s7  ;;  %p8268_p1 = scmp.lt.u32.totalorder %s8264_s7, %s9687_s9 }
  0x99   :  { %p8270_p2 = pnand %p8268_p1, %p8265_p0 }
  0x9b   :  { %8273 = shalt.err (!%p8270_p2)
}
  0x9c   :  { %s8274_s24 = scalar_lea.vmem %s99_s2, 16  ;;  %s8278_s1 = scalar_lea.vmem %s99_s2, 32 }
  0x9d   :  { %p8275_p3 = scmp.ne.s32.totalorder %s99_s2, %s8274_s24  ;;  %p8279_p4 = scmp.lt.s32.totalorder %s99_s2, %s99_s2 }
  0x9e   :  { %p8280_p5 = scmp.lt.s32.totalorder %s8278_s1, %s8274_s24 }
  0xa0   :  { %p8281_p6 = por %p8280_p5, %p8279_p4 }
  0xa2   :  { %p8282_p7 = pnand %p8281_p6, %p8275_p3 }
  0xa4   :  { %8285 = shalt.err (!%p8282_p7)
}
  0xa5   :  { %101 = dma.hbm_to_vmem [thread:$0]  %s9687_s9, 16, %s99_s2, [#allocation9]  }
  0xa6   :  { %s8422_s6 = smov [#allocation13]   ;;  %s8423_s4 = smov [#allocation16]  }
  0xa7   :  { %s117_s3 = sshll.u32 %s8422_s6, 4  ;;  %s143_s8 = sshll.u32 %s8423_s4, 4  ;;  %s118_s3 = int_to_ptr.vmem [resolvable:$true] %s117_s3  ;;  %s8683_s8 = int_to_ptr.vmem [resolvable:$true] %s143_s8 }
  0xa8   :  { %s8286_s25 = scalar_lea.hbm %s9689_s11, 512 }
  0xa9   :  { %p8287_p8 = scmp.ne.s32.totalorder %s9689_s11, %s8286_s25  ;;  %p8290_p9 = scmp.lt.u32.totalorder %s8286_s25, %s9689_s11 }
  0xab   :  { %p8292_p10 = pnand %p8290_p9, %p8287_p8 }
  0xad   :  { %8295 = shalt.err (!%p8292_p10)
}
  0xae   :  { %s8296_s9 = scalar_lea.vmem %s118_s3, 512  ;;  %p8301_p12 = scmp.lt.s32.totalorder %s118_s3, %s118_s3 }
  0xaf   :  { %p8297_p11 = scmp.ne.s32.totalorder %s118_s3, %s8296_s9  ;;  %p8302_p13 = scmp.lt.s32.totalorder %s8296_s9, %s8296_s9 }
  0xb1   :  { %p8303_p0 = por %p8302_p13, %p8301_p12 }
  0xb3   :  { %p8304_p1 = pnand %p8303_p0, %p8297_p11 }
  0xb5   :  { %8307 = shalt.err (!%p8304_p1)
}
  0xb6   :  { %123 = dma.hbm_to_vmem [thread:$0]  %s9689_s11, 512, %s118_s3, [#allocation12], %s9722_s10, %s9722_s10, %s8415_s0  }
  0xb7   :  { %s8308_s28 = scalar_lea.hbm %s9692_s14, 512 }
  0xb8   :  { %p8309_p2 = scmp.ne.s32.totalorder %s9692_s14, %s8308_s28  ;;  %p8312_p3 = scmp.lt.u32.totalorder %s8308_s28, %s9692_s14 }
  0xba   :  { %p8314_p4 = pnand %p8312_p3, %p8309_p2 }
  0xbc   :  { %8317 = shalt.err (!%p8314_p4)
}
  0xbd   :  { %s8318_s15 = scalar_lea.vmem %s8683_s8, 512  ;;  %p8323_p6 = scmp.lt.s32.totalorder %s8683_s8, %s8683_s8 }
  0xbe   :  { %p8319_p5 = scmp.ne.s32.totalorder %s8683_s8, %s8318_s15  ;;  %p8324_p7 = scmp.lt.s32.totalorder %s8318_s15, %s8318_s15 }
  0xc0   :  { %p8325_p8 = por %p8324_p7, %p8323_p6 }
  0xc2   :  { %p8326_p9 = pnand %p8325_p8, %p8319_p5 }
  0xc4   :  { %8329 = shalt.err (!%p8326_p9)
}
  0xc5   :  { %149 = dma.hbm_to_vmem [thread:$0]  %s9692_s14, 512, %s8683_s8, [#allocation15], %s9722_s10, %s9722_s10, %s8415_s0  }
  0xc6   :  { %s8424_s25 = smov [#allocation19]   ;;  %s8425_s12 = smov [#allocation20]  }
  0xc7   :  { %s167_s7 = sshll.u32 %s8424_s25, 4  ;;  %s187_s29 = sshll.u32 %s8425_s12, 4  ;;  %s168_s7 = int_to_ptr.vmem [resolvable:$true] %s167_s7  ;;  %s8720_s29 = int_to_ptr.vmem [resolvable:$true] %s187_s29 }
  0xc8   :  { %s8330_s2 = scalar_lea.hbm %s9694_s16, 512 }
  0xc9   :  { %p8331_p10 = scmp.ne.s32.totalorder %s9694_s16, %s8330_s2  ;;  %p8334_p11 = scmp.lt.u32.totalorder %s8330_s2, %s9694_s16 }
  0xcb   :  { %p8336_p12 = pnand %p8334_p11, %p8331_p10 }
  0xcd   :  { %8339 = shalt.err (!%p8336_p12)
}
  0xce   :  { %s8340_s14 = scalar_lea.vmem %s168_s7, 512  ;;  %p8345_p0 = scmp.lt.s32.totalorder %s168_s7, %s168_s7 }
  0xcf   :  { %p8341_p13 = scmp.ne.s32.totalorder %s168_s7, %s8340_s14  ;;  %p8346_p1 = scmp.lt.s32.totalorder %s8340_s14, %s8340_s14 }
  0xd1   :  { %p8347_p2 = por %p8346_p1, %p8345_p0 }
  0xd3   :  { %p8348_p3 = pnand %p8347_p2, %p8341_p13 }
  0xd5   :  { %8351 = shalt.err (!%p8348_p3)
}
  0xd6   :  { %173 = dma.hbm_to_vmem [thread:$0]  %s9694_s16, 512, %s168_s7, [#allocation18], %s9722_s10, %s9722_s10, %s8415_s0  }
  0xd7   :  { %s8352_s27 = scalar_lea.hbm %s9699_s21, 512 }
  0xd8   :  { %p8353_p4 = scmp.ne.s32.totalorder %s9699_s21, %s8352_s27  ;;  %p8356_p5 = scmp.lt.u32.totalorder %s8352_s27, %s9699_s21 }
  0xda   :  { %p8358_p6 = pnand %p8356_p5, %p8353_p4 }
  0xdc   :  { %8361 = shalt.err (!%p8358_p6)
}
  0xdd   :  { %s8362_s12 = scalar_lea.vmem %s8720_s29, 512  ;;  %p8367_p8 = scmp.lt.s32.totalorder %s8720_s29, %s8720_s29 }
  0xde   :  { %p8363_p7 = scmp.ne.s32.totalorder %s8720_s29, %s8362_s12  ;;  %p8368_p9 = scmp.lt.s32.totalorder %s8362_s12, %s8362_s12 }
  0xe0   :  { %p8369_p10 = por %p8368_p9, %p8367_p8 }
  0xe2   :  { %p8370_p11 = pnand %p8369_p10, %p8363_p7 }
  0xe4   :  { %8373 = shalt.err (!%p8370_p11)
}
  0xe5   :  { %193 = dma.hbm_to_vmem [thread:$0]  %s9699_s21, 512, %s8720_s29, [#allocation21], %s9722_s10, %s9722_s10, %s8415_s0  }
  0xe6   :  { %8396 = dma.done.wait [#allocation3], 256  }
  0xe7   :  { %8397 = vsyncadd [#allocation3], 4294967040 }
  0xe8   :  { %8398 = dma.done.wait [#allocation6], 512  }
  0xe9   :  { %8399 = vsyncadd [#allocation6], 4294966784 }
  0xea   :  { %8400 = dma.done.wait [#allocation9], 32  }
  0xeb   :  { %8401 = vsyncadd [#allocation9], 4294967264 }
  0xec   :  { %8402 = dma.done.wait [#allocation12], 528  }
  0xed   :  { %8403 = vsyncadd [#allocation12], 4294966768 }
  0xee   :  { %8404 = dma.done.wait [#allocation15], 1024  }
  0xef   :  { %8405 = vsyncadd [#allocation15], 4294966272 }
  0xf0   :  { %8406 = dma.done.wait [#allocation18], 1024  }
  0xf1   :  { %8407 = vsyncadd [#allocation18], 4294966272 }
  0xf2   :  { %8408 = dma.done.wait [#allocation21], 512  }
  0xf3   :  { %8409 = vsyncadd [#allocation21], 4294966784  ;;  %vm324_vm0 = vcmask 130048   ;;  %v232_v0 = vld [vmem:[#allocation2] sm:$0xff]  ;;  %v233_v1 = vld [vmem:[#allocation2 + $0x8] sm:$0xff]  ;;  %s9725_s21 = sld [smem:[#allocation31_spill]] }
  0xf4   :  { %v7491_v3 = vpack.c.bf16 %v233_v1, %v232_v0  ;;  %v234_v4 = vld [vmem:[#allocation5] sm:$0xff]  ;;  %v235_v5 = vld [vmem:[#allocation5 + $0x8] sm:$0xff]  ;;  %v236_v9 = vld [vmem:[#allocation7] sm:$0xff]  ;;  %s9726_s1 = sld [smem:[#allocation35_spill]]  ;;  %v8426_v16 = vmov 0.0|0.0   ;;  %s9727_s0 = sld [smem:[#allocation37_spill]] }
  0xf5   :  { %v7495_v6 = vpack.c.bf16 %v235_v5, %v234_v4  ;;  %v237_v10 = vld [vmem:[#allocation7 + $0x8] sm:$0xff]  ;;  %s9728_s30 = sld [smem:[#allocation36_spill]]  ;;  %vm8427_vm1 = vmmov 0   ;;  %v9711_v32 = vmov 0.0   ;;  %v257_v37 = vld [vmem:[#allocation13] sm:$0xff]  ;;  %v258_v38 = vld [vmem:[#allocation13 + $0x8] sm:$0xff] }
  0xf6   :  { %7941 = vmatprep.subr.bf16.mxu1 %v7491_v3  ;;  %7492 = vmatprep.subr.bf16.mxu0 %v7491_v3  ;;  %v7499_v13 = vpack.c.bf16 %v237_v10, %v236_v9  ;;  %v261_v39 = vld [vmem:[#allocation14] sm:$0xff]  ;;  %v8890_v40 = vpack.c.bf16 %v258_v38, %v257_v37  ;;  %v262_v41 = vld [vmem:[#allocation14 + $0x8] sm:$0xff]  ;;  %v259_v43 = vld [vmem:[#allocation13 + $0x10] sm:$0xff]  ;;  %s9729_s16 = sld [smem:[#allocation38_spill]]  ;;  %vm678_vm2 = vcmask 261120   ;;  %s8429_s25 = smov [#allocation22]  }
  0xf7   :  { %7942 = vmatpush3.bf16.msra.mxu1 %v7491_v3  ;;  %7494 = vmatpush3.bf16.msra.mxu0 %v7491_v3  ;;  %v8892_v42 = vpack.c.bf16 %v262_v41, %v261_v39  ;;  %v260_v44 = vld [vmem:[#allocation13 + $0x18] sm:$0xff]  ;;  %v263_v45 = vld [vmem:[#allocation14 + $0x10] sm:$0xff]  ;;  %s6130_s12 = sshll.u32 %s8429_s25, 4  ;;  %s6131_s12 = int_to_ptr.vmem [resolvable:$true] %s6130_s12 }
  0xf8   :  { %7496 = vmatprep.subr.bf16.mxu1 %v7495_v6  ;;  %7500 = vmatprep.subr.bf16.mxu0 %v7499_v13  ;;  %v8898_v46 = vpack.c.bf16 %v260_v44, %v259_v43  ;;  %v264_v47 = vld [vmem:[#allocation14 + $0x18] sm:$0xff]  ;;  %p8379_p13 = scmp.lt.s32.totalorder %s6131_s12, %s6131_s12 }
  0xf9   :  { %v8760_v2 = vld [vmem:[%s9725_s21 + $0x30] sm:$0xff]  ;;  %v8767_v7 = vld [vmem:[%s9725_s21 + $0x38] sm:$0xff]  ;;  %v309_v8 = vld [vmem:[%s9725_s21] sm:$0xff]  ;;  %v8900_v48 = vpack.c.bf16 %v264_v47, %v263_v45 }
  0xfa   :  { %6653 = vmatprep.mubr.msk.f32.mxu1 %vm324_vm0, %v8760_v2  ;;  %v238_v11 = vld [vmem:[%s9726_s1] sm:$0xff]  ;;  %v239_v12 = vld [vmem:[%s9726_s1 + $0x8] sm:$0xff]  ;;  %6644 = vmatprep.mubr.msk.f32.mxu0 %vm324_vm0, %v309_v8  ;;  %v311_v17 = vld [vmem:[%s9725_s21 + $0x10] sm:$0xff] }
  0xfb   :  { %v310_v14 = vld [vmem:[%s9725_s21 + $0x8] sm:$0xff]  ;;  %6654 = vmatmul.mubr.msk.f32.vlgmr.msra.gmra.mrb[0].mxu1 %vm324_vm0, %v8767_v7  ;;  %v8786_v15 = vpack.c.bf16 %v239_v12, %v238_v11  ;;  %v240_v18 = vld [vmem:[%s9726_s1 + $0x10] sm:$0xff]  ;;  %v241_v19 = vld [vmem:[%s9726_s1 + $0x18] sm:$0xff] }
  0xfc   :  { %6645 = vmatmul.mubr.msk.f32.vlgmr.msra.gmra.mrb[0].mxu0 %vm324_vm0, %v310_v14  ;;  %7498 = vmatpush3.bf16.msra.mxu1 %v7495_v6  ;;  %v312_v20 = vld [vmem:[%s9725_s21 + $0x18] sm:$0xff]  ;;  %v313_v21 = vld [vmem:[%s9725_s21 + $0x20] sm:$0xff]  ;;  %v8809_v22 = vpack.c.bf16 %v241_v19, %v240_v18  ;;  %v247_v24 = vld [vmem:[%s9727_s0 + $0x8] sm:$0xff] }
  0xfd   :  { %6660 = vmatprep.mubr.msk.f32.mxu1 %vm324_vm0, %v309_v8  ;;  %7503 = vmatprep.subr.bf16.mxu1 %v8426_v16  ;;  %v246_v23 = vld [vmem:[%s9727_s0] sm:$0xff]  ;;  %v314_v25 = vld [vmem:[%s9725_s21 + $0x28] sm:$0xff]  ;;  %v248_v27 = vld [vmem:[%s9727_s0 + $0x10] sm:$0xff] }
  0xfe   :  { %7502 = vmatpush3.bf16.msra.mxu0 %v7499_v13  ;;  %6647 = vmatprep.mubr.msk.f32.mxu0 %vm324_vm0, %v311_v17  ;;  %v8827_v26 = vpack.c.bf16 %v247_v24, %v246_v23  ;;  %v249_v28 = vld [vmem:[%s9727_s0 + $0x18] sm:$0xff]  ;;  %v242_v29 = vld [vmem:[%s9728_s30] sm:$0xff]  ;;  %v243_v30 = vld [vmem:[%s9728_s30 + $0x8] sm:$0xff] }
  0xff   :  { %6661 = vmatmul.mubr.msk.f32.vlgmr.msra.gmra.mrb[2].mxu1 %vm324_vm0, %v310_v14  ;;  %7515 = vmatprep.subr.bf16.mxu0 %v8426_v16  ;;  %v8850_v31 = vpack.c.bf16 %v249_v28, %v248_v27  ;;  %v8857_v33 = vpack.c.bf16 %v243_v30, %v242_v29  ;;  %v244_v34 = vld [vmem:[%s9728_s30 + $0x10] sm:$0xff]  ;;  %v245_v35 = vld [vmem:[%s9728_s30 + $0x18] sm:$0xff]  ;;  %v6150_v49 = vld [vmem:[%s9729_s16] ss:$0 sm:$0xff]  ;;  %s8374_s16 = scalar_lea.vmem %s6131_s12, 128 }
 0x100   :  { %6648 = vmatmul.mubr.msk.f32.gmra.mrb[2].mxu0 %vm324_vm0, %v312_v20  ;;  %7505 = vmatpush3.bf16.msra.mxu1 %v8786_v15  ;;  %v8871_v36 = vpack.c.bf16 %v245_v35, %v244_v34  ;;  %v6159_v57 = vld [vmem:[#allocation8] ss:$0 sm:$0xff]  ;;  %v6168_v9 = vld [vmem:[#allocation10] ss:$0 sm:$0xff]  ;;  %p8375_p12 = scmp.ne.s32.totalorder %s6131_s12, %s8374_s16  ;;  %p8380_p0 = scmp.lt.s32.totalorder %s8374_s16, %s8374_s16 }
 0x101   :  { %6663 = vmatprep.mubr.msk.f32.mxu1 %vm324_vm0, %v311_v17  ;;  %7506 = vmatprep.subr.bf16.mxu1 %v8426_v16 }
 0x102   :  { %6650 = vmatprep.mubr.msk.f32.mxu0 %vm324_vm0, %v313_v21  ;;  %p8381_p1 = por %p8380_p0, %p8379_p13 }
 0x103   :  { %6664 = vmatmul.mubr.msk.f32.gmra.mrb[4].mxu1 %vm324_vm0, %v312_v20 }
 0x104   :  { %6651 = vmatmul.mubr.msk.f32.gmra.mrb[4].mxu0 %vm324_vm0, %v314_v25  ;;  %6666 = vmatprep.mubr.msk.f32.mxu1 %vm324_vm0, %v313_v21  ;;  %p8382_p2 = pnand %p8381_p1, %p8375_p12 }
 0x105   :  { %7508 = vmatpush3.bf16.msra.mxu1 %v8809_v22  ;;  %6676 = vmatprep.mubr.msk.f32.mxu0 %vm324_vm0, %v309_v8 }
 0x106   :  { %7509 = vmatprep.subr.bf16.mxu1 %v8426_v16 }
 0x107   :  { %6667 = vmatmul.mubr.msk.f32.gmra.mrb[6].mxu1 %vm324_vm0, %v314_v25 }
 0x108   :  { %6677 = vmatmul.mubr.msk.f32.vlgmr.msra.gmra.mrb[6].mxu0 %vm324_vm0, %v310_v14  ;;  %6669 = vmatprep.mubr.msk.f32.mxu1 %vm324_vm0, %v8760_v2 }
 0x109   :  { %7517 = vmatpush3.bf16.msra.mxu0 %v8827_v26  ;;  %6679 = vmatprep.mubr.msk.f32.mxu0 %vm324_vm0, %v311_v17 }
 0x10a   :  { %7518 = vmatprep.subr.bf16.mxu0 %v8426_v16 }
 0x10b   :  { %6670 = vmatmul.mubr.msk.f32.gmra.mrb[8].mxu1 %vm324_vm0, %v8767_v7 }
 0x10c   :  { %6680 = vmatmul.mubr.msk.f32.gmra.mrb[8].mxu0 %vm324_vm0, %v312_v20  ;;  %6696 = vmatprep.mubr.msk.f32.mxu1 %vm8427_vm1, %v9711_v32 }
 0x10d   :  { %6682 = vmatprep.mubr.msk.f32.mxu0 %vm324_vm0, %v313_v21  ;;  %7520 = vmatpush3.bf16.msra.mxu0 %v8850_v31 }
 0x10e   :  { %7527 = vmatprep.subr.bf16.mxu0 %v8426_v16 }
 0x10f   :  { %6697 = vmatmul.mubr.f32.vlgmr.msra.gmra.mrb[10].mxu1 %v9711_v32 }
 0x110   :  { %6683 = vmatmul.mubr.msk.f32.gmra.mrb[10].mxu0 %vm324_vm0, %v314_v25  ;;  %7511 = vmatpush3.bf16.msra.mxu1 %v8857_v33 }
 0x111   :  { %6707 = vmatprep.mubr.msk.f32.mxu1 %vm8427_vm1, %v9711_v32  ;;  %7512 = vmatprep.subr.bf16.mxu1 %v8426_v16 }
 0x112   :  { %6685 = vmatprep.mubr.msk.f32.mxu0 %vm324_vm0, %v8760_v2 }
 0x114   :  { %6686 = vmatmul.mubr.msk.f32.gmra.mrb[12].mxu0 %vm324_vm0, %v8767_v7  ;;  %7514 = vmatpush3.bf16.msra.mxu1 %v8871_v36 }
 0x115   :  { %6718 = vmatprep.mubr.msk.f32.mxu0 %vm8427_vm1, %v9711_v32  ;;  %7521 = vmatprep.subr.bf16.mxu1 %v8426_v16 }
 0x117   :  { %6708 = vmatmul.mubr.f32.vlgmr.msra.gmra.mrb[12].mxu1 %v9711_v32 }
 0x118   :  { %6719 = vmatmul.mubr.f32.vlgmr.msra.gmra.mrb[14].mxu0 %v9711_v32  ;;  %6729 = vmatprep.mubr.msk.f32.mxu1 %vm8427_vm1, %v9711_v32 }
 0x119   :  { %6740 = vmatprep.mubr.msk.f32.mxu0 %vm8427_vm1, %v9711_v32  ;;  %7523 = vmatpush3.bf16.msra.mxu1 %v8890_v40 }
 0x11a   :  { %7529 = vmatpush3.bf16.msra.mxu0 %v8892_v42  ;;  %7524 = vmatprep.subr.bf16.mxu1 %v8426_v16 }
 0x11b   :  { %7530 = vmatprep.subr.bf16.mxu0 %v8426_v16 }
 0x11d   :  { %7526 = vmatpush3.bf16.msra.mxu1 %v8898_v46 }
 0x11e   :  { %7532 = vmatpush3.bf16.msra.mxu0 %v8900_v48  ;;  %7533 = vmatprep.subr.bf16.mxu1 %v8426_v16 }
 0x11f   :  { %7545 = vmatprep.subr.bf16.mxu0 %v8426_v16 }
 0x1ce   :  { %v6655_v50 = vpop.f32.mrb[0].mxu1 }
 0x1cf   :  { %v6646_v51 = vpop.f32.mrb[0].mxu0  ;;  %v8909_v52 = vadd.f32 %v6655_v50, %v6150_v49  ;;  %v445_v53 = vpop.f32.mrb[1].mxu1 }
 0x1d0   :  { %v8911_v54 = vadd.f32 %v6646_v51, %v6150_v49  ;;  %v415_v55 = vpop.f32.mrb[1].mxu0  ;;  %v8913_v56 = vadd.f32 %v6150_v49, %v445_v53 }
 0x1d1   :  { %v416_v29 = vadd.f32 %v6150_v49, %v415_v55 }
 0x1d2   :  { %v6662_v58 = vpop.f32.mrb[2].mxu1 }
 0x1d3   :  { %v6649_v59 = vpop.f32.mrb[2].mxu0  ;;  %v8915_v60 = vadd.f32 %v6662_v58, %v6159_v57  ;;  %v527_v61 = vpop.f32.mrb[3].mxu1 }
 0x1d4   :  { %v8917_v62 = vadd.f32 %v6649_v59, %v6150_v49  ;;  %v425_v63 = vpop.f32.mrb[3].mxu0  ;;  %v528_v51 = vadd.f32 %v6159_v57, %v527_v61 }
 0x1d5   :  { %v8919_v0 = vadd.f32 %v6150_v49, %v425_v63 }
 0x1d6   :  { %v6665_v1 = vpop.f32.mrb[4].mxu1 }
 0x1d7   :  { %v6652_v2 = vpop.f32.mrb[4].mxu0  ;;  %v8921_v3 = vadd.f32 %v6665_v1, %v6159_v57  ;;  %v537_v4 = vpop.f32.mrb[5].mxu1  ;;  %v8951_v1 = vld [vmem:[#allocation11] ss:$0 sm:$0xff] }
 0x1d8   :  { %v8923_v5 = vadd.f32 %v6652_v2, %v6150_v49  ;;  %v435_v6 = vpop.f32.mrb[5].mxu0  ;;  %v8925_v7 = vadd.f32 %v6159_v57, %v537_v4 }
 0x1d9   :  { %v8927_v8 = vadd.f32 %v6150_v49, %v435_v6 }
 0x1da   :  { %v6668_v10 = vpop.f32.mrb[6].mxu1 }
 0x1db   :  { %v6678_v11 = vpop.f32.mrb[6].mxu0  ;;  %v8929_v12 = vadd.f32 %v6668_v10, %v6159_v57  ;;  %v547_v13 = vpop.f32.mrb[7].mxu1 }
 0x1dc   :  { %v8931_v14 = vadd.f32 %v6678_v11, %v6168_v9  ;;  %v639_v17 = vpop.f32.mrb[7].mxu0  ;;  %v8933_v18 = vadd.f32 %v6159_v57, %v547_v13 }
 0x1dd   :  { %v640_v11 = vadd.f32 %v6168_v9, %v639_v17 }
 0x1de   :  { %v6671_v19 = vpop.f32.mrb[8].mxu1 }
 0x1df   :  { %v6681_v20 = vpop.f32.mrb[8].mxu0  ;;  %v8935_v21 = vadd.f32 %v6671_v19, %v6159_v57  ;;  %v557_v23 = vpop.f32.mrb[9].mxu1 }
 0x1e0   :  { %v8937_v24 = vadd.f32 %v6681_v20, %v6168_v9  ;;  %v649_v25 = vpop.f32.mrb[9].mxu0  ;;  %v8939_v27 = vadd.f32 %v6159_v57, %v557_v23  ;;  %v265_v23 = vld [vmem:[%s9691_s13] sm:$0xff] }
 0x1e1   :  { %v8941_v28 = vadd.f32 %v6168_v9, %v649_v25 }
 0x1e2   :  { %v748_v30 = vpop.f32.mrb[10].mxu1 }
 0x1e3   :  { %v6684_v34 = vpop.f32.mrb[10].mxu0  ;;  %v892_v35 = vadd.f32 %v748_v30, %v416_v29  ;;  %v6698_v37 = vpop.f32.mrb[11].mxu1  ;;  %v266_v29 = vld [vmem:[%s9691_s13 + $0x8] sm:$0xff]  ;;  %v273_v30 = vld [vmem:[#allocation17] sm:$0xff] }
 0x1e4   :  { %v8943_v38 = vadd.f32 %v6684_v34, %v6168_v9  ;;  %v659_v39 = vpop.f32.mrb[11].mxu0  ;;  %v274_v34 = vld [vmem:[#allocation17 + $0x8] sm:$0xff]  ;;  %v8960_v17 = vpack.c.bf16 %v266_v29, %v265_v23 }
 0x1e5   :  { %v8945_v41 = vadd.f32 %v6168_v9, %v659_v39  ;;  %v893_v43 = vmul.f32 0.5, %v892_v35  ;;  %v8962_v39 = vpack.c.bf16 %v274_v34, %v273_v30  ;;  %v9056_v30 = vld [vmem:[%s9695_s17] ss:$0 sm:$0xff] }
 0x1e7   :  { %v6687_v44 = vpop.f32.mrb[12].mxu0  ;;  %8009 = vtanh.f32 %v893_v43  ;;  %v267_v43 = vld [vmem:[%s9691_s13 + $0x10] sm:$0xff] }
 0x1e8   :  { %v8947_v45 = vadd.f32 %v6687_v44, %v6168_v9  ;;  %v669_v47 = vpop.f32.mrb[13].mxu0 }
 0x1e9   :  { %v8949_v50 = vadd.f32 %v6168_v9, %v669_v47  ;;  %v268_v47 = vld [vmem:[%s9691_s13 + $0x18] sm:$0xff] }
 0x1ea   :  { %v818_v53 = vpop.f32.mrb[12].mxu1 }
 0x1eb   :  { %v888_v49 = vpop.f32.mrb[14].mxu0  ;;  %v897_v55 = vadd.f32 %v818_v53, %v528_v51  ;;  %v6709_v58 = vpop.f32.mrb[13].mxu1  ;;  %v275_v51 = vld [vmem:[#allocation17 + $0x10] sm:$0xff]  ;;  %v276_v53 = vld [vmem:[#allocation17 + $0x18] sm:$0xff] }
 0x1ec   :  { %v6720_v59 = vpop.f32.mrb[15].mxu0  ;;  %v889_v6 = vadd.f32 %v8951_v1, %v888_v49  ;;  %v8978_v49 = vpack.c.bf16 %v268_v47, %v267_v43  ;;  %v269_v58 = vld [vmem:[#allocation16] sm:$0xff] }
 0x1ed   :  { %v898_v63 = vmul.f32 0.5, %v897_v55  ;;  %v8980_v55 = vpack.c.bf16 %v276_v53, %v275_v51  ;;  %v270_v59 = vld [vmem:[#allocation16 + $0x8] sm:$0xff] }
 0x1ef   :  { %8011 = vtanh.f32 %v898_v63  ;;  %v277_v63 = vld [vmem:[#allocation19] sm:$0xff] }
 0x1f1   :  { %v8010_v2 = vpop.eup %8009 }
 0x1f2   :  { %v895_v4 = vmul.f32 0.5, %v8010_v2  ;;  %v278_v2 = vld [vmem:[#allocation19 + $0x8] sm:$0xff] }
 0x1f4   :  { %v896_v10 = vadd.f32 0.5, %v895_v4  ;;  %v8990_v4 = vpack.c.bf16 %v270_v59, %v269_v58 }
 0x1f6   :  { %v902_v13 = vmul.f32 %v896_v10, %v889_v6  ;;  %v8992_v6 = vpack.c.bf16 %v278_v2, %v277_v63  ;;  %v271_v10 = vld [vmem:[#allocation16 + $0x10] sm:$0xff] }
 0x1f8   :  { %v903_v19 = vadd.f32 %v902_v13, %v640_v11  ;;  %v272_v11 = vld [vmem:[#allocation16 + $0x18] sm:$0xff]  ;;  %v279_v13 = vld [vmem:[#allocation19 + $0x10] sm:$0xff] }
 0x1f9   :  { %v8012_v20 = vpop.eup %8011 }
 0x1fa   :  { %8013 = vtanh.f32 %v903_v19  ;;  %v900_v57 = vmul.f32 0.5, %v8012_v20  ;;  %v280_v19 = vld [vmem:[#allocation19 + $0x18] sm:$0xff]  ;;  %v9001_v20 = vpack.c.bf16 %v272_v11, %v271_v10 }
 0x1fc   :  { %v901_v61 = vadd.f32 0.5, %v900_v57  ;;  %v9003_v57 = vpack.c.bf16 %v280_v19, %v279_v13 }
 0x1fe   :  { %v905_v25 = vsub.f32 1.0, %v901_v61  ;;  %v907_v37 = vmul.f32 0.0, %v901_v61 }
 0x204   :  { %v8014_v35 = vpop.eup %8013 }
 0x205   :  { %v906_v9 = vmul.f32 %v8014_v35, %v905_v25 }
 0x207   :  { %v8967_v44 = vadd.f32 %v907_v37, %v906_v9  ;;  %v9061_v37 = vld [vmem:[%s9696_s18] ss:$0 sm:$0xff] }
 0x209   :  { %6730 = vmatmul.mubr.msk.f32.vlgmr.msra.gmra.mrb[14].mxu1 %vm678_vm2, %v8967_v44  ;;  %6741 = vmatmul.mubr.msk.f32.vlgmr.msra.gmra.mrb[16].mxu0 %vm678_vm2, %v8967_v44 }
 0x20a   :  { %7535 = vmatpush3.bf16.msra.mxu1 %v8960_v17  ;;  %7547 = vmatpush3.bf16.msra.mxu0 %v8962_v39 }
 0x20b   :  { %7536 = vmatprep.subr.bf16.mxu1 %v8426_v16  ;;  %7548 = vmatprep.subr.bf16.mxu0 %v8426_v16 }
 0x20c   :  { %6751 = vmatprep.mubr.msk.f32.mxu1 %vm8427_vm1, %v9711_v32  ;;  %6773 = vmatprep.mubr.msk.f32.mxu0 %vm8427_vm1, %v9711_v32 }
 0x20e   :  { %7538 = vmatpush3.bf16.msra.mxu1 %v8978_v49  ;;  %7550 = vmatpush3.bf16.msra.mxu0 %v8980_v55 }
 0x20f   :  { %7539 = vmatprep.subr.bf16.mxu1 %v8426_v16  ;;  %7551 = vmatprep.subr.bf16.mxu0 %v8426_v16 }
 0x211   :  { %6752 = vmatmul.mubr.msk.f32.vlgmr.msra.gmra.mrb[16].mxu1 %vm678_vm2, %v8967_v44  ;;  %6774 = vmatmul.mubr.f32.vlgmr.msra.gmra.mrb[16].mxu0 %v9711_v32 }
 0x212   :  { %7541 = vmatpush3.bf16.msra.mxu1 %v8990_v4  ;;  %7553 = vmatpush3.bf16.msra.mxu0 %v8992_v6 }
 0x213   :  { %7542 = vmatprep.subr.bf16.mxu1 %v8426_v16  ;;  %7554 = vmatprep.subr.bf16.mxu0 %v8426_v16 }
 0x214   :  { %6762 = vmatprep.mubr.msk.f32.mxu1 %vm8427_vm1, %v9711_v32  ;;  %6784 = vmatprep.mubr.msk.f32.mxu0 %vm8427_vm1, %v9711_v32 }
 0x216   :  { %7544 = vmatpush3.bf16.msra.mxu1 %v9001_v20  ;;  %7556 = vmatpush3.bf16.msra.mxu0 %v9003_v57 }
 0x217   :  { %7557 = vmatprep.subr.bf16.mxu1 %v8426_v16  ;;  %7563 = vmatprep.subr.bf16.mxu0 %v8426_v16 }
 0x219   :  { %6763 = vmatmul.mubr.f32.vlgmr.msra.gmra.mrb[14].mxu1 %v9711_v32  ;;  %6785 = vmatmul.mubr.f32.vlgmr.msra.gmra.mrb[18].mxu0 %v9711_v32 }
 0x21a   :  { %7559 = vmatpush3.bf16.msra.mxu1 %v8786_v15  ;;  %7565 = vmatpush3.bf16.msra.mxu0 %v8857_v33 }
 0x21b   :  { %7560 = vmatprep.subr.bf16.mxu1 %v8426_v16  ;;  %7566 = vmatprep.subr.bf16.mxu0 %v8426_v16 }
 0x21c   :  { %6795 = vmatprep.mubr.msk.f32.mxu1 %vm8427_vm1, %v9711_v32  ;;  %6806 = vmatprep.mubr.msk.f32.mxu0 %vm8427_vm1, %v9711_v32 }
 0x21e   :  { %7562 = vmatpush3.bf16.msra.mxu1 %v8809_v22  ;;  %7568 = vmatpush3.bf16.msra.mxu0 %v8871_v36 }
 0x21f   :  { %7569 = vmatprep.subr.bf16.mxu1 %v8426_v16  ;;  %7575 = vmatprep.subr.bf16.mxu0 %v8426_v16 }
 0x221   :  { %6796 = vmatmul.mubr.msk.f32.vlgmr.msra.gmra.mrb[18].mxu1 %vm678_vm2, %v8967_v44  ;;  %6807 = vmatmul.mubr.msk.f32.vlgmr.msra.gmra.mrb[20].mxu0 %vm678_vm2, %v8967_v44 }
 0x222   :  { %7571 = vmatpush3.bf16.msra.mxu1 %v8827_v26  ;;  %6817 = vmatprep.mubr.msk.f32.mxu1 %vm8427_vm1, %v9711_v32 }
 0x223   :  { %7572 = vmatprep.subr.bf16.mxu1 %v8426_v16  ;;  %7577 = vmatpush3.bf16.msra.mxu0 %v8890_v40 }
 0x224   :  { %7578 = vmatprep.subr.bf16.mxu0 %v8426_v16  ;;  %6828 = vmatprep.mubr.msk.f32.mxu0 %vm8427_vm1, %v9711_v32 }
 0x226   :  { %7574 = vmatpush3.bf16.msra.mxu1 %v8850_v31 }
 0x227   :  { %7581 = vmatprep.subr.bf16.mxu1 %v8426_v16  ;;  %7580 = vmatpush3.bf16.msra.mxu0 %v8898_v46 }
 0x228   :  { %7587 = vmatprep.subr.bf16.mxu0 %v8426_v16 }
 0x229   :  { %6818 = vmatmul.mubr.msk.f32.vlgmr.msra.gmra.mrb[20].mxu1 %vm678_vm2, %v8967_v44 }
 0x22a   :  { %7583 = vmatpush3.bf16.msra.mxu1 %v8892_v42  ;;  %6839 = vmatprep.mubr.msk.f32.mxu1 %vm8427_vm1, %v9711_v32 }
 0x22b   :  { %7584 = vmatprep.subr.bf16.mxu1 %v8426_v16 }
 0x22e   :  { %7586 = vmatpush3.bf16.msra.mxu1 %v8900_v48 }
 0x22f   :  { %7599 = vmatprep.subr.bf16.mxu1 %v8426_v16 }
 0x2e4   :  { %v1118_v61 = vpop.f32.mrb[16].mxu1  ;;  %v1258_v23 = vpop.f32.mrb[16].mxu0 }
 0x2e5   :  { %v6753_v25 = vpop.f32.mrb[17].mxu1  ;;  %v6775_v29 = vpop.f32.mrb[17].mxu0  ;;  %v7944_v53 = vadd.f32 %v9061_v37, %v1258_v23 }
 0x2e6   :  { %v9070_v29 = vld [vmem:[%s9698_s20] ss:$0 sm:$0xff] }
 0x2e7   :  { %v1338_v58 = vmul.f32 0.5, %v7944_v53 }
 0x2ec   :  { %v1188_v34 = vpop.f32.mrb[14].mxu1  ;;  %v1328_v35 = vpop.f32.mrb[18].mxu0 }
 0x2ed   :  { %v7943_v9 = vadd.f32 %v9056_v30, %v1188_v34  ;;  %v6764_v43 = vpop.f32.mrb[15].mxu1  ;;  %v6786_v47 = vpop.f32.mrb[19].mxu0 }
 0x2ee   :  { %v1329_v43 = vadd.f32 %v9070_v29, %v1328_v35 }
 0x2ef   :  { %v1333_v51 = vmul.f32 0.5, %v7943_v9 }
 0x2f1   :  { %8015 = vtanh.f32 %v1333_v51 }
 0x2f2   :  { %8017 = vtanh.f32 %v1338_v58 }
 0x2f4   :  { %v1415_v59 = vpop.f32.mrb[18].mxu1  ;;  %v1485_v63 = vpop.f32.mrb[20].mxu0 }
 0x2f5   :  { %v1559_v2 = vadd.f32 %v1415_v59, %v8911_v54  ;;  %v1564_v10 = vadd.f32 %v1485_v63, %v8915_v60  ;;  %v6797_v11 = vpop.f32.mrb[19].mxu1  ;;  %v6808_v13 = vpop.f32.mrb[21].mxu0  ;;  %v9075_v54 = vld [vmem:[%s9697_s19] ss:$0 sm:$0xff] }
 0x2f6   :  { %v1119_v51 = vadd.f32 %v9075_v54, %v1118_v61 }
 0x2f7   :  { %v1560_v19 = vmul.f32 0.5, %v1559_v2  ;;  %v1565_v34 = vmul.f32 0.5, %v1564_v10 }
 0x2f9   :  { %8019 = vtanh.f32 %v1560_v19 }
 0x2fa   :  { %8021 = vtanh.f32 %v1565_v34 }
 0x2fb   :  { %v8016_v25 = vpop.eup %8015 }
 0x2fc   :  { %v1335_v23 = vmul.f32 0.5, %v8016_v25  ;;  %v1555_v9 = vpop.f32.mrb[20].mxu1  ;;  %v8018_v58 = vpop.eup %8017 }
 0x2fd   :  { %v6819_v60 = vpop.f32.mrb[21].mxu1  ;;  %v1340_v10 = vmul.f32 0.5, %v8018_v58  ;;  %v1556_v11 = vadd.f32 %v8951_v1, %v1555_v9 }
 0x2fe   :  { %v1336_v47 = vadd.f32 0.5, %v1335_v23 }
 0x2ff   :  { %v1341_v25 = vadd.f32 0.5, %v1340_v10 }
 0x300   :  { %v1342_v53 = vmul.f32 %v1336_v47, %v1329_v43 }
 0x301   :  { %v1345_v35 = vsub.f32 1.0, %v1341_v25  ;;  %v1347_v43 = vmul.f32 0.0, %v1341_v25 }
 0x302   :  { %v1343_v59 = vadd.f32 %v1342_v53, %v1119_v51 }
 0x303   :  { %v8020_v63 = vpop.eup %8019 }
 0x304   :  { %8023 = vtanh.f32 %v1343_v59  ;;  %v1562_v2 = vmul.f32 0.5, %v8020_v63  ;;  %v8022_v32 = vpop.eup %8021 }
 0x305   :  { %v1567_v23 = vmul.f32 0.5, %v8022_v32  ;;  %v9730_v32 = vmov 0.0  }
 0x306   :  { %v1563_v13 = vadd.f32 0.5, %v1562_v2 }
 0x307   :  { %v1568_v47 = vadd.f32 0.5, %v1567_v23 }
 0x308   :  { %v1569_v19 = vmul.f32 %v1563_v13, %v1556_v11 }
 0x309   :  { %v1572_v53 = vsub.f32 1.0, %v1568_v47  ;;  %v1574_v58 = vmul.f32 %v1568_v47, %v8967_v44 }
 0x30a   :  { %v1570_v60 = vadd.f32 %v1569_v19, %v8931_v14 }
 0x30c   :  { %8025 = vtanh.f32 %v1570_v60 }
 0x30e   :  { %v8024_v61 = vpop.eup %8023 }
 0x30f   :  { %v1346_v34 = vmul.f32 %v8024_v61, %v1345_v35 }
 0x311   :  { %v9081_v51 = vadd.f32 %v1347_v43, %v1346_v34 }
 0x316   :  { %v8026_v59 = vpop.eup %8025 }
 0x317   :  { %v1573_v9 = vmul.f32 %v8026_v59, %v1572_v53 }
 0x319   :  { %v9084_v63 = vadd.f32 %v1574_v58, %v1573_v9 }
 0x31b   :  { %6829 = vmatmul.mubr.msk.f32.vlgmr.msra.gmra.mrb[22].mxu0 %vm678_vm2, %v9084_v63  ;;  %6840 = vmatmul.mubr.msk.f32.vlgmr.msra.gmra.mrb[22].mxu1 %vm678_vm2, %v9084_v63 }
 0x31c   :  { %7589 = vmatpush3.bf16.msra.mxu0 %v8960_v17  ;;  %7601 = vmatpush3.bf16.msra.mxu1 %v8962_v39 }
 0x31d   :  { %7590 = vmatprep.subr.bf16.mxu0 %v8426_v16  ;;  %7602 = vmatprep.subr.bf16.mxu1 %v8426_v16 }
 0x31e   :  { %6850 = vmatprep.mubr.msk.f32.mxu0 %vm8427_vm1, %v9730_v32  ;;  %6872 = vmatprep.mubr.msk.f32.mxu1 %vm8427_vm1, %v9730_v32 }
 0x320   :  { %7592 = vmatpush3.bf16.msra.mxu0 %v8978_v49  ;;  %7604 = vmatpush3.bf16.msra.mxu1 %v8980_v55 }
 0x321   :  { %7593 = vmatprep.subr.bf16.mxu0 %v8426_v16  ;;  %7605 = vmatprep.subr.bf16.mxu1 %v8426_v16 }
 0x323   :  { %6851 = vmatmul.mubr.msk.f32.vlgmr.msra.gmra.mrb[24].mxu0 %vm678_vm2, %v9084_v63  ;;  %6873 = vmatmul.mubr.msk.f32.vlgmr.msra.gmra.mrb[22].mxu1 %vm678_vm2, %v9081_v51 }
 0x324   :  { %7595 = vmatpush3.bf16.msra.mxu0 %v8990_v4  ;;  %7607 = vmatpush3.bf16.msra.mxu1 %v8992_v6 }
 0x325   :  { %7596 = vmatprep.subr.bf16.mxu0 %v8426_v16  ;;  %7608 = vmatprep.subr.bf16.mxu1 %v8426_v16 }
 0x326   :  { %6861 = vmatprep.mubr.msk.f32.mxu0 %vm8427_vm1, %v9730_v32  ;;  %6883 = vmatprep.mubr.msk.f32.mxu1 %vm8427_vm1, %v9730_v32 }
 0x328   :  { %7598 = vmatpush3.bf16.msra.mxu0 %v9001_v20  ;;  %7610 = vmatpush3.bf16.msra.mxu1 %v9003_v57 }
 0x329   :  { %7611 = vmatprep.subr.bf16.mxu0 %v8426_v16  ;;  %7617 = vmatprep.subr.bf16.mxu1 %v8426_v16 }
 0x32b   :  { %6862 = vmatmul.mubr.msk.f32.vlgmr.msra.gmra.mrb[22].mxu0 %vm678_vm2, %v9081_v51  ;;  %6884 = vmatmul.mubr.msk.f32.vlgmr.msra.gmra.mrb[24].mxu1 %vm678_vm2, %v9081_v51 }
 0x32c   :  { %7613 = vmatpush3.bf16.msra.mxu0 %v8786_v15  ;;  %7619 = vmatpush3.bf16.msra.mxu1 %v8857_v33 }
 0x32d   :  { %7614 = vmatprep.subr.bf16.mxu0 %v8426_v16  ;;  %7620 = vmatprep.subr.bf16.mxu1 %v8426_v16 }
 0x32e   :  { %6894 = vmatprep.mubr.msk.f32.mxu0 %vm8427_vm1, %v9730_v32  ;;  %6905 = vmatprep.mubr.msk.f32.mxu1 %vm8427_vm1, %v9730_v32 }
 0x330   :  { %7616 = vmatpush3.bf16.msra.mxu0 %v8809_v22  ;;  %7622 = vmatpush3.bf16.msra.mxu1 %v8871_v36 }
 0x331   :  { %7623 = vmatprep.subr.bf16.mxu0 %v8426_v16  ;;  %7629 = vmatprep.subr.bf16.mxu1 %v8426_v16 }
 0x333   :  { %6895 = vmatmul.mubr.msk.f32.vlgmr.msra.gmra.mrb[26].mxu0 %vm678_vm2, %v9084_v63  ;;  %6906 = vmatmul.mubr.msk.f32.vlgmr.msra.gmra.mrb[26].mxu1 %vm678_vm2, %v9084_v63 }
 0x334   :  { %7625 = vmatpush3.bf16.msra.mxu0 %v8827_v26  ;;  %6916 = vmatprep.mubr.msk.f32.mxu0 %vm8427_vm1, %v9730_v32 }
 0x335   :  { %7626 = vmatprep.subr.bf16.mxu0 %v8426_v16  ;;  %7631 = vmatpush3.bf16.msra.mxu1 %v8890_v40 }
 0x336   :  { %7632 = vmatprep.subr.bf16.mxu1 %v8426_v16  ;;  %6927 = vmatprep.mubr.msk.f32.mxu1 %vm8427_vm1, %v9730_v32 }
 0x338   :  { %7628 = vmatpush3.bf16.msra.mxu0 %v8850_v31 }
 0x339   :  { %7635 = vmatprep.subr.bf16.mxu0 %v8426_v16  ;;  %7634 = vmatpush3.bf16.msra.mxu1 %v8898_v46 }
 0x33a   :  { %7641 = vmatprep.subr.bf16.mxu1 %v8426_v16 }
 0x33b   :  { %6917 = vmatmul.mubr.msk.f32.vlgmr.msra.gmra.mrb[28].mxu0 %vm678_vm2, %v9084_v63 }
 0x33c   :  { %7637 = vmatpush3.bf16.msra.mxu0 %v8892_v42  ;;  %6938 = vmatprep.mubr.msk.f32.mxu0 %vm8427_vm1, %v9730_v32 }
 0x33d   :  { %7638 = vmatprep.subr.bf16.mxu0 %v8426_v16 }
 0x340   :  { %7640 = vmatpush3.bf16.msra.mxu0 %v8900_v48 }
 0x341   :  { %7653 = vmatprep.subr.bf16.mxu0 %v8426_v16 }
 0x3f6   :  { %v1785_v14 = vpop.f32.mrb[24].mxu0  ;;  %v1928_v44 = vpop.f32.mrb[22].mxu1 }
 0x3f7   :  { %v6852_v2 = vpop.f32.mrb[25].mxu0  ;;  %v6874_v10 = vpop.f32.mrb[23].mxu1  ;;  %v7946_v23 = vadd.f32 %v9061_v37, %v1928_v44 }
 0x3f9   :  { %v2008_v61 = vmul.f32 0.5, %v7946_v23 }
 0x3fe   :  { %v1858_v11 = vpop.f32.mrb[22].mxu0  ;;  %v1998_v13 = vpop.f32.mrb[24].mxu1 }
 0x3ff   :  { %v7945_v19 = vadd.f32 %v9056_v30, %v1858_v11  ;;  %v6863_v25 = vpop.f32.mrb[23].mxu0  ;;  %v6885_v60 = vpop.f32.mrb[25].mxu1  ;;  %v1999_v44 = vadd.f32 %v9070_v29, %v1998_v13 }
 0x401   :  { %v2003_v35 = vmul.f32 0.5, %v7945_v19 }
 0x403   :  { %8027 = vtanh.f32 %v2003_v35  ;;  %v1786_v35 = vadd.f32 %v9075_v54, %v1785_v14 }
 0x404   :  { %8029 = vtanh.f32 %v2008_v61 }
 0x406   :  { %v2085_v43 = vpop.f32.mrb[26].mxu0  ;;  %v2155_v34 = vpop.f32.mrb[26].mxu1 }
 0x407   :  { %v2229_v47 = vadd.f32 %v2085_v43, %v8919_v0  ;;  %v2234_v53 = vadd.f32 %v2155_v34, %v8925_v7  ;;  %v6896_v59 = vpop.f32.mrb[27].mxu0  ;;  %v6907_v58 = vpop.f32.mrb[27].mxu1 }
 0x409   :  { %v2230_v9 = vmul.f32 0.5, %v2229_v47  ;;  %v2235_v11 = vmul.f32 0.5, %v2234_v53 }
 0x40b   :  { %8031 = vtanh.f32 %v2230_v9 }
 0x40c   :  { %8033 = vtanh.f32 %v2235_v11 }
 0x40d   :  { %v8028_v2 = vpop.eup %8027 }
 0x40e   :  { %v2005_v10 = vmul.f32 0.5, %v8028_v2  ;;  %v2225_v25 = vpop.f32.mrb[28].mxu0  ;;  %v8030_v0 = vpop.eup %8029 }
 0x40f   :  { %v6918_v19 = vpop.f32.mrb[29].mxu0  ;;  %v2010_v47 = vmul.f32 0.5, %v8030_v0  ;;  %v2226_v61 = vadd.f32 %v8951_v1, %v2225_v25 }
 0x410   :  { %v2006_v60 = vadd.f32 0.5, %v2005_v10 }
 0x411   :  { %v2011_v53 = vadd.f32 0.5, %v2010_v47 }
 0x412   :  { %v2012_v23 = vmul.f32 %v2006_v60, %v1999_v44 }
 0x413   :  { %v2015_v13 = vsub.f32 1.0, %v2011_v53  ;;  %v2017_v11 = vmul.f32 %v2011_v53, %v9081_v51 }
 0x414   :  { %v2013_v43 = vadd.f32 %v2012_v23, %v1786_v35 }
 0x415   :  { %v8032_v7 = vpop.eup %8031 }
 0x416   :  { %8035 = vtanh.f32 %v2013_v43  ;;  %v2232_v34 = vmul.f32 0.5, %v8032_v7  ;;  %v8034_v9 = vpop.eup %8033 }
 0x417   :  { %v2237_v10 = vmul.f32 0.5, %v8034_v9 }
 0x418   :  { %v2233_v59 = vadd.f32 0.5, %v2232_v34 }
 0x419   :  { %v2238_v44 = vadd.f32 0.5, %v2237_v10 }
 0x41a   :  { %v2239_v58 = vmul.f32 %v2233_v59, %v2226_v61 }
 0x41b   :  { %v2242_v35 = vsub.f32 1.0, %v2238_v44  ;;  %v2244_v25 = vmul.f32 %v2238_v44, %v9084_v63 }
 0x41c   :  { %v2240_v2 = vadd.f32 %v2239_v58, %v8941_v28 }
 0x41e   :  { %8037 = vtanh.f32 %v2240_v2 }
 0x420   :  { %v8036_v14 = vpop.eup %8035 }
 0x421   :  { %v2016_v19 = vmul.f32 %v8036_v14, %v2015_v13 }
 0x423   :  { %v9167_v60 = vadd.f32 %v2017_v11, %v2016_v19 }
 0x428   :  { %v8038_v23 = vpop.eup %8037 }
 0x429   :  { %v2243_v0 = vmul.f32 %v8038_v23, %v2242_v35 }
 0x42b   :  { %v9170_v43 = vadd.f32 %v2244_v25, %v2243_v0 }
 0x42d   :  { %6928 = vmatmul.mubr.msk.f32.vlgmr.msra.gmra.mrb[28].mxu1 %vm678_vm2, %v9170_v43  ;;  %6939 = vmatmul.mubr.msk.f32.vlgmr.msra.gmra.mrb[30].mxu0 %vm678_vm2, %v9170_v43 }
 0x42e   :  { %7643 = vmatpush3.bf16.msra.mxu1 %v8960_v17  ;;  %7655 = vmatpush3.bf16.msra.mxu0 %v8962_v39 }
 0x42f   :  { %7644 = vmatprep.subr.bf16.mxu1 %v8426_v16  ;;  %7656 = vmatprep.subr.bf16.mxu0 %v8426_v16 }
 0x430   :  { %6949 = vmatprep.mubr.msk.f32.mxu1 %vm8427_vm1, %v9730_v32  ;;  %6971 = vmatprep.mubr.msk.f32.mxu0 %vm8427_vm1, %v9730_v32 }
 0x432   :  { %7646 = vmatpush3.bf16.msra.mxu1 %v8978_v49  ;;  %7658 = vmatpush3.bf16.msra.mxu0 %v8980_v55 }
 0x433   :  { %7647 = vmatprep.subr.bf16.mxu1 %v8426_v16  ;;  %7659 = vmatprep.subr.bf16.mxu0 %v8426_v16 }
 0x435   :  { %6950 = vmatmul.mubr.msk.f32.vlgmr.msra.gmra.mrb[30].mxu1 %vm678_vm2, %v9170_v43  ;;  %6972 = vmatmul.mubr.msk.f32.vlgmr.msra.gmra.mrb[30].mxu0 %vm678_vm2, %v9167_v60 }
 0x436   :  { %7649 = vmatpush3.bf16.msra.mxu1 %v8990_v4  ;;  %7661 = vmatpush3.bf16.msra.mxu0 %v8992_v6 }
 0x437   :  { %7650 = vmatprep.subr.bf16.mxu1 %v8426_v16  ;;  %7662 = vmatprep.subr.bf16.mxu0 %v8426_v16 }
 0x438   :  { %6960 = vmatprep.mubr.msk.f32.mxu1 %vm8427_vm1, %v9730_v32  ;;  %6982 = vmatprep.mubr.msk.f32.mxu0 %vm8427_vm1, %v9730_v32 }
 0x43a   :  { %7652 = vmatpush3.bf16.msra.mxu1 %v9001_v20  ;;  %7664 = vmatpush3.bf16.msra.mxu0 %v9003_v57 }
 0x43b   :  { %7665 = vmatprep.subr.bf16.mxu1 %v8426_v16  ;;  %7671 = vmatprep.subr.bf16.mxu0 %v8426_v16 }
 0x43d   :  { %6961 = vmatmul.mubr.msk.f32.vlgmr.msra.gmra.mrb[28].mxu1 %vm678_vm2, %v9167_v60  ;;  %6983 = vmatmul.mubr.msk.f32.vlgmr.msra.gmra.mrb[32].mxu0 %vm678_vm2, %v9167_v60 }
 0x43e   :  { %7667 = vmatpush3.bf16.msra.mxu1 %v8786_v15  ;;  %7673 = vmatpush3.bf16.msra.mxu0 %v8857_v33 }
 0x43f   :  { %7668 = vmatprep.subr.bf16.mxu1 %v8426_v16  ;;  %7674 = vmatprep.subr.bf16.mxu0 %v8426_v16 }
 0x440   :  { %6993 = vmatprep.mubr.msk.f32.mxu1 %vm8427_vm1, %v9730_v32  ;;  %7004 = vmatprep.mubr.msk.f32.mxu0 %vm8427_vm1, %v9730_v32 }
 0x442   :  { %7670 = vmatpush3.bf16.msra.mxu1 %v8809_v22  ;;  %7676 = vmatpush3.bf16.msra.mxu0 %v8871_v36 }
 0x443   :  { %7677 = vmatprep.subr.bf16.mxu1 %v8426_v16  ;;  %7683 = vmatprep.subr.bf16.mxu0 %v8426_v16 }
 0x445   :  { %6994 = vmatmul.mubr.msk.f32.vlgmr.msra.gmra.mrb[32].mxu1 %vm678_vm2, %v9170_v43  ;;  %7005 = vmatmul.mubr.msk.f32.vlgmr.msra.gmra.mrb[34].mxu0 %vm678_vm2, %v9170_v43 }
 0x446   :  { %7679 = vmatpush3.bf16.msra.mxu1 %v8827_v26  ;;  %7015 = vmatprep.mubr.msk.f32.mxu1 %vm8427_vm1, %v9730_v32 }
 0x447   :  { %7680 = vmatprep.subr.bf16.mxu1 %v8426_v16  ;;  %7685 = vmatpush3.bf16.msra.mxu0 %v8890_v40 }
 0x448   :  { %7686 = vmatprep.subr.bf16.mxu0 %v8426_v16  ;;  %7026 = vmatprep.mubr.msk.f32.mxu0 %vm8427_vm1, %v9730_v32 }
 0x44a   :  { %7682 = vmatpush3.bf16.msra.mxu1 %v8850_v31 }
 0x44b   :  { %7689 = vmatprep.subr.bf16.mxu1 %v8426_v16  ;;  %7688 = vmatpush3.bf16.msra.mxu0 %v8898_v46 }
 0x44c   :  { %7695 = vmatprep.subr.bf16.mxu0 %v8426_v16 }
 0x44d   :  { %7016 = vmatmul.mubr.msk.f32.vlgmr.msra.gmra.mrb[34].mxu1 %vm678_vm2, %v9170_v43 }
 0x44e   :  { %7691 = vmatpush3.bf16.msra.mxu1 %v8892_v42  ;;  %7037 = vmatprep.mubr.msk.f32.mxu1 %vm8427_vm1, %v9730_v32 }
 0x44f   :  { %7692 = vmatprep.subr.bf16.mxu1 %v8426_v16 }
 0x452   :  { %7694 = vmatpush3.bf16.msra.mxu1 %v8900_v48 }
 0x453   :  { %7707 = vmatprep.subr.bf16.mxu1 %v8426_v16 }
 0x508   :  { %v2455_v28 = vpop.f32.mrb[30].mxu1  ;;  %v2598_v51 = vpop.f32.mrb[30].mxu0 }
 0x509   :  { %v6951_v63 = vpop.f32.mrb[31].mxu1  ;;  %v6973_v7 = vpop.f32.mrb[31].mxu0  ;;  %v7948_v9 = vadd.f32 %v9061_v37, %v2598_v51 }
 0x50b   :  { %v2678_v2 = vmul.f32 0.5, %v7948_v9 }
 0x510   :  { %v2528_v34 = vpop.f32.mrb[28].mxu1  ;;  %v2668_v47 = vpop.f32.mrb[32].mxu0 }
 0x511   :  { %v7947_v61 = vadd.f32 %v9056_v30, %v2528_v34  ;;  %v6962_v59 = vpop.f32.mrb[29].mxu1  ;;  %v6984_v58 = vpop.f32.mrb[33].mxu0  ;;  %v2669_v51 = vadd.f32 %v9070_v29, %v2668_v47 }
 0x513   :  { %v2673_v53 = vmul.f32 0.5, %v7947_v61  ;;  %v2456_v61 = vadd.f32 %v9075_v54, %v2455_v28 }
 0x515   :  { %8039 = vtanh.f32 %v2673_v53 }
 0x516   :  { %8041 = vtanh.f32 %v2678_v2 }
 0x518   :  { %v2755_v13 = vpop.f32.mrb[32].mxu1  ;;  %v2825_v10 = vpop.f32.mrb[34].mxu0 }
 0x519   :  { %v2899_v14 = vadd.f32 %v2755_v13, %v8917_v62  ;;  %v2904_v11 = vadd.f32 %v2825_v10, %v8921_v3  ;;  %v6995_v19 = vpop.f32.mrb[33].mxu1  ;;  %v7006_v44 = vpop.f32.mrb[35].mxu0 }
 0x51b   :  { %v2900_v35 = vmul.f32 0.5, %v2899_v14  ;;  %v2905_v0 = vmul.f32 0.5, %v2904_v11 }
 0x51d   :  { %8043 = vtanh.f32 %v2900_v35 }
 0x51e   :  { %8045 = vtanh.f32 %v2905_v0 }
 0x51f   :  { %v8040_v23 = vpop.eup %8039 }
 0x520   :  { %v2675_v25 = vmul.f32 0.5, %v8040_v23  ;;  %v2895_v63 = vpop.f32.mrb[34].mxu1  ;;  %v8042_v62 = vpop.eup %8041 }
 0x521   :  { %v7017_v7 = vpop.f32.mrb[35].mxu1  ;;  %v2680_v9 = vmul.f32 0.5, %v8042_v62  ;;  %v2896_v2 = vadd.f32 %v8951_v1, %v2895_v63 }
 0x522   :  { %v2676_v34 = vadd.f32 0.5, %v2675_v25 }
 0x523   :  { %v2681_v14 = vadd.f32 0.5, %v2680_v9 }
 0x524   :  { %v2682_v59 = vmul.f32 %v2676_v34, %v2669_v51 }
 0x525   :  { %v2685_v47 = vsub.f32 1.0, %v2681_v14  ;;  %v2687_v35 = vmul.f32 %v2681_v14, %v9167_v60 }
 0x526   :  { %v2683_v58 = vadd.f32 %v2682_v59, %v2456_v61 }
 0x527   :  { %v8044_v3 = vpop.eup %8043 }
 0x528   :  { %8047 = vtanh.f32 %v2683_v58  ;;  %v2902_v53 = vmul.f32 0.5, %v8044_v3  ;;  %v8046_v11 = vpop.eup %8045 }
 0x529   :  { %v2907_v44 = vmul.f32 0.5, %v8046_v11 }
 0x52a   :  { %v2903_v13 = vadd.f32 0.5, %v2902_v53 }
 0x52b   :  { %v2908_v25 = vadd.f32 0.5, %v2907_v44 }
 0x52c   :  { %v2909_v10 = vmul.f32 %v2903_v13, %v2896_v2 }
 0x52d   :  { %v2912_v7 = vsub.f32 1.0, %v2908_v25  ;;  %v2914_v63 = vmul.f32 %v2908_v25, %v9170_v43 }
 0x52e   :  { %v2910_v19 = vadd.f32 %v2909_v10, %v8937_v24 }
 0x530   :  { %8049 = vtanh.f32 %v2910_v19 }
 0x532   :  { %v8048_v28 = vpop.eup %8047 }
 0x533   :  { %v2686_v23 = vmul.f32 %v8048_v28, %v2685_v47 }
 0x535   :  { %v9253_v0 = vadd.f32 %v2687_v35, %v2686_v23 }
 0x53a   :  { %v8050_v51 = vpop.eup %8049 }
 0x53b   :  { %v2913_v34 = vmul.f32 %v8050_v51, %v2912_v7 }
 0x53d   :  { %v9256_v61 = vadd.f32 %v2914_v63, %v2913_v34 }
 0x53f   :  { %7027 = vmatmul.mubr.msk.f32.vlgmr.msra.gmra.mrb[36].mxu0 %vm678_vm2, %v9256_v61  ;;  %7038 = vmatmul.mubr.msk.f32.vlgmr.msra.gmra.mrb[36].mxu1 %vm678_vm2, %v9256_v61 }
 0x540   :  { %7697 = vmatpush3.bf16.msra.mxu0 %v8960_v17  ;;  %7709 = vmatpush3.bf16.msra.mxu1 %v8962_v39 }
 0x541   :  { %7698 = vmatprep.subr.bf16.mxu0 %v8426_v16  ;;  %7710 = vmatprep.subr.bf16.mxu1 %v8426_v16 }
 0x542   :  { %7048 = vmatprep.mubr.msk.f32.mxu0 %vm8427_vm1, %v9730_v32  ;;  %7070 = vmatprep.mubr.msk.f32.mxu1 %vm8427_vm1, %v9730_v32 }
 0x544   :  { %7700 = vmatpush3.bf16.msra.mxu0 %v8978_v49  ;;  %7712 = vmatpush3.bf16.msra.mxu1 %v8980_v55 }
 0x545   :  { %7701 = vmatprep.subr.bf16.mxu0 %v8426_v16  ;;  %7713 = vmatprep.subr.bf16.mxu1 %v8426_v16 }
 0x547   :  { %7049 = vmatmul.mubr.msk.f32.vlgmr.msra.gmra.mrb[38].mxu0 %vm678_vm2, %v9256_v61  ;;  %7071 = vmatmul.mubr.msk.f32.vlgmr.msra.gmra.mrb[36].mxu1 %vm678_vm2, %v9253_v0 }
 0x548   :  { %7703 = vmatpush3.bf16.msra.mxu0 %v8990_v4  ;;  %7715 = vmatpush3.bf16.msra.mxu1 %v8992_v6 }
 0x549   :  { %7704 = vmatprep.subr.bf16.mxu0 %v8426_v16  ;;  %7716 = vmatprep.subr.bf16.mxu1 %v8426_v16 }
 0x54a   :  { %7059 = vmatprep.mubr.msk.f32.mxu0 %vm8427_vm1, %v9730_v32  ;;  %7081 = vmatprep.mubr.msk.f32.mxu1 %vm8427_vm1, %v9730_v32 }
 0x54c   :  { %7706 = vmatpush3.bf16.msra.mxu0 %v9001_v20  ;;  %7718 = vmatpush3.bf16.msra.mxu1 %v9003_v57 }
 0x54d   :  { %7719 = vmatprep.subr.bf16.mxu0 %v8426_v16  ;;  %7725 = vmatprep.subr.bf16.mxu1 %v8426_v16 }
 0x54f   :  { %7060 = vmatmul.mubr.msk.f32.vlgmr.msra.gmra.mrb[36].mxu0 %vm678_vm2, %v9253_v0  ;;  %7082 = vmatmul.mubr.msk.f32.vlgmr.msra.gmra.mrb[38].mxu1 %vm678_vm2, %v9253_v0 }
 0x550   :  { %7721 = vmatpush3.bf16.msra.mxu0 %v8786_v15  ;;  %7727 = vmatpush3.bf16.msra.mxu1 %v8857_v33 }
 0x551   :  { %7722 = vmatprep.subr.bf16.mxu0 %v8426_v16  ;;  %7728 = vmatprep.subr.bf16.mxu1 %v8426_v16 }
 0x552   :  { %7092 = vmatprep.mubr.msk.f32.mxu0 %vm8427_vm1, %v9730_v32  ;;  %7103 = vmatprep.mubr.msk.f32.mxu1 %vm8427_vm1, %v9730_v32 }
 0x554   :  { %7724 = vmatpush3.bf16.msra.mxu0 %v8809_v22  ;;  %7730 = vmatpush3.bf16.msra.mxu1 %v8871_v36 }
 0x555   :  { %7731 = vmatprep.subr.bf16.mxu0 %v8426_v16  ;;  %7737 = vmatprep.subr.bf16.mxu1 %v8426_v16 }
 0x557   :  { %7093 = vmatmul.mubr.msk.f32.vlgmr.msra.gmra.mrb[40].mxu0 %vm678_vm2, %v9256_v61  ;;  %7104 = vmatmul.mubr.msk.f32.vlgmr.msra.gmra.mrb[40].mxu1 %vm678_vm2, %v9256_v61 }
 0x558   :  { %7733 = vmatpush3.bf16.msra.mxu0 %v8827_v26  ;;  %7114 = vmatprep.mubr.msk.f32.mxu0 %vm8427_vm1, %v9730_v32 }
 0x559   :  { %7734 = vmatprep.subr.bf16.mxu0 %v8426_v16  ;;  %7739 = vmatpush3.bf16.msra.mxu1 %v8890_v40 }
 0x55a   :  { %7740 = vmatprep.subr.bf16.mxu1 %v8426_v16  ;;  %7125 = vmatprep.mubr.msk.f32.mxu1 %vm8427_vm1, %v9730_v32 }
 0x55c   :  { %7736 = vmatpush3.bf16.msra.mxu0 %v8850_v31 }
 0x55d   :  { %7743 = vmatprep.subr.bf16.mxu0 %v8426_v16  ;;  %7742 = vmatpush3.bf16.msra.mxu1 %v8898_v46 }
 0x55e   :  { %7749 = vmatprep.subr.bf16.mxu1 %v8426_v16 }
 0x55f   :  { %7115 = vmatmul.mubr.msk.f32.vlgmr.msra.gmra.mrb[42].mxu0 %vm678_vm2, %v9256_v61 }
 0x560   :  { %7745 = vmatpush3.bf16.msra.mxu0 %v8892_v42  ;;  %7136 = vmatprep.mubr.msk.f32.mxu0 %vm8427_vm1, %v9730_v32 }
 0x561   :  { %7746 = vmatprep.subr.bf16.mxu0 %v8426_v16 }
 0x564   :  { %7748 = vmatpush3.bf16.msra.mxu0 %v8900_v48 }
 0x565   :  { %7761 = vmatprep.subr.bf16.mxu0 %v8426_v16 }
 0x61a   :  { %v3125_v24 = vpop.f32.mrb[38].mxu0  ;;  %v3268_v60 = vpop.f32.mrb[36].mxu1 }
 0x61b   :  { %v7050_v43 = vpop.f32.mrb[39].mxu0  ;;  %v7072_v59 = vpop.f32.mrb[37].mxu1  ;;  %v7950_v13 = vadd.f32 %v9061_v37, %v3268_v60 }
 0x61c   :  { %v3126_v43 = vadd.f32 %v9075_v54, %v3125_v24 }
 0x61d   :  { %v3348_v10 = vmul.f32 0.5, %v7950_v13 }
 0x622   :  { %v3198_v62 = vpop.f32.mrb[36].mxu0  ;;  %v3338_v58 = vpop.f32.mrb[38].mxu1 }
 0x623   :  { %v7949_v3 = vadd.f32 %v9056_v30, %v3198_v62  ;;  %v7061_v53 = vpop.f32.mrb[37].mxu0  ;;  %v7083_v9 = vpop.f32.mrb[39].mxu1  ;;  %v3339_v34 = vadd.f32 %v9070_v29, %v3338_v58 }
 0x625   :  { %v3343_v2 = vmul.f32 0.5, %v7949_v3 }
 0x627   :  { %8051 = vtanh.f32 %v3343_v2 }
 0x628   :  { %8053 = vtanh.f32 %v3348_v10 }
 0x62a   :  { %v3425_v14 = vpop.f32.mrb[40].mxu0  ;;  %v3495_v11 = vpop.f32.mrb[40].mxu1 }
 0x62b   :  { %v3569_v19 = vadd.f32 %v3425_v14, %v8927_v8  ;;  %v3574_v47 = vadd.f32 %v3495_v11, %v8933_v18  ;;  %v7094_v44 = vpop.f32.mrb[41].mxu0  ;;  %v7105_v28 = vpop.f32.mrb[41].mxu1 }
 0x62d   :  { %v3570_v35 = vmul.f32 0.5, %v3569_v19  ;;  %v3575_v7 = vmul.f32 0.5, %v3574_v47 }
 0x62f   :  { %8055 = vtanh.f32 %v3570_v35 }
 0x630   :  { %8057 = vtanh.f32 %v3575_v7 }
 0x631   :  { %v8052_v23 = vpop.eup %8051 }
 0x632   :  { %v3345_v25 = vmul.f32 0.5, %v8052_v23  ;;  %v3565_v51 = vpop.f32.mrb[42].mxu0  ;;  %v8054_v8 = vpop.eup %8053 }
 0x633   :  { %v7116_v63 = vpop.f32.mrb[43].mxu0  ;;  %v3350_v53 = vmul.f32 0.5, %v8054_v8  ;;  %v3566_v9 = vadd.f32 %v8951_v1, %v3565_v51 }
 0x634   :  { %v3346_v60 = vadd.f32 0.5, %v3345_v25 }
 0x635   :  { %v3351_v10 = vadd.f32 0.5, %v3350_v53 }
 0x636   :  { %v3352_v59 = vmul.f32 %v3346_v60, %v3339_v34 }
 0x637   :  { %v3355_v58 = vsub.f32 1.0, %v3351_v10  ;;  %v3357_v47 = vmul.f32 %v3351_v10, %v9253_v0 }
 0x638   :  { %v3353_v62 = vadd.f32 %v3352_v59, %v3126_v43 }
 0x639   :  { %v8056_v18 = vpop.eup %8055 }
 0x63a   :  { %8059 = vtanh.f32 %v3353_v62  ;;  %v3572_v3 = vmul.f32 0.5, %v8056_v18  ;;  %v8058_v14 = vpop.eup %8057 }
 0x63b   :  { %v3577_v19 = vmul.f32 0.5, %v8058_v14 }
 0x63c   :  { %v3573_v2 = vadd.f32 0.5, %v3572_v3 }
 0x63d   :  { %v3578_v28 = vadd.f32 0.5, %v3577_v19 }
 0x63e   :  { %v3579_v13 = vmul.f32 %v3573_v2, %v3566_v9 }
 0x63f   :  { %v3582_v23 = vsub.f32 1.0, %v3578_v28  ;;  %v3584_v1 = vmul.f32 %v3578_v28, %v9256_v61 }
 0x640   :  { %v3580_v11 = vadd.f32 %v3579_v13, %v8945_v41 }
 0x642   :  { %8061 = vtanh.f32 %v3580_v11 }
 0x644   :  { %v8060_v24 = vpop.eup %8059 }
 0x645   :  { %v3356_v44 = vmul.f32 %v8060_v24, %v3355_v58 }
 0x647   :  { %v9339_v35 = vadd.f32 %v3357_v47, %v3356_v44 }
 0x64c   :  { %v8062_v25 = vpop.eup %8061 }
 0x64d   :  { %v3583_v7 = vmul.f32 %v8062_v25, %v3582_v23 }
 0x64f   :  { %v9342_v51 = vadd.f32 %v3584_v1, %v3583_v7 }
 0x651   :  { %7126 = vmatmul.mubr.msk.f32.vlgmr.msra.gmra.mrb[42].mxu1 %vm678_vm2, %v9342_v51  ;;  %7137 = vmatmul.mubr.msk.f32.vlgmr.msra.gmra.mrb[44].mxu0 %vm678_vm2, %v9342_v51 }
 0x652   :  { %7751 = vmatpush3.bf16.msra.mxu1 %v8960_v17  ;;  %7763 = vmatpush3.bf16.msra.mxu0 %v8962_v39 }
 0x653   :  { %7752 = vmatprep.subr.bf16.mxu1 %v8426_v16  ;;  %7764 = vmatprep.subr.bf16.mxu0 %v8426_v16 }
 0x654   :  { %7147 = vmatprep.mubr.msk.f32.mxu1 %vm8427_vm1, %v9730_v32  ;;  %7169 = vmatprep.mubr.msk.f32.mxu0 %vm8427_vm1, %v9730_v32 }
 0x656   :  { %7754 = vmatpush3.bf16.msra.mxu1 %v8978_v49  ;;  %7766 = vmatpush3.bf16.msra.mxu0 %v8980_v55 }
 0x657   :  { %7755 = vmatprep.subr.bf16.mxu1 %v8426_v16  ;;  %7767 = vmatprep.subr.bf16.mxu0 %v8426_v16 }
 0x659   :  { %7148 = vmatmul.mubr.msk.f32.vlgmr.msra.gmra.mrb[44].mxu1 %vm678_vm2, %v9342_v51  ;;  %7170 = vmatmul.mubr.msk.f32.vlgmr.msra.gmra.mrb[44].mxu0 %vm678_vm2, %v9339_v35 }
 0x65a   :  { %7757 = vmatpush3.bf16.msra.mxu1 %v8990_v4  ;;  %7769 = vmatpush3.bf16.msra.mxu0 %v8992_v6 }
 0x65b   :  { %7758 = vmatprep.subr.bf16.mxu1 %v8426_v16  ;;  %7770 = vmatprep.subr.bf16.mxu0 %v8426_v16 }
 0x65c   :  { %7158 = vmatprep.mubr.msk.f32.mxu1 %vm8427_vm1, %v9730_v32  ;;  %7180 = vmatprep.mubr.msk.f32.mxu0 %vm8427_vm1, %v9730_v32 }
 0x65e   :  { %7760 = vmatpush3.bf16.msra.mxu1 %v9001_v20  ;;  %7772 = vmatpush3.bf16.msra.mxu0 %v9003_v57 }
 0x65f   :  { %7773 = vmatprep.subr.bf16.mxu1 %v8426_v16  ;;  %7779 = vmatprep.subr.bf16.mxu0 %v8426_v16 }
 0x661   :  { %7159 = vmatmul.mubr.msk.f32.vlgmr.msra.gmra.mrb[42].mxu1 %vm678_vm2, %v9339_v35  ;;  %7181 = vmatmul.mubr.msk.f32.vlgmr.msra.gmra.mrb[46].mxu0 %vm678_vm2, %v9339_v35 }
 0x662   :  { %7775 = vmatpush3.bf16.msra.mxu1 %v8786_v15  ;;  %7781 = vmatpush3.bf16.msra.mxu0 %v8857_v33 }
 0x663   :  { %7776 = vmatprep.subr.bf16.mxu1 %v8426_v16  ;;  %7782 = vmatprep.subr.bf16.mxu0 %v8426_v16 }
 0x664   :  { %7191 = vmatprep.mubr.msk.f32.mxu1 %vm8427_vm1, %v9730_v32  ;;  %7202 = vmatprep.mubr.msk.f32.mxu0 %vm8427_vm1, %v9730_v32 }
 0x666   :  { %7778 = vmatpush3.bf16.msra.mxu1 %v8809_v22  ;;  %7784 = vmatpush3.bf16.msra.mxu0 %v8871_v36 }
 0x667   :  { %7785 = vmatprep.subr.bf16.mxu1 %v8426_v16  ;;  %7791 = vmatprep.subr.bf16.mxu0 %v8426_v16 }
 0x669   :  { %7192 = vmatmul.mubr.msk.f32.vlgmr.msra.gmra.mrb[46].mxu1 %vm678_vm2, %v9342_v51  ;;  %7203 = vmatmul.mubr.msk.f32.vlgmr.msra.gmra.mrb[48].mxu0 %vm678_vm2, %v9342_v51 }
 0x66a   :  { %7787 = vmatpush3.bf16.msra.mxu1 %v8827_v26  ;;  %7213 = vmatprep.mubr.msk.f32.mxu1 %vm8427_vm1, %v9730_v32 }
 0x66b   :  { %7788 = vmatprep.subr.bf16.mxu1 %v8426_v16  ;;  %7793 = vmatpush3.bf16.msra.mxu0 %v8890_v40 }
 0x66c   :  { %7794 = vmatprep.subr.bf16.mxu0 %v8426_v16  ;;  %7224 = vmatprep.mubr.msk.f32.mxu0 %vm8427_vm1, %v9730_v32 }
 0x66e   :  { %7790 = vmatpush3.bf16.msra.mxu1 %v8850_v31 }
 0x66f   :  { %7797 = vmatprep.subr.bf16.mxu1 %v8426_v16  ;;  %7796 = vmatpush3.bf16.msra.mxu0 %v8898_v46 }
 0x670   :  { %7803 = vmatprep.subr.bf16.mxu0 %v8426_v16 }
 0x671   :  { %7214 = vmatmul.mubr.msk.f32.vlgmr.msra.gmra.mrb[48].mxu1 %vm678_vm2, %v9342_v51 }
 0x672   :  { %7799 = vmatpush3.bf16.msra.mxu1 %v8892_v42  ;;  %7235 = vmatprep.mubr.msk.f32.mxu1 %vm8427_vm1, %v9730_v32 }
 0x673   :  { %7800 = vmatprep.subr.bf16.mxu1 %v8426_v16 }
 0x676   :  { %7802 = vmatpush3.bf16.msra.mxu1 %v8900_v48 }
 0x677   :  { %7815 = vmatprep.subr.bf16.mxu1 %v8426_v16 }
 0x72c   :  { %v3795_v41 = vpop.f32.mrb[44].mxu1  ;;  %v3938_v0 = vpop.f32.mrb[44].mxu0 }
 0x72d   :  { %v7149_v61 = vpop.f32.mrb[45].mxu1  ;;  %v7171_v63 = vpop.f32.mrb[45].mxu0  ;;  %v7952_v18 = vadd.f32 %v9061_v37, %v3938_v0  ;;  %v3796_v28 = vadd.f32 %v9075_v54, %v3795_v41  ;;  %v9422_v0 = vld [vmem:[#allocation11] ss:$0 sm:$0xff] }
 0x72f   :  { %v4018_v3 = vmul.f32 0.5, %v7952_v18 }
 0x734   :  { %v3868_v34 = vpop.f32.mrb[42].mxu1  ;;  %v4008_v60 = vpop.f32.mrb[46].mxu0 }
 0x735   :  { %v7951_v43 = vadd.f32 %v9056_v30, %v3868_v34  ;;  %v7160_v59 = vpop.f32.mrb[43].mxu1  ;;  %v7182_v8 = vpop.f32.mrb[47].mxu0  ;;  %v4009_v37 = vadd.f32 %v9070_v29, %v4008_v60 }
 0x737   :  { %v4013_v62 = vmul.f32 0.5, %v7951_v43 }
 0x739   :  { %8063 = vtanh.f32 %v4013_v62 }
 0x73a   :  { %8065 = vtanh.f32 %v4018_v3 }
 0x73c   :  { %v4095_v53 = vpop.f32.mrb[46].mxu1  ;;  %v4165_v9 = vpop.f32.mrb[48].mxu0 }
 0x73d   :  { %v4239_v2 = vadd.f32 %v4095_v53, %v8923_v5  ;;  %v4244_v13 = vadd.f32 %v4165_v9, %v8929_v12  ;;  %v7193_v10 = vpop.f32.mrb[47].mxu1  ;;  %v7204_v14 = vpop.f32.mrb[49].mxu0 }
 0x73f   :  { %v4240_v11 = vmul.f32 0.5, %v4239_v2  ;;  %v4245_v19 = vmul.f32 0.5, %v4244_v13 }
 0x741   :  { %8067 = vtanh.f32 %v4240_v11 }
 0x742   :  { %8069 = vtanh.f32 %v4245_v19 }
 0x743   :  { %v8064_v58 = vpop.eup %8063 }
 0x744   :  { %v4015_v30 = vmul.f32 0.5, %v8064_v58  ;;  %v4235_v24 = vpop.f32.mrb[48].mxu1  ;;  %v8066_v5 = vpop.eup %8065 }
 0x745   :  { %v7215_v47 = vpop.f32.mrb[49].mxu1  ;;  %v4020_v7 = vmul.f32 0.5, %v8066_v5  ;;  %v4236_v61 = vadd.f32 %v9422_v0, %v4235_v24 }
 0x746   :  { %v4016_v44 = vadd.f32 0.5, %v4015_v30  ;;  %v9507_v30 = vld [vmem:[%s9695_s17] ss:$0 sm:$0xff] }
 0x747   :  { %v4021_v43 = vadd.f32 0.5, %v4020_v7 }
 0x748   :  { %v4022_v23 = vmul.f32 %v4016_v44, %v4009_v37  ;;  %v9513_v44 = vld [vmem:[%s9696_s18] ss:$0 sm:$0xff] }
 0x749   :  { %v4025_v54 = vsub.f32 1.0, %v4021_v43  ;;  %v4027_v8 = vmul.f32 %v4021_v43, %v9339_v35 }
 0x74a   :  { %v4023_v25 = vadd.f32 %v4022_v23, %v3796_v28 }
 0x74b   :  { %v8068_v12 = vpop.eup %8067 }
 0x74c   :  { %8071 = vtanh.f32 %v4023_v25  ;;  %v4242_v1 = vmul.f32 0.5, %v8068_v12  ;;  %v8070_v59 = vpop.eup %8069 }
 0x74d   :  { %v4247_v41 = vmul.f32 0.5, %v8070_v59 }
 0x74e   :  { %v4243_v63 = vadd.f32 0.5, %v4242_v1 }
 0x74f   :  { %v4248_v18 = vadd.f32 0.5, %v4247_v41  ;;  %v9521_v41 = vld [vmem:[%s9698_s20] ss:$0 sm:$0xff] }
 0x750   :  { %v4249_v34 = vmul.f32 %v4243_v63, %v4236_v61 }
 0x751   :  { %v4252_v53 = vsub.f32 1.0, %v4248_v18  ;;  %v4254_v2 = vmul.f32 %v4248_v18, %v9342_v51 }
 0x752   :  { %v4250_v29 = vadd.f32 %v4249_v34, %v8943_v38 }
 0x754   :  { %8073 = vtanh.f32 %v4250_v29 }
 0x756   :  { %v8072_v60 = vpop.eup %8071 }
 0x757   :  { %v4026_v62 = vmul.f32 %v8072_v60, %v4025_v54 }
 0x759   :  { %v9427_v3 = vadd.f32 %v4027_v8, %v4026_v62 }
 0x75e   :  { %v8074_v9 = vpop.eup %8073 }
 0x75f   :  { %v4253_v13 = vmul.f32 %v8074_v9, %v4252_v53 }
 0x761   :  { %v9430_v10 = vadd.f32 %v4254_v2, %v4253_v13 }
 0x763   :  { %7225 = vmatmul.mubr.msk.f32.vlgmr.msra.gmra.mrb[50].mxu0 %vm678_vm2, %v9430_v10  ;;  %7236 = vmatmul.mubr.msk.f32.vlgmr.msra.gmra.mrb[50].mxu1 %vm678_vm2, %v9430_v10 }
 0x764   :  { %7805 = vmatpush3.bf16.msra.mxu0 %v8960_v17  ;;  %7817 = vmatpush3.bf16.msra.mxu1 %v8962_v39 }
 0x765   :  { %7806 = vmatprep.subr.bf16.mxu0 %v8426_v16  ;;  %7818 = vmatprep.subr.bf16.mxu1 %v8426_v16 }
 0x766   :  { %7246 = vmatprep.mubr.msk.f32.mxu0 %vm8427_vm1, %v9730_v32  ;;  %7268 = vmatprep.mubr.msk.f32.mxu1 %vm8427_vm1, %v9730_v32 }
 0x768   :  { %7808 = vmatpush3.bf16.msra.mxu0 %v8978_v49  ;;  %7820 = vmatpush3.bf16.msra.mxu1 %v8980_v55 }
 0x769   :  { %7809 = vmatprep.subr.bf16.mxu0 %v8426_v16  ;;  %7821 = vmatprep.subr.bf16.mxu1 %v8426_v16 }
 0x76b   :  { %7247 = vmatmul.mubr.msk.f32.vlgmr.msra.gmra.mrb[52].mxu0 %vm678_vm2, %v9430_v10  ;;  %7269 = vmatmul.mubr.msk.f32.vlgmr.msra.gmra.mrb[50].mxu1 %vm678_vm2, %v9427_v3 }
 0x76c   :  { %7811 = vmatpush3.bf16.msra.mxu0 %v8990_v4  ;;  %7823 = vmatpush3.bf16.msra.mxu1 %v8992_v6 }
 0x76d   :  { %7812 = vmatprep.subr.bf16.mxu0 %v8426_v16  ;;  %7824 = vmatprep.subr.bf16.mxu1 %v8426_v16 }
 0x76e   :  { %7257 = vmatprep.mubr.msk.f32.mxu0 %vm8427_vm1, %v9730_v32  ;;  %7279 = vmatprep.mubr.msk.f32.mxu1 %vm8427_vm1, %v9730_v32 }
 0x770   :  { %7814 = vmatpush3.bf16.msra.mxu0 %v9001_v20  ;;  %7826 = vmatpush3.bf16.msra.mxu1 %v9003_v57 }
 0x771   :  { %7827 = vmatprep.subr.bf16.mxu0 %v8426_v16  ;;  %7833 = vmatprep.subr.bf16.mxu1 %v8426_v16 }
 0x773   :  { %7258 = vmatmul.mubr.msk.f32.vlgmr.msra.gmra.mrb[50].mxu0 %vm678_vm2, %v9427_v3  ;;  %7280 = vmatmul.mubr.msk.f32.vlgmr.msra.gmra.mrb[52].mxu1 %vm678_vm2, %v9427_v3 }
 0x774   :  { %7829 = vmatpush3.bf16.msra.mxu0 %v8786_v15  ;;  %7835 = vmatpush3.bf16.msra.mxu1 %v8857_v33 }
 0x775   :  { %7830 = vmatprep.subr.bf16.mxu0 %v8426_v16  ;;  %7836 = vmatprep.subr.bf16.mxu1 %v8426_v16 }
 0x776   :  { %7290 = vmatprep.mubr.msk.f32.mxu0 %vm8427_vm1, %v9730_v32  ;;  %7301 = vmatprep.mubr.msk.f32.mxu1 %vm8427_vm1, %v9730_v32 }
 0x778   :  { %7832 = vmatpush3.bf16.msra.mxu0 %v8809_v22  ;;  %7838 = vmatpush3.bf16.msra.mxu1 %v8871_v36 }
 0x779   :  { %7839 = vmatprep.subr.bf16.mxu0 %v8426_v16  ;;  %7845 = vmatprep.subr.bf16.mxu1 %v8426_v16 }
 0x77b   :  { %7291 = vmatmul.mubr.msk.f32.vlgmr.msra.gmra.mrb[54].mxu0 %vm678_vm2, %v9430_v10  ;;  %7302 = vmatmul.mubr.msk.f32.vlgmr.msra.gmra.mrb[54].mxu1 %vm678_vm2, %v9430_v10 }
 0x77c   :  { %7841 = vmatpush3.bf16.msra.mxu0 %v8827_v26  ;;  %7312 = vmatprep.mubr.msk.f32.mxu0 %vm8427_vm1, %v9730_v32 }
 0x77d   :  { %7842 = vmatprep.subr.bf16.mxu0 %v8426_v16  ;;  %7847 = vmatpush3.bf16.msra.mxu1 %v8890_v40 }
 0x77e   :  { %7848 = vmatprep.subr.bf16.mxu1 %v8426_v16  ;;  %7323 = vmatprep.mubr.msk.f32.mxu1 %vm8427_vm1, %v9730_v32 }
 0x780   :  { %7844 = vmatpush3.bf16.msra.mxu0 %v8850_v31 }
 0x781   :  { %7851 = vmatprep.subr.bf16.mxu0 %v8426_v16  ;;  %7850 = vmatpush3.bf16.msra.mxu1 %v8898_v46 }
 0x782   :  { %7857 = vmatprep.subr.bf16.mxu1 %v8426_v16 }
 0x783   :  { %7313 = vmatmul.mubr.msk.f32.vlgmr.msra.gmra.mrb[56].mxu0 %vm678_vm2, %v9430_v10 }
 0x784   :  { %7853 = vmatpush3.bf16.msra.mxu0 %v8892_v42  ;;  %7334 = vmatprep.mubr.msk.f32.mxu0 %vm8427_vm1, %v9730_v32 }
 0x785   :  { %7854 = vmatprep.subr.bf16.mxu0 %v8426_v16 }
 0x788   :  { %7856 = vmatpush3.bf16.msra.mxu0 %v8900_v48 }
 0x789   :  { %7869 = vmatprep.subr.bf16.mxu0 %v8426_v16 }
 0x83e   :  { %v4465_v38 = vpop.f32.mrb[52].mxu0  ;;  %v4608_v35 = vpop.f32.mrb[50].mxu1 }
 0x83f   :  { %v7248_v51 = vpop.f32.mrb[53].mxu0  ;;  %v7270_v14 = vpop.f32.mrb[51].mxu1  ;;  %v7954_v28 = vadd.f32 %v9513_v44, %v4608_v35 }
 0x841   :  { %v4688_v23 = vmul.f32 0.5, %v7954_v28 }
 0x846   :  { %v4538_v11 = vpop.f32.mrb[50].mxu0  ;;  %v4678_v58 = vpop.f32.mrb[52].mxu1 }
 0x847   :  { %v7953_v19 = vadd.f32 %v9507_v30, %v4538_v11  ;;  %v7259_v24 = vpop.f32.mrb[51].mxu0  ;;  %v7281_v47 = vpop.f32.mrb[53].mxu1  ;;  %v4679_v60 = vadd.f32 %v9521_v41, %v4678_v58 }
 0x849   :  { %v4683_v37 = vmul.f32 0.5, %v7953_v19 }
 0x84b   :  { %8075 = vtanh.f32 %v4683_v37 }
 0x84c   :  { %8077 = vtanh.f32 %v4688_v23 }
 0x84e   :  { %v4765_v5 = vpop.f32.mrb[54].mxu0  ;;  %v4835_v25 = vpop.f32.mrb[54].mxu1 }
 0x84f   :  { %v4909_v12 = vadd.f32 %v4765_v5, %v8913_v56  ;;  %v4914_v1 = vadd.f32 %v4835_v25, %v8939_v27  ;;  %v7292_v7 = vpop.f32.mrb[55].mxu0  ;;  %v7303_v61 = vpop.f32.mrb[55].mxu1  ;;  %v9527_v27 = vld [vmem:[%s9697_s19] ss:$0 sm:$0xff] }
 0x850   :  { %v4466_v8 = vadd.f32 %v9527_v27, %v4465_v38 }
 0x851   :  { %v4910_v63 = vmul.f32 0.5, %v4909_v12  ;;  %v4915_v59 = vmul.f32 0.5, %v4914_v1 }
 0x853   :  { %8079 = vtanh.f32 %v4910_v63 }
 0x854   :  { %8081 = vtanh.f32 %v4915_v59 }
 0x855   :  { %v8076_v34 = vpop.eup %8075 }
 0x856   :  { %v4685_v43 = vmul.f32 0.5, %v8076_v34  ;;  %v4905_v29 = vpop.f32.mrb[56].mxu0  ;;  %v8078_v18 = vpop.eup %8077 }
 0x857   :  { %v7314_v54 = vpop.f32.mrb[57].mxu0  ;;  %v4690_v13 = vmul.f32 0.5, %v8078_v18  ;;  %v4906_v35 = vadd.f32 %v9422_v0, %v4905_v29 }
 0x858   :  { %v4686_v56 = vadd.f32 0.5, %v4685_v43 }
 0x859   :  { %v4691_v11 = vadd.f32 0.5, %v4690_v13 }
 0x85a   :  { %v4692_v62 = vmul.f32 %v4686_v56, %v4679_v60 }
 0x85b   :  { %v4695_v24 = vsub.f32 1.0, %v4691_v11  ;;  %v4697_v37 = vmul.f32 %v4691_v11, %v9427_v3 }
 0x85c   :  { %v4693_v53 = vadd.f32 %v4692_v62, %v4466_v8 }
 0x85d   :  { %v8080_v9 = vpop.eup %8079 }
 0x85e   :  { %8083 = vtanh.f32 %v4693_v53  ;;  %v4912_v2 = vmul.f32 0.5, %v8080_v9  ;;  %v8082_v58 = vpop.eup %8081 }
 0x85f   :  { %v4917_v47 = vmul.f32 0.5, %v8082_v58 }
 0x860   :  { %v4913_v51 = vadd.f32 0.5, %v4912_v2 }
 0x861   :  { %v4918_v23 = vadd.f32 0.5, %v4917_v47 }
 0x862   :  { %v4919_v14 = vmul.f32 %v4913_v51, %v4906_v35 }
 0x863   :  { %v4922_v25 = vsub.f32 1.0, %v4918_v23  ;;  %v4924_v1 = vmul.f32 %v4918_v23, %v9430_v10 }
 0x864   :  { %v4920_v19 = vadd.f32 %v4919_v14, %v8949_v50 }
 0x866   :  { %8085 = vtanh.f32 %v4920_v19 }
 0x868   :  { %v8084_v38 = vpop.eup %8083 }
 0x869   :  { %v4696_v28 = vmul.f32 %v8084_v38, %v4695_v24 }
 0x86b   :  { %v9533_v5 = vadd.f32 %v4697_v37, %v4696_v28 }
 0x870   :  { %v8086_v12 = vpop.eup %8085 }
 0x871   :  { %v4923_v7 = vmul.f32 %v8086_v12, %v4922_v25 }
 0x873   :  { %v9536_v61 = vadd.f32 %v4924_v1, %v4923_v7 }
 0x875   :  { %7324 = vmatmul.mubr.msk.f32.vlgmr.msra.gmra.mrb[56].mxu1 %vm678_vm2, %v9536_v61  ;;  %7335 = vmatmul.mubr.msk.f32.vlgmr.msra.gmra.mrb[58].mxu0 %vm678_vm2, %v9536_v61 }
 0x876   :  { %7859 = vmatpush3.bf16.msra.mxu1 %v8960_v17  ;;  %7871 = vmatpush3.bf16.msra.mxu0 %v8962_v39 }
 0x877   :  { %7860 = vmatprep.subr.bf16.mxu1 %v8426_v16  ;;  %7872 = vmatprep.subr.bf16.mxu0 %v8426_v16 }
 0x878   :  { %7345 = vmatprep.mubr.msk.f32.mxu1 %vm8427_vm1, %v9730_v32  ;;  %7367 = vmatprep.mubr.msk.f32.mxu0 %vm8427_vm1, %v9730_v32 }
 0x87a   :  { %7862 = vmatpush3.bf16.msra.mxu1 %v8978_v49  ;;  %7874 = vmatpush3.bf16.msra.mxu0 %v8980_v55 }
 0x87b   :  { %7863 = vmatprep.subr.bf16.mxu1 %v8426_v16  ;;  %7875 = vmatprep.subr.bf16.mxu0 %v8426_v16 }
 0x87d   :  { %7346 = vmatmul.mubr.msk.f32.vlgmr.msra.gmra.mrb[58].mxu1 %vm678_vm2, %v9536_v61  ;;  %7368 = vmatmul.mubr.msk.f32.vlgmr.msra.gmra.mrb[58].mxu0 %vm678_vm2, %v9533_v5 }
 0x87e   :  { %7865 = vmatpush3.bf16.msra.mxu1 %v8990_v4  ;;  %7877 = vmatpush3.bf16.msra.mxu0 %v8992_v6 }
 0x87f   :  { %7866 = vmatprep.subr.bf16.mxu1 %v8426_v16  ;;  %7878 = vmatprep.subr.bf16.mxu0 %v8426_v16 }
 0x880   :  { %7356 = vmatprep.mubr.msk.f32.mxu1 %vm8427_vm1, %v9730_v32  ;;  %7378 = vmatprep.mubr.msk.f32.mxu0 %vm8427_vm1, %v9730_v32 }
 0x882   :  { %7868 = vmatpush3.bf16.msra.mxu1 %v9001_v20  ;;  %7880 = vmatpush3.bf16.msra.mxu0 %v9003_v57 }
 0x883   :  { %7881 = vmatprep.subr.bf16.mxu1 %v8426_v16  ;;  %7887 = vmatprep.subr.bf16.mxu0 %v8426_v16 }
 0x885   :  { %7357 = vmatmul.mubr.msk.f32.vlgmr.msra.gmra.mrb[56].mxu1 %vm678_vm2, %v9533_v5  ;;  %7379 = vmatmul.mubr.msk.f32.vlgmr.msra.gmra.mrb[60].mxu0 %vm678_vm2, %v9533_v5 }
 0x886   :  { %7883 = vmatpush3.bf16.msra.mxu1 %v8786_v15  ;;  %7889 = vmatpush3.bf16.msra.mxu0 %v8857_v33 }
 0x887   :  { %7884 = vmatprep.subr.bf16.mxu1 %v8426_v16  ;;  %7890 = vmatprep.subr.bf16.mxu0 %v8426_v16 }
 0x888   :  { %7389 = vmatprep.mubr.msk.f32.mxu1 %vm8427_vm1, %v9730_v32  ;;  %7400 = vmatprep.mubr.msk.f32.mxu0 %vm8427_vm1, %v9730_v32 }
 0x88a   :  { %7886 = vmatpush3.bf16.msra.mxu1 %v8809_v22  ;;  %7892 = vmatpush3.bf16.msra.mxu0 %v8871_v36 }
 0x88b   :  { %7893 = vmatprep.subr.bf16.mxu1 %v8426_v16  ;;  %7899 = vmatprep.subr.bf16.mxu0 %v8426_v16 }
 0x88d   :  { %7390 = vmatmul.mubr.msk.f32.vlgmr.msra.gmra.mrb[60].mxu1 %vm678_vm2, %v9536_v61  ;;  %7401 = vmatmul.mubr.msk.f32.vlgmr.msra.gmra.mrb[62].mxu0 %vm678_vm2, %v9536_v61 }
 0x88e   :  { %7895 = vmatpush3.bf16.msra.mxu1 %v8827_v26  ;;  %7411 = vmatprep.mubr.msk.f32.mxu1 %vm8427_vm1, %v9730_v32 }
 0x88f   :  { %7896 = vmatprep.subr.bf16.mxu1 %v8426_v16  ;;  %7901 = vmatpush3.bf16.msra.mxu0 %v8890_v40 }
 0x890   :  { %7902 = vmatprep.subr.bf16.mxu0 %v8426_v16  ;;  %7422 = vmatprep.mubr.msk.f32.mxu0 %vm8427_vm1, %v9730_v32 }
 0x892   :  { %7898 = vmatpush3.bf16.msra.mxu1 %v8850_v31 }
 0x893   :  { %7905 = vmatprep.subr.bf16.mxu1 %v8426_v16  ;;  %7904 = vmatpush3.bf16.msra.mxu0 %v8898_v46 }
 0x894   :  { %7911 = vmatprep.subr.bf16.mxu0 %v8426_v16 }
 0x895   :  { %7412 = vmatmul.mubr.msk.f32.vlgmr.msra.gmra.mrb[62].mxu1 %vm678_vm2, %v9536_v61 }
 0x896   :  { %7907 = vmatpush3.bf16.msra.mxu1 %v8892_v42  ;;  %7433 = vmatprep.mubr.msk.f32.mxu1 %vm8427_vm1, %v9730_v32 }
 0x897   :  { %7908 = vmatprep.subr.bf16.mxu1 %v8426_v16 }
 0x89a   :  { %7910 = vmatpush3.bf16.msra.mxu1 %v8900_v48 }
 0x89b   :  { %7923 = vmatprep.subr.bf16.mxu1 %v8426_v16 }
 0x950   :  { %v5135_v15 = vpop.f32.mrb[58].mxu1  ;;  %v5278_v22 = vpop.f32.mrb[58].mxu0 }
 0x951   :  { %v7347_v26 = vpop.f32.mrb[59].mxu1  ;;  %v7369_v31 = vpop.f32.mrb[59].mxu0  ;;  %v7956_v3 = vadd.f32 %v9513_v44, %v5278_v22  ;;  %v5136_v2 = vadd.f32 %v9527_v27, %v5135_v15 }
 0x953   :  { %v5358_v10 = vmul.f32 0.5, %v7956_v3 }
 0x958   :  { %v5208_v33 = vpop.f32.mrb[56].mxu1  ;;  %v5348_v36 = vpop.f32.mrb[60].mxu0 }
 0x959   :  { %v7955_v40 = vadd.f32 %v9507_v30, %v5208_v33  ;;  %v7358_v46 = vpop.f32.mrb[57].mxu1  ;;  %v7380_v50 = vpop.f32.mrb[61].mxu0  ;;  %v5349_v53 = vadd.f32 %v9521_v41, %v5348_v36 }
 0x95b   :  { %v5353_v42 = vmul.f32 0.5, %v7955_v40 }
 0x95d   :  { %8087 = vtanh.f32 %v5353_v42 }
 0x95e   :  { %8089 = vtanh.f32 %v5358_v10 }
 0x960   :  { %v5435_v63 = vpop.f32.mrb[60].mxu1  ;;  %v5505_v34 = vpop.f32.mrb[62].mxu0 }
 0x961   :  { %v5579_v48 = vadd.f32 %v5435_v63, %v8909_v52  ;;  %v5584_v43 = vadd.f32 %v5505_v34, %v8935_v21  ;;  %v7391_v59 = vpop.f32.mrb[61].mxu1  ;;  %v7402_v29 = vpop.f32.mrb[63].mxu0 }
 0x963   :  { %v5580_v54 = vmul.f32 0.5, %v5579_v48  ;;  %v5585_v8 = vmul.f32 0.5, %v5584_v43 }
 0x965   :  { %8091 = vtanh.f32 %v5580_v54 }
 0x966   :  { %8093 = vtanh.f32 %v5585_v8 }
 0x967   :  { %v8088_v60 = vpop.eup %8087 }
 0x968   :  { %v5355_v56 = vmul.f32 0.5, %v8088_v60  ;;  %v5575_v62 = vpop.f32.mrb[62].mxu1  ;;  %v8090_v52 = vpop.eup %8089 }
 0x969   :  { %v7413_v18 = vpop.f32.mrb[63].mxu1  ;;  %v5360_v14 = vmul.f32 0.5, %v8090_v52  ;;  %v5576_v11 = vadd.f32 %v9422_v0, %v5575_v62 }
 0x96a   :  { %v5356_v9 = vadd.f32 0.5, %v5355_v56 }
 0x96b   :  { %v5361_v24 = vadd.f32 0.5, %v5360_v14 }
 0x96c   :  { %v5362_v13 = vmul.f32 %v5356_v9, %v5349_v53 }
 0x96d   :  { %v5365_v37 = vsub.f32 1.0, %v5361_v24  ;;  %v5367_v25 = vmul.f32 %v5361_v24, %v9533_v5 }
 0x96e   :  { %v5363_v35 = vadd.f32 %v5362_v13, %v5136_v2 }
 0x96f   :  { %v8092_v21 = vpop.eup %8091 }
 0x970   :  { %8095 = vtanh.f32 %v5363_v35  ;;  %v5582_v51 = vmul.f32 0.5, %v8092_v21  ;;  %v8094_v47 = vpop.eup %8093 }
 0x971   :  { %v5587_v28 = vmul.f32 0.5, %v8094_v47 }
 0x972   :  { %v5583_v58 = vadd.f32 0.5, %v5582_v51 }
 0x973   :  { %v5588_v1 = vadd.f32 0.5, %v5587_v28 }
 0x974   :  { %v5589_v19 = vmul.f32 %v5583_v58, %v5576_v11 }
 0x975   :  { %v5592_v15 = vsub.f32 1.0, %v5588_v1  ;;  %v5594_v0 = vmul.f32 %v5588_v1, %v9536_v61 }
 0x976   :  { %v5590_v38 = vadd.f32 %v5589_v19, %v8947_v45  ;;  %v6039_v45 = vld [vmem:[#allocation20] sm:$0xff] }
 0x978   :  { %8097 = vtanh.f32 %v5590_v38 }
 0x97a   :  { %v8096_v23 = vpop.eup %8095 }
 0x97b   :  { %v5366_v12 = vmul.f32 %v8096_v23, %v5365_v37 }
 0x97d   :  { %v9619_v7 = vadd.f32 %v5367_v25, %v5366_v12 }
 0x982   :  { %v8098_v22 = vpop.eup %8097 }
 0x983   :  { %v5593_v26 = vmul.f32 %v8098_v22, %v5592_v15 }
 0x985   :  { %v5595_v31 = vadd.f32 %v5594_v0, %v5593_v26 }
 0x987   :  { %7423 = vmatmul.mubr.msk.f32.vlgmr.msra.gmra.mrb[64].mxu0 %vm678_vm2, %v5595_v31  ;;  %7434 = vmatmul.mubr.msk.f32.vlgmr.msra.gmra.mrb[64].mxu1 %vm678_vm2, %v5595_v31 }
 0x988   :  { %7913 = vmatpush3.bf16.msra.mxu0 %v8960_v17  ;;  %7925 = vmatpush3.bf16.msra.mxu1 %v8962_v39  ;;  %v6040_v17 = vld [vmem:[#allocation20 + $0x8] sm:$0xff]  ;;  %v6041_v39 = vld [vmem:[#allocation20 + $0x10] sm:$0xff] }
 0x989   :  { %7914 = vmatprep.subr.bf16.mxu0 %v8426_v16  ;;  %7926 = vmatprep.subr.bf16.mxu1 %v8426_v16 }
 0x98a   :  { %7444 = vmatprep.mubr.msk.f32.mxu0 %vm8427_vm1, %v9730_v32  ;;  %7466 = vmatprep.mubr.msk.f32.mxu1 %vm8427_vm1, %v9730_v32 }
 0x98c   :  { %7916 = vmatpush3.bf16.msra.mxu0 %v8978_v49  ;;  %7928 = vmatpush3.bf16.msra.mxu1 %v8980_v55  ;;  %v7936_v49 = vpack.c.bf16 %v6040_v17, %v6039_v45  ;;  %v6042_v55 = vld [vmem:[#allocation20 + $0x18] sm:$0xff] }
 0x98d   :  { %7917 = vmatprep.subr.bf16.mxu0 %v8426_v16  ;;  %7929 = vmatprep.subr.bf16.mxu1 %v8426_v16 }
 0x98f   :  { %7445 = vmatmul.mubr.msk.f32.vlgmr.msra.gmra.mrb[66].mxu0 %vm678_vm2, %v5595_v31  ;;  %7467 = vmatmul.mubr.msk.f32.vlgmr.msra.gmra.mrb[64].mxu1 %vm678_vm2, %v9619_v7 }
 0x990   :  { %7919 = vmatpush3.bf16.msra.mxu0 %v8990_v4  ;;  %7931 = vmatpush3.bf16.msra.mxu1 %v8992_v6  ;;  %v7939_v4 = vpack.c.bf16 %v6042_v55, %v6041_v39 }
 0x991   :  { %7920 = vmatprep.subr.bf16.mxu0 %v8426_v16  ;;  %7932 = vmatprep.subr.bf16.mxu1 %v8426_v16 }
 0x992   :  { %7455 = vmatprep.mubr.msk.f32.mxu0 %vm8427_vm1, %v9730_v32  ;;  %7477 = vmatprep.mubr.msk.f32.mxu1 %vm8427_vm1, %v9730_v32 }
 0x994   :  { %7922 = vmatpush3.bf16.msra.mxu0 %v9001_v20  ;;  %7934 = vmatpush3.bf16.msra.mxu1 %v9003_v57 }
 0x995   :  { %7935 = vmatprep.subr.bf16.mxu0 %v8426_v16 }
 0x997   :  { %7456 = vmatmul.mubr.msk.f32.vlgmr.msra.gmra.mrb[64].mxu0 %vm678_vm2, %v9619_v7  ;;  %7478 = vmatmul.mubr.msk.f32.vlgmr.msra.gmra.mrb[66].mxu1 %vm678_vm2, %v9619_v7 }
 0x998   :  { %7488 = vmatprep.mubr.msk.f32.mxu0 %vm8427_vm1, %v9730_v32  ;;  %7937 = vmatpush3.bf16.msra.mxu0 %v7936_v49 }
 0x999   :  { %7938 = vmatprep.subr.bf16.mxu0 %v8426_v16 }
 0x99c   :  { %7940 = vmatpush3.bf16.msra.mxu0 %v7939_v4 }
 0xa62   :  { %v5805_v6 = vpop.f32.mrb[66].mxu0  ;;  %v5948_v20 = vpop.f32.mrb[64].mxu1 }
 0xa63   :  { %v7446_v57 = vpop.f32.mrb[67].mxu0  ;;  %v7468_v5 = vpop.f32.mrb[65].mxu1  ;;  %v7958_v50 = vadd.f32 %v9513_v44, %v5948_v20  ;;  %v5806_v34 = vadd.f32 %v9527_v27, %v5805_v6 }
 0xa65   :  { %v6028_v42 = vmul.f32 0.5, %v7958_v50 }
 0xa6a   :  { %v5878_v61 = vpop.f32.mrb[64].mxu0  ;;  %v6018_v33 = vpop.f32.mrb[66].mxu1 }
 0xa6b   :  { %v7957_v36 = vadd.f32 %v9507_v30, %v5878_v61  ;;  %v7457_v40 = vpop.f32.mrb[65].mxu0  ;;  %v7479_v32 = vpop.f32.mrb[67].mxu1  ;;  %v6019_v16 = vadd.f32 %v9521_v41, %v6018_v33  ;;  %v6243_v41 = vld [vmem:[%s9700_s22] ss:$0 sm:$0xff] }
 0xa6d   :  { %v6023_v46 = vmul.f32 0.5, %v7957_v36 }
 0xa6f   :  { %8099 = vtanh.f32 %v6023_v46 }
 0xa70   :  { %8101 = vtanh.f32 %v6028_v42 }
 0xa79   :  { %v8100_v3 = vpop.eup %8099 }
 0xa7a   :  { %v6025_v10 = vmul.f32 0.5, %v8100_v3  ;;  %v8102_v43 = vpop.eup %8101 }
 0xa7b   :  { %v6030_v30 = vmul.f32 0.5, %v8102_v43 }
 0xa7c   :  { %v6026_v63 = vadd.f32 0.5, %v6025_v10 }
 0xa7d   :  { %v6031_v29 = vadd.f32 0.5, %v6030_v30 }
 0xa7e   :  { %v6032_v48 = vmul.f32 %v6026_v63, %v6019_v16 }
 0xa7f   :  { %v6035_v54 = vsub.f32 1.0, %v6031_v29  ;;  %v6037_v44 = vmul.f32 %v6031_v29, %v9619_v7 }
 0xa80   :  { %v6033_v59 = vadd.f32 %v6032_v48, %v5806_v34 }
 0xa82   :  { %8103 = vtanh.f32 %v6033_v59 }
 0xa8c   :  { %v8104_v60 = vpop.eup %8103 }
 0xa8d   :  { %v6036_v56 = vmul.f32 %v8104_v60, %v6035_v54 }
 0xa8f   :  { %v6038_v8 = vadd.f32 %v6037_v44, %v6036_v56 }
 0xa91   :  { %7489 = vmatmul.mubr.msk.f32.vlgmr.msra.gmra.mrb[68].mxu0 %vm678_vm2, %v6038_v8 }
 0xb64   :  { %v6119_v27 = vpop.f32.mrb[68].mxu0 }
 0xb65   :  { %v6120_v62 = vadd.f32 %v6243_v41, %v6119_v27  ;;  %v7490_v18 = vpop.f32.mrb[69].mxu0 }
 0xb67   :  { %6123 = vst [vmem:[#allocation22] sm:$0xff] %v6120_v62 }
 0xb68   :  { %8385 = shalt.err (!%p8382_p2)
}
 0xb69   :  { %s8386_s9 = scalar_lea.hbm %s9701_s23, 128 }
 0xb6a   :  { %p8387_p3 = scmp.ne.s32.totalorder %s9701_s23, %s8386_s9  ;;  %p8390_p4 = scmp.lt.u32.totalorder %s8386_s9, %s9701_s23 }
 0xb6c   :  { %p8392_p5 = pnand %p8390_p4, %p8387_p3 }
 0xb6e   :  { %8395 = shalt.err (!%p8392_p5)
}
 0xb6f   :  { %6133 = dma.vmem_to_hbm [thread:$0]  %s6131_s12, 128, %s9701_s23, [#allocation4]  }
 0xb70   :  { %8410 = dma.done.wait [#allocation4], 128  }
 0xb71   :  { %8411 = vsyncadd [#allocation4], 4294967168 }
 0xb72   :  { %6137 = vsyncpa [#allocation3], 1 }
 0xb73   :  { %6138 = vsyncpa [#allocation6], 1 }
 0xb74   :  { %6139 = vsyncpa [#allocation9], 1 }
 0xb75   :  { %6140 = vsyncpa [#allocation12], 1 }
 0xb76   :  { %6141 = vsyncpa [#allocation15], 1 }
 0xb77   :  { %6142 = vsyncpa [#allocation18], 1 }
 0xb78   :  { %6143 = vsyncpa [#allocation21], 1 }
 0xb79   :  { %6144 = vsyncpa [#allocation4], 1 }

</bundles_post_ra>
